<compile_context>
chip_gen: v6e
topology: v6e:2x2x1
jax: 0.10.0
libtpu: 0.0.40
codegen_flags: <defaults>
</compile_context>

<pallas_src>
import functools

import jax
import jax.numpy as jnp
from jax.experimental import pallas as pl
from jax.experimental.pallas import tpu as pltpu


_VMEM_LIMIT = 48 * 1024 * 1024     # explicit scoped-VMEM cap; safe on v5e/v6e/v7x


# ------------------------------ small helpers --------------------------------

def _pick_div(n, target):
    """Largest divisor of n that is <= target (used for leading-dim tiles)."""
    t = min(n, max(1, target))
    for d in range(t, 0, -1):
        if n % d == 0:
            return d
    return 1


def _pick_row_tile(n, target):
    """Row tile for blocks whose tiled axis is the second-minor dim:
    must equal n or be a multiple of 8 (TPU sublane rule)."""
    if n <= target:
        return n
    for d in range(min(n, target), 7, -1):
        if n % d == 0 and d % 8 == 0:
            return d
    return n


def _ln(x, g, b, eps):
    """LayerNorm over the last axis (f32 math)."""
    mean = jnp.mean(x, axis=-1, keepdims=True)
    xc = x - mean
    var = jnp.mean(xc * xc, axis=-1, keepdims=True)
    return xc * jax.lax.rsqrt(var + eps) * g + b


def conv1d_as_matrix(w, p_len, out_channel_major):
    """Express Conv1d(in_ch->out_ch, kernel=3, padding=1) over a length-p_len signal
    as a dense (p_len*in_ch, p_len*out_ch) matrix (exact math).
    Input layout:  position-major (j*in_ch + i).
    Output layout: position-major (p*out_ch + o) or channel-major (o*p_len + p)."""
    out_ch, in_ch, K = w.shape
    mat = jnp.zeros((p_len * in_ch, p_len * out_ch), jnp.float32)
    for p in range(p_len):
        for k in range(K):
            j = p + k - (K // 2)
            if 0 <= j < p_len:
                blk = w[:, :, k].T                      # (in_ch, out_ch)
                if out_channel_major:
                    mat = mat.at[j * in_ch:(j + 1) * in_ch, p::p_len].add(blk)
                else:
                    mat = mat.at[j * in_ch:(j + 1) * in_ch,
                                 p * out_ch:(p + 1) * out_ch].add(blk)
    return mat


# ----------------------------- Pallas kernels --------------------------------

def _revin_norm_kernel(x_ref, w_ref, b_ref, xn_ref, mu_ref, sd_ref, *, eps):
    x = x_ref[...]                                       # (Bb, C, L) f32, L on lanes
    mean = jnp.mean(x, axis=-1, keepdims=True)           # (Bb, C, 1)
    xc = x - mean
    var = jnp.mean(xc * xc, axis=-1, keepdims=True)      # unbiased=False
    std = jnp.sqrt(var + eps)
    xn_ref[...] = (xc / std) * w_ref[...] + b_ref[...]
    mu_ref[...] = mean
    sd_ref[...] = std


def revin_norm(xt, w, b, eps):
    B, C, L = xt.shape
    Bb = _pick_div(B, max(1, 512 // max(C, 1)))
    return pl.pallas_call(
        functools.partial(_revin_norm_kernel, eps=eps),
        out_shape=(jax.ShapeDtypeStruct((B, C, L), jnp.float32),
                   jax.ShapeDtypeStruct((B, C, 1), jnp.float32),
                   jax.ShapeDtypeStruct((B, C, 1), jnp.float32)),
        grid_spec=pltpu.PrefetchScalarGridSpec(
            num_scalar_prefetch=0,
            grid=(B // Bb,),
            in_specs=[
                pl.BlockSpec((Bb, C, L), lambda i: (i, 0, 0)),
                pl.BlockSpec((1, C, 1), lambda i: (0, 0, 0)),
                pl.BlockSpec((1, C, 1), lambda i: (0, 0, 0)),
            ],
            out_specs=[
                pl.BlockSpec((Bb, C, L), lambda i: (i, 0, 0)),
                pl.BlockSpec((Bb, C, 1), lambda i: (i, 0, 0)),
                pl.BlockSpec((Bb, C, 1), lambda i: (i, 0, 0)),
            ],
        ),
        compiler_params=pltpu.CompilerParams(dimension_semantics=("parallel",)),
    )(xt.astype(jnp.float32),
      w.reshape(1, C, 1).astype(jnp.float32),
      b.reshape(1, C, 1).astype(jnp.float32))


def _cnn_embed_kernel(x_ref, w1_ref, b1_ref, w2_ref, b2_ref, pe_ref, o_ref):
    # conv1(1->8,k3,p1)+ReLU and conv2(8->32,k3,p1)+ReLU expressed as two matmuls
    # via precomputed conv-as-matrix weights; PE added in the epilogue.
    Bt, s, p = x_ref.shape
    E = o_ref.shape[-1]
    x = x_ref[...].reshape(Bt * s, p).astype(jnp.bfloat16)
    h = jnp.dot(x, w1_ref[...], preferred_element_type=jnp.float32) + b1_ref[...]
    h = jnp.maximum(h, 0.0)                                          # (Bt*s, 8p)
    h = jnp.dot(h.astype(jnp.bfloat16), w2_ref[...],
                preferred_element_type=jnp.float32) + b2_ref[...]    # (Bt*s, E)
    h = jnp.maximum(h, 0.0)
    o_ref[...] = (h.reshape(Bt, s, E) + pe_ref[...]).astype(o_ref.dtype)


def cnn_embed(xp, w1m, b1f, w2m, b2f, pe):
    BC, s, p = xp.shape
    H1 = w1m.shape[1]
    E = w2m.shape[1]
    Bt = _pick_div(BC, max(1, 1024 // max(s, 1)))
    return pl.pallas_call(
        _cnn_embed_kernel,
        out_shape=jax.ShapeDtypeStruct((BC, s, E), jnp.float32),
        grid_spec=pltpu.PrefetchScalarGridSpec(
            num_scalar_prefetch=0,
            grid=(BC // Bt,),
            in_specs=[
                pl.BlockSpec((Bt, s, p), lambda i: (i, 0, 0)),
                pl.BlockSpec((p, H1), lambda i: (0, 0)),
                pl.BlockSpec((1, H1), lambda i: (0, 0)),
                pl.BlockSpec((H1, E), lambda i: (0, 0)),
                pl.BlockSpec((1, E), lambda i: (0, 0)),
                pl.BlockSpec((1, s, E), lambda i: (0, 0, 0)),
            ],
            out_specs=pl.BlockSpec((Bt, s, E), lambda i: (i, 0, 0)),
        ),
        compiler_params=pltpu.CompilerParams(
            dimension_semantics=("parallel",), vmem_limit_bytes=_VMEM_LIMIT),
    )(xp.astype(jnp.float32),
      w1m.astype(jnp.bfloat16), b1f.reshape(1, -1).astype(jnp.float32),
      w2m.astype(jnp.bfloat16), b2f.reshape(1, -1).astype(jnp.float32),
      pe.astype(jnp.float32))


def _encoder_layer_kernel(z_ref, ln1g_ref, ln1b_ref, wqkv_ref, bqkv_ref,
                          wo_ref, bo_ref, ln1pg_ref, ln1pb_ref,
                          ln2g_ref, ln2b_ref, wff1_ref, bff1_ref,
                          wff2_ref, bff2_ref, ln2pg_ref, ln2pb_ref,
                          o_ref, *, heads, scale, eps):
    Bt, s, E = z_ref.shape
    Dh = E // heads
    z = z_ref[...].reshape(Bt * s, E)           # flatten so MXU M = Bt*s

    # --- attention branch: pre-LN -> fused QKV -> per-head attn -> out-proj -> post-LN -> +res
    zn = _ln(z, ln1g_ref[...], ln1b_ref[...], eps)
    qkv = jnp.dot(zn.astype(jnp.bfloat16), wqkv_ref[...],
                  preferred_element_type=jnp.float32) + bqkv_ref[...]
    q = qkv[:, :E].reshape(Bt, s, E)
    k = qkv[:, E:2 * E].reshape(Bt, s, E)
    v = qkv[:, 2 * E:].reshape(Bt, s, E)
    lane = jax.lax.broadcasted_iota(jnp.int32, (1, 1, E), 2)
    att = jnp.zeros((Bt, s, E), jnp.float32)
    # Per-head attention via disjoint lane masks, batched over the Bt sequences in
    # this tile (batch dim 'b' in the einsum -> no cross-sequence leakage).
    for h in range(heads):
        m = ((lane >= h * Dh) & (lane < (h + 1) * Dh)).astype(jnp.float32)
        sc = jnp.einsum('bqe,bke->bqk', q, k * m,
                        preferred_element_type=jnp.float32) * scale
        mx = jnp.max(sc, axis=-1, keepdims=True)
        p = jnp.exp(sc - mx)
        p = p * pl.reciprocal(jnp.sum(p, axis=-1, keepdims=True), approx=True)
        att = att + jnp.einsum('bqk,bke->bqe', p, v * m,
                               preferred_element_type=jnp.float32)
    out = jnp.dot(att.reshape(Bt * s, E).astype(jnp.bfloat16), wo_ref[...],
                  preferred_element_type=jnp.float32) + bo_ref[...]
    out = _ln(out, ln1pg_ref[...], ln1pb_ref[...], eps)     # sandwich post-branch LN
    z = z + out

    # --- feed-forward branch: pre-LN -> FF1 -> GELU -> FF2 -> post-LN -> +res
    zn = _ln(z, ln2g_ref[...], ln2b_ref[...], eps)
    h1 = jnp.dot(zn.astype(jnp.bfloat16), wff1_ref[...],
                 preferred_element_type=jnp.float32) + bff1_ref[...]
    h1 = jax.nn.gelu(h1)   # TODO(synk): tanh-approx GELU vs PyTorch exact-erf nn.GELU
    h2 = jnp.dot(h1.astype(jnp.bfloat16), wff2_ref[...],
                 preferred_element_type=jnp.float32) + bff2_ref[...]
    h2 = _ln(h2, ln2pg_ref[...], ln2pb_ref[...], eps)       # sandwich post-branch LN
    z = z + h2

    o_ref[...] = z.reshape(Bt, s, E).astype(o_ref.dtype)


def encoder_layer(z, layer, *, heads, scale, eps):
    BC, s, E = z.shape
    Bt = _pick_div(BC, max(1, 512 // max(s, 1)))      # ~512 rows of M per grid step
    vec = lambda a: a.reshape(1, -1).astype(jnp.float32)
    wqkv = layer["wqkv"].transpose(1, 0, 2).reshape(E, 3 * E)   # [Wq | Wk | Wv]
    bqkv = layer["bqkv"].reshape(1, 3 * E)

    def const2(shp):
        return pl.BlockSpec(shp, lambda i: (0, 0))

    return pl.pallas_call(
        functools.partial(_encoder_layer_kernel, heads=heads, scale=scale, eps=eps),
        out_shape=jax.ShapeDtypeStruct((BC, s, E), jnp.float32),
        grid_spec=pltpu.PrefetchScalarGridSpec(
            num_scalar_prefetch=0,
            grid=(BC // Bt,),
            in_specs=[
                pl.BlockSpec((Bt, s, E), lambda i: (i, 0, 0)),
                const2((1, E)), const2((1, E)),                 # ln1 g/b
                const2((E, 3 * E)), const2((1, 3 * E)),         # wqkv / bqkv
                const2((E, E)), const2((1, E)),                 # wo / bo
                const2((1, E)), const2((1, E)),                 # post-attn LN g/b
                const2((1, E)), const2((1, E)),                 # ln2 g/b
                const2((E, 4 * E)), const2((1, 4 * E)),         # ff1 w/b
                const2((4 * E, E)), const2((1, E)),             # ff2 w/b
                const2((1, E)), const2((1, E)),                 # post-ff LN g/b
            ],
            out_specs=pl.BlockSpec((Bt, s, E), lambda i: (i, 0, 0)),
        ),
        compiler_params=pltpu.CompilerParams(
            dimension_semantics=("parallel",), vmem_limit_bytes=_VMEM_LIMIT),
    )(z,
      vec(layer["ln1_g"]), vec(layer["ln1_b"]),
      wqkv.astype(jnp.bfloat16), bqkv.astype(jnp.float32),
      layer["wo"].astype(jnp.bfloat16), vec(layer["bo"]),
      vec(layer["ln1p_g"]), vec(layer["ln1p_b"]),
      vec(layer["ln2_g"]), vec(layer["ln2_b"]),
      layer["w_ff1"].astype(jnp.bfloat16), vec(layer["b_ff1"]),
      layer["w_ff2"].astype(jnp.bfloat16), vec(layer["b_ff2"]),
      vec(layer["ln2p_g"]), vec(layer["ln2p_b"]))


def _decoder_kernel(z_ref, g_ref, b_ref, w_ref, db_ref, wa_ref, ba_ref,
                    mu_ref, sd_ref, o_ref, *, eps):
    # Final LN + Flatten(-2) + Linear(s*E -> T) + RevIN denorm for one tile of rows.
    # The flatten-matmul is an in-register accumulation over patches; the narrow
    # (Rt, T) output is written exactly once.
    Rt, s, E = z_ref.shape
    T = o_ref.shape[-1]
    zb = z_ref[...]                                      # (Rt, s, E)
    acc = jnp.zeros((Rt, T), jnp.float32)
    for j in range(s):
        zn = _ln(zb[:, j, :], g_ref[...], b_ref[...], eps)
        acc = acc + jnp.dot(zn.astype(jnp.bfloat16), w_ref[j],
                            preferred_element_type=jnp.float32)
    y = acc + db_ref[...]
    y = (y - ba_ref[...]) / (wa_ref[...] + eps * eps)    # RevIN denorm (affine undo)
    o_ref[...] = y * sd_ref[...] + mu_ref[...]


def decoder_head(z, g, b, w3, db, wa, ba, mu, sd, eps):
    BC, s, E = z.shape
    T = db.shape[0]
    Rt = _pick_row_tile(BC, 256)
    rowspec = pl.BlockSpec((Rt, 1), lambda i: (i, 0))
    return pl.pallas_call(
        functools.partial(_decoder_kernel, eps=eps),
        out_shape=jax.ShapeDtypeStruct((BC, T), jnp.float32),
        grid_spec=pltpu.PrefetchScalarGridSpec(
            num_scalar_prefetch=0,
            grid=(BC // Rt,),
            in_specs=[
                pl.BlockSpec((Rt, s, E), lambda i: (i, 0, 0)),
                pl.BlockSpec((1, E), lambda i: (0, 0)),
                pl.BlockSpec((1, E), lambda i: (0, 0)),
                pl.BlockSpec((s, E, T), lambda i: (0, 0, 0)),
                pl.BlockSpec((1, T), lambda i: (0, 0)),
                rowspec, rowspec, rowspec, rowspec,
            ],
            out_specs=pl.BlockSpec((Rt, T), lambda i: (i, 0)),
        ),
        compiler_params=pltpu.CompilerParams(
            dimension_semantics=("parallel",), vmem_limit_bytes=_VMEM_LIMIT),
    )(z, g.reshape(1, E).astype(jnp.float32), b.reshape(1, E).astype(jnp.float32),
      w3.astype(jnp.bfloat16), db.reshape(1, T).astype(jnp.float32),
      wa.astype(jnp.float32), ba.astype(jnp.float32),
      mu.astype(jnp.float32), sd.astype(jnp.float32))


# ------------------------------- model glue -----------------------------------

def init_params(key, *, num_channels, patch_len, seq_len, heads, depth,
                target_seq_size):
    s = seq_len // patch_len
    E = 32 * patch_len            # cnn embed mode: embedding dim = 32 * patch_len
    del heads

    def nrm(k, shape, scale=0.02):
        return scale * jax.random.normal(k, shape, jnp.float32)

    ks = iter(jax.random.split(key, 8 + depth * 8))
    params = dict(
        revin_w=jnp.ones((num_channels,), jnp.float32),
        revin_b=jnp.zeros((num_channels,), jnp.float32),
        conv1_w=nrm(next(ks), (8, 1, 3), 0.3),     # Conv1d(1, 8, 3, padding=1)
        conv1_b=nrm(next(ks), (8,), 0.1),
        conv2_w=nrm(next(ks), (32, 8, 3), 0.2),    # Conv1d(8, 32, 3, padding=1)
        conv2_b=nrm(next(ks), (32,), 0.1),
        pe=nrm(next(ks), (1, s, E), 1.0),
        final_ln_g=jnp.ones((E,), jnp.float32),
        final_ln_b=jnp.zeros((E,), jnp.float32),
        dec_w=nrm(next(ks), (s * E, target_seq_size)),
        dec_b=nrm(next(ks), (target_seq_size,)),
    )
    layers = []
    for _ in range(depth):
        layers.append(dict(
            ln1_g=jnp.ones((E,), jnp.float32), ln1_b=jnp.zeros((E,), jnp.float32),
            wqkv=nrm(next(ks), (3, E, E)), bqkv=jnp.zeros((3, E), jnp.float32),
            wo=nrm(next(ks), (E, E)), bo=jnp.zeros((E,), jnp.float32),
            ln1p_g=jnp.ones((E,), jnp.float32), ln1p_b=jnp.zeros((E,), jnp.float32),
            ln2_g=jnp.ones((E,), jnp.float32), ln2_b=jnp.zeros((E,), jnp.float32),
            w_ff1=nrm(next(ks), (E, 4 * E)), b_ff1=jnp.zeros((4 * E,), jnp.float32),
            w_ff2=nrm(next(ks), (4 * E, E)), b_ff2=jnp.zeros((E,), jnp.float32),
            ln2p_g=jnp.ones((E,), jnp.float32), ln2p_b=jnp.zeros((E,), jnp.float32),
        ))
    params["layers"] = layers
    return params


@functools.partial(jax.jit, static_argnames=("patch_len", "heads", "eps"))
def patchtst_forward(params, x, *, patch_len, heads, eps=1e-5):
    B, L, C = x.shape
    s = L // patch_len
    E = 32 * patch_len
    BC = B * C

    # ---- RevIN 'norm' on a channel-major lane-dense (B, C, L) layout ----
    xt = jnp.transpose(x.astype(jnp.float32), (0, 2, 1))           # (B, C, L)
    xn, mu, sd = revin_norm(xt, params["revin_w"], params["revin_b"], eps)

    # ---- patchify: 'b c (s p) -> (b c) s p' is a free contiguous reshape ----
    xp = xn.reshape(BC, s, patch_len)

    # ---- fused CNN embedding (conv1+ReLU+conv2+ReLU as matmuls) + positional emb ----
    w1m = conv1d_as_matrix(params["conv1_w"], patch_len, out_channel_major=False)
    b1f = jnp.tile(params["conv1_b"], patch_len)                   # layout (p, o)
    w2m = conv1d_as_matrix(params["conv2_w"], patch_len, out_channel_major=True)
    b2f = jnp.repeat(params["conv2_b"], patch_len)                 # layout '(e p)'
    z = cnn_embed(xp, w1m, b1f, w2m, b2f, params["pe"])            # (BC, s, E)

    # ---- sandwich-norm transformer encoder, ONE fused kernel per layer ----
    scale = (E // heads) ** -0.5
    for layer in params["layers"]:
        z = encoder_layer(z, layer, heads=heads, scale=scale, eps=eps)

    # ---- final LN + decoder head + RevIN 'denorm' (one fused kernel) ----
    T = params["dec_b"].shape[0]
    wa = jnp.tile(params["revin_w"], B).reshape(BC, 1)
    ba = jnp.tile(params["revin_b"], B).reshape(BC, 1)
    y = decoder_head(z, params["final_ln_g"], params["final_ln_b"],
                     params["dec_w"].reshape(s, E, T), params["dec_b"],
                     wa, ba, mu.reshape(BC, 1), sd.reshape(BC, 1), eps)   # (BC, T)

    # ---- 'b c t -> b t c' ----
    return y.reshape(B, C, T).transpose(0, 2, 1)


# --------------------------------- main ---------------------------------------

if __name__ == "__main__":
    B, C = 2, 3
    patch_len = 4
    seq_len = 32                  # -> num_patches s = 8 (sublane-aligned)
    heads = 4
    depth = 2
    target_seq_size = 12
    embed_dim = 32 * patch_len    # forced by the 1d-conv embedding (=128)

    key = jax.random.PRNGKey(0)
    pkey, xkey = jax.random.split(key)
    params = init_params(pkey, num_channels=C, patch_len=patch_len,
                         seq_len=seq_len, heads=heads, depth=depth,
                         target_seq_size=target_seq_size)
    x = jax.random.normal(xkey, (B, seq_len, C), jnp.float32)

    y = patchtst_forward(params, x, patch_len=patch_len, heads=heads)
    y = jax.block_until_ready(y)
    assert y.shape == (B, target_seq_size, C), y.shape
    assert bool(jnp.all(jnp.isfinite(y)))
    print("KERNEL_OK")
</pallas_src>

<mosaic_0001>
module attributes {stable_mosaic.version = 11 : i64} {
  func.func @_revin_norm_kernel(%arg0: i32, %arg1: memref<2x3x32xf32, #tpu.memory_space<vmem>>, %arg2: memref<1x3x1xf32, #tpu.memory_space<vmem>>, %arg3: memref<1x3x1xf32, #tpu.memory_space<vmem>>, %arg4: memref<2x3x32xf32, #tpu.memory_space<vmem>>, %arg5: memref<2x3x1xf32, #tpu.memory_space<vmem>>, %arg6: memref<2x3x1xf32, #tpu.memory_space<vmem>>) attributes {dimension_semantics = [#tpu.dimension_semantics<parallel>], iteration_bounds = array<i64: 1>, scalar_prefetch = 0 : i64, scratch_operands = 0 : i64, tpu.core_type = #tpu.core_type<tc>, window_params = [{transform_indices = @transform_0, window_bounds = array<i64: 2, 3, 32>}, {pipeline_mode = #tpu.pipeline_mode<synchronous>, transform_indices = @transform_1, window_bounds = array<i64: 1, 3, 1>}, {pipeline_mode = #tpu.pipeline_mode<synchronous>, transform_indices = @transform_2, window_bounds = array<i64: 1, 3, 1>}, {transform_indices = @transform_3, window_bounds = array<i64: 2, 3, 32>}, {transform_indices = @transform_4, window_bounds = array<i64: 2, 3, 1>}, {transform_indices = @transform_5, window_bounds = array<i64: 2, 3, 1>}]} {
    %c0 = arith.constant 0 : index
    %c0_0 = arith.constant 0 : index
    %c0_1 = arith.constant 0 : index
    %0 = vector.load %arg1[%c0, %c0_0, %c0_1] : memref<2x3x32xf32, #tpu.memory_space<vmem>>, vector<2x3x32xf32>
    %cst = arith.constant dense<0.000000e+00> : vector<2x3xf32>
    %1 = vector.multi_reduction <add>, %0, %cst [2] : vector<2x3x32xf32> to vector<2x3xf32>
    %2 = vector.shape_cast %1 : vector<2x3xf32> to vector<2x3x1xf32>
    %cst_2 = arith.constant 3.200000e+01 : f32
    %3 = vector.broadcast %cst_2 : f32 to vector<2x3x1xf32>
    %4 = arith.divf %2, %3 : vector<2x3x1xf32>
    %5 = vector.broadcast %4 : vector<2x3x1xf32> to vector<2x3x32xf32>
    %6 = arith.subf %0, %5 : vector<2x3x32xf32>
    %7 = arith.mulf %6, %6 : vector<2x3x32xf32>
    %cst_3 = arith.constant dense<0.000000e+00> : vector<2x3xf32>
    %8 = vector.multi_reduction <add>, %7, %cst_3 [2] : vector<2x3x32xf32> to vector<2x3xf32>
    %9 = vector.shape_cast %8 : vector<2x3xf32> to vector<2x3x1xf32>
    %cst_4 = arith.constant 3.200000e+01 : f32
    %10 = vector.broadcast %cst_4 : f32 to vector<2x3x1xf32>
    %11 = arith.divf %9, %10 : vector<2x3x1xf32>
    %cst_5 = arith.constant 9.99999974E-6 : f32
    %12 = vector.broadcast %cst_5 : f32 to vector<2x3x1xf32>
    %13 = arith.addf %11, %12 : vector<2x3x1xf32>
    %14 = math.sqrt %13 : vector<2x3x1xf32>
    %15 = vector.broadcast %14 : vector<2x3x1xf32> to vector<2x3x32xf32>
    %16 = arith.divf %6, %15 : vector<2x3x32xf32>
    %c0_6 = arith.constant 0 : index
    %c0_7 = arith.constant 0 : index
    %c0_8 = arith.constant 0 : index
    %17 = vector.load %arg2[%c0_6, %c0_7, %c0_8] : memref<1x3x1xf32, #tpu.memory_space<vmem>>, vector<1x3x1xf32>
    %18 = vector.broadcast %17 : vector<1x3x1xf32> to vector<2x3x32xf32>
    %19 = arith.mulf %16, %18 : vector<2x3x32xf32>
    %c0_9 = arith.constant 0 : index
    %c0_10 = arith.constant 0 : index
    %c0_11 = arith.constant 0 : index
    %20 = vector.load %arg3[%c0_9, %c0_10, %c0_11] : memref<1x3x1xf32, #tpu.memory_space<vmem>>, vector<1x3x1xf32>
    %21 = vector.broadcast %20 : vector<1x3x1xf32> to vector<2x3x32xf32>
    %22 = arith.addf %19, %21 : vector<2x3x32xf32>
    %c0_12 = arith.constant 0 : index
    %c0_13 = arith.constant 0 : index
    %c0_14 = arith.constant 0 : index
    %23 = vector.load %arg4[%c0_12, %c0_13, %c0_14] : memref<2x3x32xf32, #tpu.memory_space<vmem>>, vector<2x3x32xf32>
    tpu.vector_store %arg4[%c0_12, %c0_13, %c0_14], %22 {strides = array<i32>} : memref<2x3x32xf32, #tpu.memory_space<vmem>>, vector<2x3x32xf32>,
    %c0_15 = arith.constant 0 : index
    %c0_16 = arith.constant 0 : index
    %c0_17 = arith.constant 0 : index
    %24 = vector.load %arg5[%c0_15, %c0_16, %c0_17] : memref<2x3x1xf32, #tpu.memory_space<vmem>>, vector<2x3x1xf32>
    tpu.vector_store %arg5[%c0_15, %c0_16, %c0_17], %4 {strides = array<i32>} : memref<2x3x1xf32, #tpu.memory_space<vmem>>, vector<2x3x1xf32>,
    %c0_18 = arith.constant 0 : index
    %c0_19 = arith.constant 0 : index
    %c0_20 = arith.constant 0 : index
    %25 = vector.load %arg6[%c0_18, %c0_19, %c0_20] : memref<2x3x1xf32, #tpu.memory_space<vmem>>, vector<2x3x1xf32>
    tpu.vector_store %arg6[%c0_18, %c0_19, %c0_20], %14 {strides = array<i32>} : memref<2x3x1xf32, #tpu.memory_space<vmem>>, vector<2x3x1xf32>,
    return
  }
  func.func @transform_0(%arg0: i32) -> (i32, i32, i32) {
    %c0_i32 = arith.constant 0 : i32
    %c0_i32_0 = arith.constant 0 : i32
    %c0_i32_1 = arith.constant 0 : i32
    return %arg0, %c0_i32, %c0_i32_0 : i32, i32, i32
  }
  func.func @transform_1(%arg0: i32) -> (i32, i32, i32) {
    %c0_i32 = arith.constant 0 : i32
    %c0_i32_0 = arith.constant 0 : i32
    %c0_i32_1 = arith.constant 0 : i32
    %c0_i32_2 = arith.constant 0 : i32
    return %c0_i32, %c0_i32_0, %c0_i32_1 : i32, i32, i32
  }
  func.func @transform_2(%arg0: i32) -> (i32, i32, i32) {
    %c0_i32 = arith.constant 0 : i32
    %c0_i32_0 = arith.constant 0 : i32
    %c0_i32_1 = arith.constant 0 : i32
    %c0_i32_2 = arith.constant 0 : i32
    return %c0_i32, %c0_i32_0, %c0_i32_1 : i32, i32, i32
  }
  func.func @transform_3(%arg0: i32) -> (i32, i32, i32) {
    %c0_i32 = arith.constant 0 : i32
    %c0_i32_0 = arith.constant 0 : i32
    %c0_i32_1 = arith.constant 0 : i32
    return %arg0, %c0_i32, %c0_i32_0 : i32, i32, i32
  }
  func.func @transform_4(%arg0: i32) -> (i32, i32, i32) {
    %c0_i32 = arith.constant 0 : i32
    %c0_i32_0 = arith.constant 0 : i32
    %c0_i32_1 = arith.constant 0 : i32
    return %arg0, %c0_i32, %c0_i32_0 : i32, i32, i32
  }
  func.func @transform_5(%arg0: i32) -> (i32, i32, i32) {
    %c0_i32 = arith.constant 0 : i32
    %c0_i32_0 = arith.constant 0 : i32
    %c0_i32_1 = arith.constant 0 : i32
    return %arg0, %c0_i32, %c0_i32_0 : i32, i32, i32
  }
}

module attributes {stable_mosaic.version = 11 : i64} {
  func.func @_cnn_embed_kernel(%arg0: i32, %arg1: memref<6x8x4xf32, #tpu.memory_space<vmem>>, %arg2: memref<4x32xbf16, #tpu.memory_space<vmem>>, %arg3: memref<1x32xf32, #tpu.memory_space<vmem>>, %arg4: memref<32x128xbf16, #tpu.memory_space<vmem>>, %arg5: memref<1x128xf32, #tpu.memory_space<vmem>>, %arg6: memref<1x8x128xf32, #tpu.memory_space<vmem>>, %arg7: memref<6x8x128xf32, #tpu.memory_space<vmem>>) attributes {dimension_semantics = [#tpu.dimension_semantics<parallel>], iteration_bounds = array<i64: 1>, scalar_prefetch = 0 : i64, scratch_operands = 0 : i64, tpu.core_type = #tpu.core_type<tc>, window_params = [{transform_indices = @transform_0, window_bounds = array<i64: 6, 8, 4>}, {pipeline_mode = #tpu.pipeline_mode<synchronous>, transform_indices = @transform_1, window_bounds = array<i64: 4, 32>}, {pipeline_mode = #tpu.pipeline_mode<synchronous>, transform_indices = @transform_2, window_bounds = array<i64: 1, 32>}, {pipeline_mode = #tpu.pipeline_mode<synchronous>, transform_indices = @transform_3, window_bounds = array<i64: 32, 128>}, {pipeline_mode = #tpu.pipeline_mode<synchronous>, transform_indices = @transform_4, window_bounds = array<i64: 1, 128>}, {pipeline_mode = #tpu.pipeline_mode<synchronous>, transform_indices = @transform_5, window_bounds = array<i64: 1, 8, 128>}, {transform_indices = @transform_6, window_bounds = array<i64: 6, 8, 128>}]} {
    %c0 = arith.constant 0 : index
    %c0_0 = arith.constant 0 : index
    %c0_1 = arith.constant 0 : index
    %0 = vector.load %arg1[%c0, %c0_0, %c0_1] : memref<6x8x4xf32, #tpu.memory_space<vmem>>, vector<6x8x4xf32>
    %1 = vector.shape_cast %0 : vector<6x8x4xf32> to vector<48x4xf32>
    %2 = arith.truncf %1 : vector<48x4xf32> to vector<48x4xbf16>
    %c0_2 = arith.constant 0 : index
    %c0_3 = arith.constant 0 : index
    %3 = vector.load %arg2[%c0_2, %c0_3] : memref<4x32xbf16, #tpu.memory_space<vmem>>, vector<4x32xbf16>
    %cst = arith.constant dense<0.000000e+00> : vector<48x32xf32>
    %4 = tpu.matmul %2, %3, %cst {dimension_numbers = #tpu.dot_dimension_numbers<[1], [0], [0], [1], [0, 0, 1, 1], [], []>} : vector<48x4xbf16>, vector<4x32xbf16>, vector<48x32xf32> -> vector<48x32xf32>
    %c0_4 = arith.constant 0 : index
    %c0_5 = arith.constant 0 : index
    %5 = vector.load %arg3[%c0_4, %c0_5] : memref<1x32xf32, #tpu.memory_space<vmem>>, vector<1x32xf32>
    %6 = vector.broadcast %5 : vector<1x32xf32> to vector<48x32xf32>
    %7 = arith.addf %4, %6 : vector<48x32xf32>
    %cst_6 = arith.constant 0.000000e+00 : f32
    %8 = vector.broadcast %cst_6 : f32 to vector<48x32xf32>
    %9 = arith.maximumf %7, %8 : vector<48x32xf32>
    %10 = arith.truncf %9 : vector<48x32xf32> to vector<48x32xbf16>
    %c0_7 = arith.constant 0 : index
    %c0_8 = arith.constant 0 : index
    %11 = vector.load %arg4[%c0_7, %c0_8] : memref<32x128xbf16, #tpu.memory_space<vmem>>, vector<32x128xbf16>
    %cst_9 = arith.constant dense<0.000000e+00> : vector<48x128xf32>
    %12 = tpu.matmul %10, %11, %cst_9 {dimension_numbers = #tpu.dot_dimension_numbers<[1], [0], [0], [1], [0, 0, 1, 1], [], []>} : vector<48x32xbf16>, vector<32x128xbf16>, vector<48x128xf32> -> vector<48x128xf32>
    %c0_10 = arith.constant 0 : index
    %c0_11 = arith.constant 0 : index
    %13 = vector.load %arg5[%c0_10, %c0_11] : memref<1x128xf32, #tpu.memory_space<vmem>>, vector<1x128xf32>
    %14 = vector.broadcast %13 : vector<1x128xf32> to vector<48x128xf32>
    %15 = arith.addf %12, %14 : vector<48x128xf32>
    %cst_12 = arith.constant 0.000000e+00 : f32
    %16 = vector.broadcast %cst_12 : f32 to vector<48x128xf32>
    %17 = arith.maximumf %15, %16 : vector<48x128xf32>
    %18 = vector.shape_cast %17 : vector<48x128xf32> to vector<6x8x128xf32>
    %c0_13 = arith.constant 0 : index
    %c0_14 = arith.constant 0 : index
    %c0_15 = arith.constant 0 : index
    %19 = vector.load %arg6[%c0_13, %c0_14, %c0_15] : memref<1x8x128xf32, #tpu.memory_space<vmem>>, vector<1x8x128xf32>
    %20 = vector.broadcast %19 : vector<1x8x128xf32> to vector<6x8x128xf32>
    %21 = arith.addf %18, %20 : vector<6x8x128xf32>
    %c0_16 = arith.constant 0 : index
    %c0_17 = arith.constant 0 : index
    %c0_18 = arith.constant 0 : index
    %22 = vector.load %arg7[%c0_16, %c0_17, %c0_18] : memref<6x8x128xf32, #tpu.memory_space<vmem>>, vector<6x8x128xf32>
    tpu.vector_store %arg7[%c0_16, %c0_17, %c0_18], %21 {strides = array<i32>} : memref<6x8x128xf32, #tpu.memory_space<vmem>>, vector<6x8x128xf32>,
    return
  }
  func.func @transform_0(%arg0: i32) -> (i32, i32, i32) {
    %c0_i32 = arith.constant 0 : i32
    %c0_i32_0 = arith.constant 0 : i32
    %c0_i32_1 = arith.constant 0 : i32
    return %arg0, %c0_i32, %c0_i32_0 : i32, i32, i32
  }
  func.func @transform_1(%arg0: i32) -> (i32, i32) {
    %c0_i32 = arith.constant 0 : i32
    %c0_i32_0 = arith.constant 0 : i32
    %c0_i32_1 = arith.constant 0 : i32
    return %c0_i32, %c0_i32_0 : i32, i32
  }
  func.func @transform_2(%arg0: i32) -> (i32, i32) {
    %c0_i32 = arith.constant 0 : i32
    %c0_i32_0 = arith.constant 0 : i32
    %c0_i32_1 = arith.constant 0 : i32
    return %c0_i32, %c0_i32_0 : i32, i32
  }
  func.func @transform_3(%arg0: i32) -> (i32, i32) {
    %c0_i32 = arith.constant 0 : i32
    %c0_i32_0 = arith.constant 0 : i32
    %c0_i32_1 = arith.constant 0 : i32
    return %c0_i32, %c0_i32_0 : i32, i32
  }
  func.func @transform_4(%arg0: i32) -> (i32, i32) {
    %c0_i32 = arith.constant 0 : i32
    %c0_i32_0 = arith.constant 0 : i32
    %c0_i32_1 = arith.constant 0 : i32
    return %c0_i32, %c0_i32_0 : i32, i32
  }
  func.func @transform_5(%arg0: i32) -> (i32, i32, i32) {
    %c0_i32 = arith.constant 0 : i32
    %c0_i32_0 = arith.constant 0 : i32
    %c0_i32_1 = arith.constant 0 : i32
    %c0_i32_2 = arith.constant 0 : i32
    return %c0_i32, %c0_i32_0, %c0_i32_1 : i32, i32, i32
  }
  func.func @transform_6(%arg0: i32) -> (i32, i32, i32) {
    %c0_i32 = arith.constant 0 : i32
    %c0_i32_0 = arith.constant 0 : i32
    %c0_i32_1 = arith.constant 0 : i32
    return %arg0, %c0_i32, %c0_i32_0 : i32, i32, i32
  }
}

module attributes {stable_mosaic.version = 11 : i64} {
  func.func @_encoder_layer_kernel(%arg0: i32, %arg1: memref<6x8x128xf32, #tpu.memory_space<vmem>>, %arg2: memref<1x128xf32, #tpu.memory_space<vmem>>, %arg3: memref<1x128xf32, #tpu.memory_space<vmem>>, %arg4: memref<128x384xbf16, #tpu.memory_space<vmem>>, %arg5: memref<1x384xf32, #tpu.memory_space<vmem>>, %arg6: memref<128x128xbf16, #tpu.memory_space<vmem>>, %arg7: memref<1x128xf32, #tpu.memory_space<vmem>>, %arg8: memref<1x128xf32, #tpu.memory_space<vmem>>, %arg9: memref<1x128xf32, #tpu.memory_space<vmem>>, %arg10: memref<1x128xf32, #tpu.memory_space<vmem>>, %arg11: memref<1x128xf32, #tpu.memory_space<vmem>>, %arg12: memref<128x512xbf16, #tpu.memory_space<vmem>>, %arg13: memref<1x512xf32, #tpu.memory_space<vmem>>, %arg14: memref<512x128xbf16, #tpu.memory_space<vmem>>, %arg15: memref<1x128xf32, #tpu.memory_space<vmem>>, %arg16: memref<1x128xf32, #tpu.memory_space<vmem>>, %arg17: memref<1x128xf32, #tpu.memory_space<vmem>>, %arg18: memref<6x8x128xf32, #tpu.memory_space<vmem>>) attributes {dimension_semantics = [#tpu.dimension_semantics<parallel>], iteration_bounds = array<i64: 1>, scalar_prefetch = 0 : i64, scratch_operands = 0 : i64, tpu.core_type = #tpu.core_type<tc>, window_params = [{transform_indices = @transform_0, window_bounds = array<i64: 6, 8, 128>}, {pipeline_mode = #tpu.pipeline_mode<synchronous>, transform_indices = @transform_1, window_bounds = array<i64: 1, 128>}, {pipeline_mode = #tpu.pipeline_mode<synchronous>, transform_indices = @transform_2, window_bounds = array<i64: 1, 128>}, {pipeline_mode = #tpu.pipeline_mode<synchronous>, transform_indices = @transform_3, window_bounds = array<i64: 128, 384>}, {pipeline_mode = #tpu.pipeline_mode<synchronous>, transform_indices = @transform_4, window_bounds = array<i64: 1, 384>}, {pipeline_mode = #tpu.pipeline_mode<synchronous>, transform_indices = @transform_5, window_bounds = array<i64: 128, 128>}, {pipeline_mode = #tpu.pipeline_mode<synchronous>, transform_indices = @transform_6, window_bounds = array<i64: 1, 128>}, {pipeline_mode = #tpu.pipeline_mode<synchronous>, transform_indices = @transform_7, window_bounds = array<i64: 1, 128>}, {pipeline_mode = #tpu.pipeline_mode<synchronous>, transform_indices = @transform_8, window_bounds = array<i64: 1, 128>}, {pipeline_mode = #tpu.pipeline_mode<synchronous>, transform_indices = @transform_9, window_bounds = array<i64: 1, 128>}, {pipeline_mode = #tpu.pipeline_mode<synchronous>, transform_indices = @transform_10, window_bounds = array<i64: 1, 128>}, {pipeline_mode = #tpu.pipeline_mode<synchronous>, transform_indices = @transform_11, window_bounds = array<i64: 128, 512>}, {pipeline_mode = #tpu.pipeline_mode<synchronous>, transform_indices = @transform_12, window_bounds = array<i64: 1, 512>}, {pipeline_mode = #tpu.pipeline_mode<synchronous>, transform_indices = @transform_13, window_bounds = array<i64: 512, 128>}, {pipeline_mode = #tpu.pipeline_mode<synchronous>, transform_indices = @transform_14, window_bounds = array<i64: 1, 128>}, {pipeline_mode = #tpu.pipeline_mode<synchronous>, transform_indices = @transform_15, window_bounds = array<i64: 1, 128>}, {pipeline_mode = #tpu.pipeline_mode<synchronous>, transform_indices = @transform_16, window_bounds = array<i64: 1, 128>}, {transform_indices = @transform_17, window_bounds = array<i64: 6, 8, 128>}]} {
    %c0 = arith.constant 0 : index
    %c0_0 = arith.constant 0 : index
    %c0_1 = arith.constant 0 : index
    %0 = vector.load %arg1[%c0, %c0_0, %c0_1] : memref<6x8x128xf32, #tpu.memory_space<vmem>>, vector<6x8x128xf32>
    %1 = vector.shape_cast %0 : vector<6x8x128xf32> to vector<48x128xf32>
    %c0_2 = arith.constant 0 : index
    %c0_3 = arith.constant 0 : index
    %2 = vector.load %arg2[%c0_2, %c0_3] : memref<1x128xf32, #tpu.memory_space<vmem>>, vector<1x128xf32>
    %c0_4 = arith.constant 0 : index
    %c0_5 = arith.constant 0 : index
    %3 = vector.load %arg3[%c0_4, %c0_5] : memref<1x128xf32, #tpu.memory_space<vmem>>, vector<1x128xf32>
    %cst = arith.constant dense<0.000000e+00> : vector<48xf32>
    %4 = vector.multi_reduction <add>, %1, %cst [1] : vector<48x128xf32> to vector<48xf32>
    %5 = vector.shape_cast %4 : vector<48xf32> to vector<48x1xf32>
    %cst_6 = arith.constant 1.280000e+02 : f32
    %6 = vector.broadcast %cst_6 : f32 to vector<48x1xf32>
    %7 = arith.divf %5, %6 : vector<48x1xf32>
    %8 = vector.broadcast %7 : vector<48x1xf32> to vector<48x128xf32>
    %9 = arith.subf %1, %8 : vector<48x128xf32>
    %10 = arith.mulf %9, %9 : vector<48x128xf32>
    %cst_7 = arith.constant dense<0.000000e+00> : vector<48xf32>
    %11 = vector.multi_reduction <add>, %10, %cst_7 [1] : vector<48x128xf32> to vector<48xf32>
    %12 = vector.shape_cast %11 : vector<48xf32> to vector<48x1xf32>
    %cst_8 = arith.constant 1.280000e+02 : f32
    %13 = vector.broadcast %cst_8 : f32 to vector<48x1xf32>
    %14 = arith.divf %12, %13 : vector<48x1xf32>
    %cst_9 = arith.constant 9.99999974E-6 : f32
    %15 = vector.broadcast %cst_9 : f32 to vector<48x1xf32>
    %16 = arith.addf %14, %15 : vector<48x1xf32>
    %17 = math.rsqrt %16 : vector<48x1xf32>
    %18 = vector.broadcast %17 : vector<48x1xf32> to vector<48x128xf32>
    %19 = arith.mulf %9, %18 : vector<48x128xf32>
    %20 = vector.broadcast %2 : vector<1x128xf32> to vector<48x128xf32>
    %21 = arith.mulf %19, %20 : vector<48x128xf32>
    %22 = vector.broadcast %3 : vector<1x128xf32> to vector<48x128xf32>
    %23 = arith.addf %21, %22 : vector<48x128xf32>
    %24 = arith.truncf %23 : vector<48x128xf32> to vector<48x128xbf16>
    %c0_10 = arith.constant 0 : index
    %c0_11 = arith.constant 0 : index
    %25 = vector.load %arg4[%c0_10, %c0_11] : memref<128x384xbf16, #tpu.memory_space<vmem>>, vector<128x384xbf16>
    %cst_12 = arith.constant dense<0.000000e+00> : vector<48x384xf32>
    %26 = tpu.matmul %24, %25, %cst_12 {dimension_numbers = #tpu.dot_dimension_numbers<[1], [0], [0], [1], [0, 0, 1, 1], [], []>} : vector<48x128xbf16>, vector<128x384xbf16>, vector<48x384xf32> -> vector<48x384xf32>
    %c0_13 = arith.constant 0 : index
    %c0_14 = arith.constant 0 : index
    %27 = vector.load %arg5[%c0_13, %c0_14] : memref<1x384xf32, #tpu.memory_space<vmem>>, vector<1x384xf32>
    %28 = vector.broadcast %27 : vector<1x384xf32> to vector<48x384xf32>
    %29 = arith.addf %26, %28 : vector<48x384xf32>
    %30 = vector.extract_strided_slice %29 {offsets = [0, 0], sizes = [48, 128], strides = [1, 1]} : vector<48x384xf32> to vector<48x128xf32>
    %31 = vector.shape_cast %30 : vector<48x128xf32> to vector<6x8x128xf32>
    %32 = vector.extract_strided_slice %29 {offsets = [0, 128], sizes = [48, 128], strides = [1, 1]} : vector<48x384xf32> to vector<48x128xf32>
    %33 = vector.shape_cast %32 : vector<48x128xf32> to vector<6x8x128xf32>
    %34 = vector.extract_strided_slice %29 {offsets = [0, 256], sizes = [48, 128], strides = [1, 1]} : vector<48x384xf32> to vector<48x128xf32>
    %35 = vector.shape_cast %34 : vector<48x128xf32> to vector<6x8x128xf32>
    %36 = tpu.iota {dimensions = array<i32: 2>} : vector<1x1x128xi32>
    %cst_15 = arith.constant 0.000000e+00 : f32
    %37 = vector.broadcast %cst_15 : f32 to vector<6x8x128xf32>
    %c0_i32 = arith.constant 0 : i32
    %38 = vector.broadcast %c0_i32 : i32 to vector<1x1x128xi32>
    %39 = arith.cmpi sge, %36, %38 : vector<1x1x128xi32>
    %c32_i32 = arith.constant 32 : i32
    %40 = vector.broadcast %c32_i32 : i32 to vector<1x1x128xi32>
    %41 = arith.cmpi slt, %36, %40 : vector<1x1x128xi32>
    %42 = arith.andi %39, %41 : vector<1x1x128xi1>
    %43 = arith.extui %42 : vector<1x1x128xi1> to vector<1x1x128xi32>
    %44 = arith.sitofp %43 : vector<1x1x128xi32> to vector<1x1x128xf32>
    %45 = vector.broadcast %44 : vector<1x1x128xf32> to vector<6x8x128xf32>
    %46 = arith.mulf %33, %45 : vector<6x8x128xf32>
    "tpu.trace_start"() <{level = 10 : i32, message = "bqe,bke->bqk"}> : () -> ()
    %cst_16 = arith.constant dense<0.000000e+00> : vector<6x8x8xf32>
    %47 = tpu.matmul %31, %46, %cst_16 {dimension_numbers = #tpu.dot_dimension_numbers<[2], [2], [1], [1], [0, 0, 0, 1, 1, 1], [0], [0]>} : vector<6x8x128xf32>, vector<6x8x128xf32>, vector<6x8x8xf32> -> vector<6x8x8xf32>
    "tpu.trace_stop"() : () -> ()
    %cst_17 = arith.constant 0.176776692 : f32
    %48 = vector.broadcast %cst_17 : f32 to vector<6x8x8xf32>
    %49 = arith.mulf %47, %48 : vector<6x8x8xf32>
    %cst_18 = arith.constant dense<0xFF800000> : vector<6x8xf32>
    %50 = vector.multi_reduction <maximumf>, %49, %cst_18 [2] : vector<6x8x8xf32> to vector<6x8xf32>
    %51 = vector.shape_cast %50 : vector<6x8xf32> to vector<6x8x1xf32>
    %52 = vector.broadcast %51 : vector<6x8x1xf32> to vector<6x8x8xf32>
    %53 = arith.subf %49, %52 : vector<6x8x8xf32>
    %54 = math.exp %53 : vector<6x8x8xf32>
    %cst_19 = arith.constant dense<0.000000e+00> : vector<6x8xf32>
    %55 = vector.multi_reduction <add>, %54, %cst_19 [2] : vector<6x8x8xf32> to vector<6x8xf32>
    %56 = vector.shape_cast %55 : vector<6x8xf32> to vector<6x8x1xf32>
    %57 = tpu.reciprocal %56 {approx = true} : vector<6x8x1xf32> -> vector<6x8x1xf32>
    %58 = vector.broadcast %57 : vector<6x8x1xf32> to vector<6x8x8xf32>
    %59 = arith.mulf %54, %58 : vector<6x8x8xf32>
    %60 = vector.broadcast %44 : vector<1x1x128xf32> to vector<6x8x128xf32>
    %61 = arith.mulf %35, %60 : vector<6x8x128xf32>
    "tpu.trace_start"() <{level = 10 : i32, message = "bqk,bke->bqe"}> : () -> ()
    %cst_20 = arith.constant dense<0.000000e+00> : vector<6x8x128xf32>
    %62 = tpu.matmul %59, %61, %cst_20 {dimension_numbers = #tpu.dot_dimension_numbers<[2], [1], [1], [2], [0, 0, 0, 1, 1, 2], [0], [0]>} : vector<6x8x8xf32>, vector<6x8x128xf32>, vector<6x8x128xf32> -> vector<6x8x128xf32>
    "tpu.trace_stop"() : () -> ()
    %63 = arith.addf %37, %62 : vector<6x8x128xf32>
    %c32_i32_21 = arith.constant 32 : i32
    %64 = vector.broadcast %c32_i32_21 : i32 to vector<1x1x128xi32>
    %65 = arith.cmpi sge, %36, %64 : vector<1x1x128xi32>
    %c64_i32 = arith.constant 64 : i32
    %66 = vector.broadcast %c64_i32 : i32 to vector<1x1x128xi32>
    %67 = arith.cmpi slt, %36, %66 : vector<1x1x128xi32>
    %68 = arith.andi %65, %67 : vector<1x1x128xi1>
    %69 = arith.extui %68 : vector<1x1x128xi1> to vector<1x1x128xi32>
    %70 = arith.sitofp %69 : vector<1x1x128xi32> to vector<1x1x128xf32>
    %71 = vector.broadcast %70 : vector<1x1x128xf32> to vector<6x8x128xf32>
    %72 = arith.mulf %33, %71 : vector<6x8x128xf32>
    "tpu.trace_start"() <{level = 10 : i32, message = "bqe,bke->bqk"}> : () -> ()
    %cst_22 = arith.constant dense<0.000000e+00> : vector<6x8x8xf32>
    %73 = tpu.matmul %31, %72, %cst_22 {dimension_numbers = #tpu.dot_dimension_numbers<[2], [2], [1], [1], [0, 0, 0, 1, 1, 1], [0], [0]>} : vector<6x8x128xf32>, vector<6x8x128xf32>, vector<6x8x8xf32> -> vector<6x8x8xf32>
    "tpu.trace_stop"() : () -> ()
    %cst_23 = arith.constant 0.176776692 : f32
    %74 = vector.broadcast %cst_23 : f32 to vector<6x8x8xf32>
    %75 = arith.mulf %73, %74 : vector<6x8x8xf32>
    %cst_24 = arith.constant dense<0xFF800000> : vector<6x8xf32>
    %76 = vector.multi_reduction <maximumf>, %75, %cst_24 [2] : vector<6x8x8xf32> to vector<6x8xf32>
    %77 = vector.shape_cast %76 : vector<6x8xf32> to vector<6x8x1xf32>
    %78 = vector.broadcast %77 : vector<6x8x1xf32> to vector<6x8x8xf32>
    %79 = arith.subf %75, %78 : vector<6x8x8xf32>
    %80 = math.exp %79 : vector<6x8x8xf32>
    %cst_25 = arith.constant dense<0.000000e+00> : vector<6x8xf32>
    %81 = vector.multi_reduction <add>, %80, %cst_25 [2] : vector<6x8x8xf32> to vector<6x8xf32>
    %82 = vector.shape_cast %81 : vector<6x8xf32> to vector<6x8x1xf32>
    %83 = tpu.reciprocal %82 {approx = true} : vector<6x8x1xf32> -> vector<6x8x1xf32>
    %84 = vector.broadcast %83 : vector<6x8x1xf32> to vector<6x8x8xf32>
    %85 = arith.mulf %80, %84 : vector<6x8x8xf32>
    %86 = vector.broadcast %70 : vector<1x1x128xf32> to vector<6x8x128xf32>
    %87 = arith.mulf %35, %86 : vector<6x8x128xf32>
    "tpu.trace_start"() <{level = 10 : i32, message = "bqk,bke->bqe"}> : () -> ()
    %cst_26 = arith.constant dense<0.000000e+00> : vector<6x8x128xf32>
    %88 = tpu.matmul %85, %87, %cst_26 {dimension_numbers = #tpu.dot_dimension_numbers<[2], [1], [1], [2], [0, 0, 0, 1, 1, 2], [0], [0]>} : vector<6x8x8xf32>, vector<6x8x128xf32>, vector<6x8x128xf32> -> vector<6x8x128xf32>
    "tpu.trace_stop"() : () -> ()
    %89 = arith.addf %63, %88 : vector<6x8x128xf32>
    %c64_i32_27 = arith.constant 64 : i32
    %90 = vector.broadcast %c64_i32_27 : i32 to vector<1x1x128xi32>
    %91 = arith.cmpi sge, %36, %90 : vector<1x1x128xi32>
    %c96_i32 = arith.constant 96 : i32
    %92 = vector.broadcast %c96_i32 : i32 to vector<1x1x128xi32>
    %93 = arith.cmpi slt, %36, %92 : vector<1x1x128xi32>
    %94 = arith.andi %91, %93 : vector<1x1x128xi1>
    %95 = arith.extui %94 : vector<1x1x128xi1> to vector<1x1x128xi32>
    %96 = arith.sitofp %95 : vector<1x1x128xi32> to vector<1x1x128xf32>
    %97 = vector.broadcast %96 : vector<1x1x128xf32> to vector<6x8x128xf32>
    %98 = arith.mulf %33, %97 : vector<6x8x128xf32>
    "tpu.trace_start"() <{level = 10 : i32, message = "bqe,bke->bqk"}> : () -> ()
    %cst_28 = arith.constant dense<0.000000e+00> : vector<6x8x8xf32>
    %99 = tpu.matmul %31, %98, %cst_28 {dimension_numbers = #tpu.dot_dimension_numbers<[2], [2], [1], [1], [0, 0, 0, 1, 1, 1], [0], [0]>} : vector<6x8x128xf32>, vector<6x8x128xf32>, vector<6x8x8xf32> -> vector<6x8x8xf32>
    "tpu.trace_stop"() : () -> ()
    %cst_29 = arith.constant 0.176776692 : f32
    %100 = vector.broadcast %cst_29 : f32 to vector<6x8x8xf32>
    %101 = arith.mulf %99, %100 : vector<6x8x8xf32>
    %cst_30 = arith.constant dense<0xFF800000> : vector<6x8xf32>
    %102 = vector.multi_reduction <maximumf>, %101, %cst_30 [2] : vector<6x8x8xf32> to vector<6x8xf32>
    %103 = vector.shape_cast %102 : vector<6x8xf32> to vector<6x8x1xf32>
    %104 = vector.broadcast %103 : vector<6x8x1xf32> to vector<6x8x8xf32>
    %105 = arith.subf %101, %104 : vector<6x8x8xf32>
    %106 = math.exp %105 : vector<6x8x8xf32>
    %cst_31 = arith.constant dense<0.000000e+00> : vector<6x8xf32>
    %107 = vector.multi_reduction <add>, %106, %cst_31 [2] : vector<6x8x8xf32> to vector<6x8xf32>
    %108 = vector.shape_cast %107 : vector<6x8xf32> to vector<6x8x1xf32>
    %109 = tpu.reciprocal %108 {approx = true} : vector<6x8x1xf32> -> vector<6x8x1xf32>
    %110 = vector.broadcast %109 : vector<6x8x1xf32> to vector<6x8x8xf32>
    %111 = arith.mulf %106, %110 : vector<6x8x8xf32>
    %112 = vector.broadcast %96 : vector<1x1x128xf32> to vector<6x8x128xf32>
    %113 = arith.mulf %35, %112 : vector<6x8x128xf32>
    "tpu.trace_start"() <{level = 10 : i32, message = "bqk,bke->bqe"}> : () -> ()
    %cst_32 = arith.constant dense<0.000000e+00> : vector<6x8x128xf32>
    %114 = tpu.matmul %111, %113, %cst_32 {dimension_numbers = #tpu.dot_dimension_numbers<[2], [1], [1], [2], [0, 0, 0, 1, 1, 2], [0], [0]>} : vector<6x8x8xf32>, vector<6x8x128xf32>, vector<6x8x128xf32> -> vector<6x8x128xf32>
    "tpu.trace_stop"() : () -> ()
    %115 = arith.addf %89, %114 : vector<6x8x128xf32>
    %c96_i32_33 = arith.constant 96 : i32
    %116 = vector.broadcast %c96_i32_33 : i32 to vector<1x1x128xi32>
    %117 = arith.cmpi sge, %36, %116 : vector<1x1x128xi32>
    %c128_i32 = arith.constant 128 : i32
    %118 = vector.broadcast %c128_i32 : i32 to vector<1x1x128xi32>
    %119 = arith.cmpi slt, %36, %118 : vector<1x1x128xi32>
    %120 = arith.andi %117, %119 : vector<1x1x128xi1>
    %121 = arith.extui %120 : vector<1x1x128xi1> to vector<1x1x128xi32>
    %122 = arith.sitofp %121 : vector<1x1x128xi32> to vector<1x1x128xf32>
    %123 = vector.broadcast %122 : vector<1x1x128xf32> to vector<6x8x128xf32>
    %124 = arith.mulf %33, %123 : vector<6x8x128xf32>
    "tpu.trace_start"() <{level = 10 : i32, message = "bqe,bke->bqk"}> : () -> ()
    %cst_34 = arith.constant dense<0.000000e+00> : vector<6x8x8xf32>
    %125 = tpu.matmul %31, %124, %cst_34 {dimension_numbers = #tpu.dot_dimension_numbers<[2], [2], [1], [1], [0, 0, 0, 1, 1, 1], [0], [0]>} : vector<6x8x128xf32>, vector<6x8x128xf32>, vector<6x8x8xf32> -> vector<6x8x8xf32>
    "tpu.trace_stop"() : () -> ()
    %cst_35 = arith.constant 0.176776692 : f32
    %126 = vector.broadcast %cst_35 : f32 to vector<6x8x8xf32>
    %127 = arith.mulf %125, %126 : vector<6x8x8xf32>
    %cst_36 = arith.constant dense<0xFF800000> : vector<6x8xf32>
    %128 = vector.multi_reduction <maximumf>, %127, %cst_36 [2] : vector<6x8x8xf32> to vector<6x8xf32>
    %129 = vector.shape_cast %128 : vector<6x8xf32> to vector<6x8x1xf32>
    %130 = vector.broadcast %129 : vector<6x8x1xf32> to vector<6x8x8xf32>
    %131 = arith.subf %127, %130 : vector<6x8x8xf32>
    %132 = math.exp %131 : vector<6x8x8xf32>
    %cst_37 = arith.constant dense<0.000000e+00> : vector<6x8xf32>
    %133 = vector.multi_reduction <add>, %132, %cst_37 [2] : vector<6x8x8xf32> to vector<6x8xf32>
    %134 = vector.shape_cast %133 : vector<6x8xf32> to vector<6x8x1xf32>
    %135 = tpu.reciprocal %134 {approx = true} : vector<6x8x1xf32> -> vector<6x8x1xf32>
    %136 = vector.broadcast %135 : vector<6x8x1xf32> to vector<6x8x8xf32>
    %137 = arith.mulf %132, %136 : vector<6x8x8xf32>
    %138 = vector.broadcast %122 : vector<1x1x128xf32> to vector<6x8x128xf32>
    %139 = arith.mulf %35, %138 : vector<6x8x128xf32>
    "tpu.trace_start"() <{level = 10 : i32, message = "bqk,bke->bqe"}> : () -> ()
    %cst_38 = arith.constant dense<0.000000e+00> : vector<6x8x128xf32>
    %140 = tpu.matmul %137, %139, %cst_38 {dimension_numbers = #tpu.dot_dimension_numbers<[2], [1], [1], [2], [0, 0, 0, 1, 1, 2], [0], [0]>} : vector<6x8x8xf32>, vector<6x8x128xf32>, vector<6x8x128xf32> -> vector<6x8x128xf32>
    "tpu.trace_stop"() : () -> ()
    %141 = arith.addf %115, %140 : vector<6x8x128xf32>
    %142 = vector.shape_cast %141 : vector<6x8x128xf32> to vector<48x128xf32>
    %143 = arith.truncf %142 : vector<48x128xf32> to vector<48x128xbf16>
    %c0_39 = arith.constant 0 : index
    %c0_40 = arith.constant 0 : index
    %144 = vector.load %arg6[%c0_39, %c0_40] : memref<128x128xbf16, #tpu.memory_space<vmem>>, vector<128x128xbf16>
    %cst_41 = arith.constant dense<0.000000e+00> : vector<48x128xf32>
    %145 = tpu.matmul %143, %144, %cst_41 {dimension_numbers = #tpu.dot_dimension_numbers<[1], [0], [0], [1], [0, 0, 1, 1], [], []>} : vector<48x128xbf16>, vector<128x128xbf16>, vector<48x128xf32> -> vector<48x128xf32>
    %c0_42 = arith.constant 0 : index
    %c0_43 = arith.constant 0 : index
    %146 = vector.load %arg7[%c0_42, %c0_43] : memref<1x128xf32, #tpu.memory_space<vmem>>, vector<1x128xf32>
    %147 = vector.broadcast %146 : vector<1x128xf32> to vector<48x128xf32>
    %148 = arith.addf %145, %147 : vector<48x128xf32>
    %c0_44 = arith.constant 0 : index
    %c0_45 = arith.constant 0 : index
    %149 = vector.load %arg8[%c0_44, %c0_45] : memref<1x128xf32, #tpu.memory_space<vmem>>, vector<1x128xf32>
    %c0_46 = arith.constant 0 : index
    %c0_47 = arith.constant 0 : index
    %150 = vector.load %arg9[%c0_46, %c0_47] : memref<1x128xf32, #tpu.memory_space<vmem>>, vector<1x128xf32>
    %cst_48 = arith.constant dense<0.000000e+00> : vector<48xf32>
    %151 = vector.multi_reduction <add>, %148, %cst_48 [1] : vector<48x128xf32> to vector<48xf32>
    %152 = vector.shape_cast %151 : vector<48xf32> to vector<48x1xf32>
    %cst_49 = arith.constant 1.280000e+02 : f32
    %153 = vector.broadcast %cst_49 : f32 to vector<48x1xf32>
    %154 = arith.divf %152, %153 : vector<48x1xf32>
    %155 = vector.broadcast %154 : vector<48x1xf32> to vector<48x128xf32>
    %156 = arith.subf %148, %155 : vector<48x128xf32>
    %157 = arith.mulf %156, %156 : vector<48x128xf32>
    %cst_50 = arith.constant dense<0.000000e+00> : vector<48xf32>
    %158 = vector.multi_reduction <add>, %157, %cst_50 [1] : vector<48x128xf32> to vector<48xf32>
    %159 = vector.shape_cast %158 : vector<48xf32> to vector<48x1xf32>
    %cst_51 = arith.constant 1.280000e+02 : f32
    %160 = vector.broadcast %cst_51 : f32 to vector<48x1xf32>
    %161 = arith.divf %159, %160 : vector<48x1xf32>
    %cst_52 = arith.constant 9.99999974E-6 : f32
    %162 = vector.broadcast %cst_52 : f32 to vector<48x1xf32>
    %163 = arith.addf %161, %162 : vector<48x1xf32>
    %164 = math.rsqrt %163 : vector<48x1xf32>
    %165 = vector.broadcast %164 : vector<48x1xf32> to vector<48x128xf32>
    %166 = arith.mulf %156, %165 : vector<48x128xf32>
    %167 = vector.broadcast %149 : vector<1x128xf32> to vector<48x128xf32>
    %168 = arith.mulf %166, %167 : vector<48x128xf32>
    %169 = vector.broadcast %150 : vector<1x128xf32> to vector<48x128xf32>
    %170 = arith.addf %168, %169 : vector<48x128xf32>
    %171 = arith.addf %1, %170 : vector<48x128xf32>
    %c0_53 = arith.constant 0 : index
    %c0_54 = arith.constant 0 : index
    %172 = vector.load %arg10[%c0_53, %c0_54] : memref<1x128xf32, #tpu.memory_space<vmem>>, vector<1x128xf32>
    %c0_55 = arith.constant 0 : index
    %c0_56 = arith.constant 0 : index
    %173 = vector.load %arg11[%c0_55, %c0_56] : memref<1x128xf32, #tpu.memory_space<vmem>>, vector<1x128xf32>
    %cst_57 = arith.constant dense<0.000000e+00> : vector<48xf32>
    %174 = vector.multi_reduction <add>, %171, %cst_57 [1] : vector<48x128xf32> to vector<48xf32>
    %175 = vector.shape_cast %174 : vector<48xf32> to vector<48x1xf32>
    %cst_58 = arith.constant 1.280000e+02 : f32
    %176 = vector.broadcast %cst_58 : f32 to vector<48x1xf32>
    %177 = arith.divf %175, %176 : vector<48x1xf32>
    %178 = vector.broadcast %177 : vector<48x1xf32> to vector<48x128xf32>
    %179 = arith.subf %171, %178 : vector<48x128xf32>
    %180 = arith.mulf %179, %179 : vector<48x128xf32>
    %cst_59 = arith.constant dense<0.000000e+00> : vector<48xf32>
    %181 = vector.multi_reduction <add>, %180, %cst_59 [1] : vector<48x128xf32> to vector<48xf32>
    %182 = vector.shape_cast %181 : vector<48xf32> to vector<48x1xf32>
    %cst_60 = arith.constant 1.280000e+02 : f32
    %183 = vector.broadcast %cst_60 : f32 to vector<48x1xf32>
    %184 = arith.divf %182, %183 : vector<48x1xf32>
    %cst_61 = arith.constant 9.99999974E-6 : f32
    %185 = vector.broadcast %cst_61 : f32 to vector<48x1xf32>
    %186 = arith.addf %184, %185 : vector<48x1xf32>
    %187 = math.rsqrt %186 : vector<48x1xf32>
    %188 = vector.broadcast %187 : vector<48x1xf32> to vector<48x128xf32>
    %189 = arith.mulf %179, %188 : vector<48x128xf32>
    %190 = vector.broadcast %172 : vector<1x128xf32> to vector<48x128xf32>
    %191 = arith.mulf %189, %190 : vector<48x128xf32>
    %192 = vector.broadcast %173 : vector<1x128xf32> to vector<48x128xf32>
    %193 = arith.addf %191, %192 : vector<48x128xf32>
    %194 = arith.truncf %193 : vector<48x128xf32> to vector<48x128xbf16>
    %c0_62 = arith.constant 0 : index
    %c0_63 = arith.constant 0 : index
    %195 = vector.load %arg12[%c0_62, %c0_63] : memref<128x512xbf16, #tpu.memory_space<vmem>>, vector<128x512xbf16>
    %cst_64 = arith.constant dense<0.000000e+00> : vector<48x512xf32>
    %196 = tpu.matmul %194, %195, %cst_64 {dimension_numbers = #tpu.dot_dimension_numbers<[1], [0], [0], [1], [0, 0, 1, 1], [], []>} : vector<48x128xbf16>, vector<128x512xbf16>, vector<48x512xf32> -> vector<48x512xf32>
    %c0_65 = arith.constant 0 : index
    %c0_66 = arith.constant 0 : index
    %197 = vector.load %arg13[%c0_65, %c0_66] : memref<1x512xf32, #tpu.memory_space<vmem>>, vector<1x512xf32>
    %198 = vector.broadcast %197 : vector<1x512xf32> to vector<48x512xf32>
    %199 = arith.addf %196, %198 : vector<48x512xf32>
    %200 = arith.mulf %199, %199 : vector<48x512xf32>
    %201 = arith.mulf %199, %200 : vector<48x512xf32>
    %cst_67 = arith.constant 4.471500e-02 : f32
    %202 = vector.broadcast %cst_67 : f32 to vector<48x512xf32>
    %203 = arith.mulf %202, %201 : vector<48x512xf32>
    %204 = arith.addf %199, %203 : vector<48x512xf32>
    %cst_68 = arith.constant 0.797884583 : f32
    %205 = vector.broadcast %cst_68 : f32 to vector<48x512xf32>
    %206 = arith.mulf %205, %204 : vector<48x512xf32>
    %207 = math.tanh %206 : vector<48x512xf32>
    %cst_69 = arith.constant 1.000000e+00 : f32
    %208 = vector.broadcast %cst_69 : f32 to vector<48x512xf32>
    %209 = arith.addf %208, %207 : vector<48x512xf32>
    %cst_70 = arith.constant 5.000000e-01 : f32
    %210 = vector.broadcast %cst_70 : f32 to vector<48x512xf32>
    %211 = arith.mulf %210, %209 : vector<48x512xf32>
    %212 = arith.mulf %199, %211 : vector<48x512xf32>
    %213 = arith.truncf %212 : vector<48x512xf32> to vector<48x512xbf16>
    %c0_71 = arith.constant 0 : index
    %c0_72 = arith.constant 0 : index
    %214 = vector.load %arg14[%c0_71, %c0_72] : memref<512x128xbf16, #tpu.memory_space<vmem>>, vector<512x128xbf16>
    %cst_73 = arith.constant dense<0.000000e+00> : vector<48x128xf32>
    %215 = tpu.matmul %213, %214, %cst_73 {dimension_numbers = #tpu.dot_dimension_numbers<[1], [0], [0], [1], [0, 0, 1, 1], [], []>} : vector<48x512xbf16>, vector<512x128xbf16>, vector<48x128xf32> -> vector<48x128xf32>
    %c0_74 = arith.constant 0 : index
    %c0_75 = arith.constant 0 : index
    %216 = vector.load %arg15[%c0_74, %c0_75] : memref<1x128xf32, #tpu.memory_space<vmem>>, vector<1x128xf32>
    %217 = vector.broadcast %216 : vector<1x128xf32> to vector<48x128xf32>
    %218 = arith.addf %215, %217 : vector<48x128xf32>
    %c0_76 = arith.constant 0 : index
    %c0_77 = arith.constant 0 : index
    %219 = vector.load %arg16[%c0_76, %c0_77] : memref<1x128xf32, #tpu.memory_space<vmem>>, vector<1x128xf32>
    %c0_78 = arith.constant 0 : index
    %c0_79 = arith.constant 0 : index
    %220 = vector.load %arg17[%c0_78, %c0_79] : memref<1x128xf32, #tpu.memory_space<vmem>>, vector<1x128xf32>
    %cst_80 = arith.constant dense<0.000000e+00> : vector<48xf32>
    %221 = vector.multi_reduction <add>, %218, %cst_80 [1] : vector<48x128xf32> to vector<48xf32>
    %222 = vector.shape_cast %221 : vector<48xf32> to vector<48x1xf32>
    %cst_81 = arith.constant 1.280000e+02 : f32
    %223 = vector.broadcast %cst_81 : f32 to vector<48x1xf32>
    %224 = arith.divf %222, %223 : vector<48x1xf32>
    %225 = vector.broadcast %224 : vector<48x1xf32> to vector<48x128xf32>
    %226 = arith.subf %218, %225 : vector<48x128xf32>
    %227 = arith.mulf %226, %226 : vector<48x128xf32>
    %cst_82 = arith.constant dense<0.000000e+00> : vector<48xf32>
    %228 = vector.multi_reduction <add>, %227, %cst_82 [1] : vector<48x128xf32> to vector<48xf32>
    %229 = vector.shape_cast %228 : vector<48xf32> to vector<48x1xf32>
    %cst_83 = arith.constant 1.280000e+02 : f32
    %230 = vector.broadcast %cst_83 : f32 to vector<48x1xf32>
    %231 = arith.divf %229, %230 : vector<48x1xf32>
    %cst_84 = arith.constant 9.99999974E-6 : f32
    %232 = vector.broadcast %cst_84 : f32 to vector<48x1xf32>
    %233 = arith.addf %231, %232 : vector<48x1xf32>
    %234 = math.rsqrt %233 : vector<48x1xf32>
    %235 = vector.broadcast %234 : vector<48x1xf32> to vector<48x128xf32>
    %236 = arith.mulf %226, %235 : vector<48x128xf32>
    %237 = vector.broadcast %219 : vector<1x128xf32> to vector<48x128xf32>
    %238 = arith.mulf %236, %237 : vector<48x128xf32>
    %239 = vector.broadcast %220 : vector<1x128xf32> to vector<48x128xf32>
    %240 = arith.addf %238, %239 : vector<48x128xf32>
    %241 = arith.addf %171, %240 : vector<48x128xf32>
    %242 = vector.shape_cast %241 : vector<48x128xf32> to vector<6x8x128xf32>
    %c0_85 = arith.constant 0 : index
    %c0_86 = arith.constant 0 : index
    %c0_87 = arith.constant 0 : index
    %243 = vector.load %arg18[%c0_85, %c0_86, %c0_87] : memref<6x8x128xf32, #tpu.memory_space<vmem>>, vector<6x8x128xf32>
    tpu.vector_store %arg18[%c0_85, %c0_86, %c0_87], %242 {strides = array<i32>} : memref<6x8x128xf32, #tpu.memory_space<vmem>>, vector<6x8x128xf32>,
    return
  }
  func.func @transform_0(%arg0: i32) -> (i32, i32, i32) {
    %c0_i32 = arith.constant 0 : i32
    %c0_i32_0 = arith.constant 0 : i32
    %c0_i32_1 = arith.constant 0 : i32
    return %arg0, %c0_i32, %c0_i32_0 : i32, i32, i32
  }
  func.func @transform_1(%arg0: i32) -> (i32, i32) {
    %c0_i32 = arith.constant 0 : i32
    %c0_i32_0 = arith.constant 0 : i32
    %c0_i32_1 = arith.constant 0 : i32
    return %c0_i32, %c0_i32_0 : i32, i32
  }
  func.func @transform_2(%arg0: i32) -> (i32, i32) {
    %c0_i32 = arith.constant 0 : i32
    %c0_i32_0 = arith.constant 0 : i32
    %c0_i32_1 = arith.constant 0 : i32
    return %c0_i32, %c0_i32_0 : i32, i32
  }
  func.func @transform_3(%arg0: i32) -> (i32, i32) {
    %c0_i32 = arith.constant 0 : i32
    %c0_i32_0 = arith.constant 0 : i32
    %c0_i32_1 = arith.constant 0 : i32
    return %c0_i32, %c0_i32_0 : i32, i32
  }
  func.func @transform_4(%arg0: i32) -> (i32, i32) {
    %c0_i32 = arith.constant 0 : i32
    %c0_i32_0 = arith.constant 0 : i32
    %c0_i32_1 = arith.constant 0 : i32
    return %c0_i32, %c0_i32_0 : i32, i32
  }
  func.func @transform_5(%arg0: i32) -> (i32, i32) {
    %c0_i32 = arith.constant 0 : i32
    %c0_i32_0 = arith.constant 0 : i32
    %c0_i32_1 = arith.constant 0 : i32
    return %c0_i32, %c0_i32_0 : i32, i32
  }
  func.func @transform_6(%arg0: i32) -> (i32, i32) {
    %c0_i32 = arith.constant 0 : i32
    %c0_i32_0 = arith.constant 0 : i32
    %c0_i32_1 = arith.constant 0 : i32
    return %c0_i32, %c0_i32_0 : i32, i32
  }
  func.func @transform_7(%arg0: i32) -> (i32, i32) {
    %c0_i32 = arith.constant 0 : i32
    %c0_i32_0 = arith.constant 0 : i32
    %c0_i32_1 = arith.constant 0 : i32
    return %c0_i32, %c0_i32_0 : i32, i32
  }
  func.func @transform_8(%arg0: i32) -> (i32, i32) {
    %c0_i32 = arith.constant 0 : i32
    %c0_i32_0 = arith.constant 0 : i32
    %c0_i32_1 = arith.constant 0 : i32
    return %c0_i32, %c0_i32_0 : i32, i32
  }
  func.func @transform_9(%arg0: i32) -> (i32, i32) {
    %c0_i32 = arith.constant 0 : i32
    %c0_i32_0 = arith.constant 0 : i32
    %c0_i32_1 = arith.constant 0 : i32
    return %c0_i32, %c0_i32_0 : i32, i32
  }
  func.func @transform_10(%arg0: i32) -> (i32, i32) {
    %c0_i32 = arith.constant 0 : i32
    %c0_i32_0 = arith.constant 0 : i32
    %c0_i32_1 = arith.constant 0 : i32
    return %c0_i32, %c0_i32_0 : i32, i32
  }
  func.func @transform_11(%arg0: i32) -> (i32, i32) {
    %c0_i32 = arith.constant 0 : i32
    %c0_i32_0 = arith.constant 0 : i32
    %c0_i32_1 = arith.constant 0 : i32
    return %c0_i32, %c0_i32_0 : i32, i32
  }
  func.func @transform_12(%arg0: i32) -> (i32, i32) {
    %c0_i32 = arith.constant 0 : i32
    %c0_i32_0 = arith.constant 0 : i32
    %c0_i32_1 = arith.constant 0 : i32
    return %c0_i32, %c0_i32_0 : i32, i32
  }
  func.func @transform_13(%arg0: i32) -> (i32, i32) {
    %c0_i32 = arith.constant 0 : i32
    %c0_i32_0 = arith.constant 0 : i32
    %c0_i32_1 = arith.constant 0 : i32
    return %c0_i32, %c0_i32_0 : i32, i32
  }
  func.func @transform_14(%arg0: i32) -> (i32, i32) {
    %c0_i32 = arith.constant 0 : i32
    %c0_i32_0 = arith.constant 0 : i32
    %c0_i32_1 = arith.constant 0 : i32
    return %c0_i32, %c0_i32_0 : i32, i32
  }
  func.func @transform_15(%arg0: i32) -> (i32, i32) {
    %c0_i32 = arith.constant 0 : i32
    %c0_i32_0 = arith.constant 0 : i32
    %c0_i32_1 = arith.constant 0 : i32
    return %c0_i32, %c0_i32_0 : i32, i32
  }
  func.func @transform_16(%arg0: i32) -> (i32, i32) {
    %c0_i32 = arith.constant 0 : i32
    %c0_i32_0 = arith.constant 0 : i32
    %c0_i32_1 = arith.constant 0 : i32
    return %c0_i32, %c0_i32_0 : i32, i32
  }
  func.func @transform_17(%arg0: i32) -> (i32, i32, i32) {
    %c0_i32 = arith.constant 0 : i32
    %c0_i32_0 = arith.constant 0 : i32
    %c0_i32_1 = arith.constant 0 : i32
    return %arg0, %c0_i32, %c0_i32_0 : i32, i32, i32
  }
}

module attributes {stable_mosaic.version = 11 : i64} {
  func.func @_decoder_kernel(%arg0: i32, %arg1: memref<6x8x128xf32, #tpu.memory_space<vmem>>, %arg2: memref<1x128xf32, #tpu.memory_space<vmem>>, %arg3: memref<1x128xf32, #tpu.memory_space<vmem>>, %arg4: memref<8x128x12xbf16, #tpu.memory_space<vmem>>, %arg5: memref<1x12xf32, #tpu.memory_space<vmem>>, %arg6: memref<6x1xf32, #tpu.memory_space<vmem>>, %arg7: memref<6x1xf32, #tpu.memory_space<vmem>>, %arg8: memref<6x1xf32, #tpu.memory_space<vmem>>, %arg9: memref<6x1xf32, #tpu.memory_space<vmem>>, %arg10: memref<6x12xf32, #tpu.memory_space<vmem>>) attributes {dimension_semantics = [#tpu.dimension_semantics<parallel>], iteration_bounds = array<i64: 1>, scalar_prefetch = 0 : i64, scratch_operands = 0 : i64, tpu.core_type = #tpu.core_type<tc>, window_params = [{transform_indices = @transform_0, window_bounds = array<i64: 6, 8, 128>}, {pipeline_mode = #tpu.pipeline_mode<synchronous>, transform_indices = @transform_1, window_bounds = array<i64: 1, 128>}, {pipeline_mode = #tpu.pipeline_mode<synchronous>, transform_indices = @transform_2, window_bounds = array<i64: 1, 128>}, {pipeline_mode = #tpu.pipeline_mode<synchronous>, transform_indices = @transform_3, window_bounds = array<i64: 8, 128, 12>}, {pipeline_mode = #tpu.pipeline_mode<synchronous>, transform_indices = @transform_4, window_bounds = array<i64: 1, 12>}, {transform_indices = @transform_5, window_bounds = array<i64: 6, 1>}, {transform_indices = @transform_6, window_bounds = array<i64: 6, 1>}, {transform_indices = @transform_7, window_bounds = array<i64: 6, 1>}, {transform_indices = @transform_8, window_bounds = array<i64: 6, 1>}, {transform_indices = @transform_9, window_bounds = array<i64: 6, 12>}]} {
    %c0 = arith.constant 0 : index
    %c0_0 = arith.constant 0 : index
    %c0_1 = arith.constant 0 : index
    %0 = vector.load %arg1[%c0, %c0_0, %c0_1] : memref<6x8x128xf32, #tpu.memory_space<vmem>>, vector<6x8x128xf32>
    %cst = arith.constant 0.000000e+00 : f32
    %1 = vector.broadcast %cst : f32 to vector<6x12xf32>
    %2 = vector.extract_strided_slice %0 {offsets = [0, 0, 0], sizes = [6, 1, 128], strides = [1, 1, 1]} : vector<6x8x128xf32> to vector<6x1x128xf32>
    %3 = vector.shape_cast %2 : vector<6x1x128xf32> to vector<6x128xf32>
    %c0_2 = arith.constant 0 : index
    %c0_3 = arith.constant 0 : index
    %4 = vector.load %arg2[%c0_2, %c0_3] : memref<1x128xf32, #tpu.memory_space<vmem>>, vector<1x128xf32>
    %c0_4 = arith.constant 0 : index
    %c0_5 = arith.constant 0 : index
    %5 = vector.load %arg3[%c0_4, %c0_5] : memref<1x128xf32, #tpu.memory_space<vmem>>, vector<1x128xf32>
    %cst_6 = arith.constant dense<0.000000e+00> : vector<6xf32>
    %6 = vector.multi_reduction <add>, %3, %cst_6 [1] : vector<6x128xf32> to vector<6xf32>
    %7 = vector.shape_cast %6 : vector<6xf32> to vector<6x1xf32>
    %cst_7 = arith.constant 1.280000e+02 : f32
    %8 = vector.broadcast %cst_7 : f32 to vector<6x1xf32>
    %9 = arith.divf %7, %8 : vector<6x1xf32>
    %10 = vector.broadcast %9 : vector<6x1xf32> to vector<6x128xf32>
    %11 = arith.subf %3, %10 : vector<6x128xf32>
    %12 = arith.mulf %11, %11 : vector<6x128xf32>
    %cst_8 = arith.constant dense<0.000000e+00> : vector<6xf32>
    %13 = vector.multi_reduction <add>, %12, %cst_8 [1] : vector<6x128xf32> to vector<6xf32>
    %14 = vector.shape_cast %13 : vector<6xf32> to vector<6x1xf32>
    %cst_9 = arith.constant 1.280000e+02 : f32
    %15 = vector.broadcast %cst_9 : f32 to vector<6x1xf32>
    %16 = arith.divf %14, %15 : vector<6x1xf32>
    %cst_10 = arith.constant 9.99999974E-6 : f32
    %17 = vector.broadcast %cst_10 : f32 to vector<6x1xf32>
    %18 = arith.addf %16, %17 : vector<6x1xf32>
    %19 = math.rsqrt %18 : vector<6x1xf32>
    %20 = vector.broadcast %19 : vector<6x1xf32> to vector<6x128xf32>
    %21 = arith.mulf %11, %20 : vector<6x128xf32>
    %22 = vector.broadcast %4 : vector<1x128xf32> to vector<6x128xf32>
    %23 = arith.mulf %21, %22 : vector<6x128xf32>
    %24 = vector.broadcast %5 : vector<1x128xf32> to vector<6x128xf32>
    %25 = arith.addf %23, %24 : vector<6x128xf32>
    %26 = arith.truncf %25 : vector<6x128xf32> to vector<6x128xbf16>
    %c0_11 = arith.constant 0 : index
    %c0_12 = arith.constant 0 : index
    %c0_13 = arith.constant 0 : index
    %27 = vector.load %arg4[%c0_11, %c0_12, %c0_13] : memref<8x128x12xbf16, #tpu.memory_space<vmem>>, vector<1x128x12xbf16>
    %28 = vector.shape_cast %27 : vector<1x128x12xbf16> to vector<128x12xbf16>
    %cst_14 = arith.constant dense<0.000000e+00> : vector<6x12xf32>
    %29 = tpu.matmul %26, %28, %cst_14 {dimension_numbers = #tpu.dot_dimension_numbers<[1], [0], [0], [1], [0, 0, 1, 1], [], []>} : vector<6x128xbf16>, vector<128x12xbf16>, vector<6x12xf32> -> vector<6x12xf32>
    %30 = arith.addf %1, %29 : vector<6x12xf32>
    %31 = vector.extract_strided_slice %0 {offsets = [0, 1, 0], sizes = [6, 1, 128], strides = [1, 1, 1]} : vector<6x8x128xf32> to vector<6x1x128xf32>
    %32 = vector.shape_cast %31 : vector<6x1x128xf32> to vector<6x128xf32>
    %c0_15 = arith.constant 0 : index
    %c0_16 = arith.constant 0 : index
    %33 = vector.load %arg2[%c0_15, %c0_16] : memref<1x128xf32, #tpu.memory_space<vmem>>, vector<1x128xf32>
    %c0_17 = arith.constant 0 : index
    %c0_18 = arith.constant 0 : index
    %34 = vector.load %arg3[%c0_17, %c0_18] : memref<1x128xf32, #tpu.memory_space<vmem>>, vector<1x128xf32>
    %cst_19 = arith.constant dense<0.000000e+00> : vector<6xf32>
    %35 = vector.multi_reduction <add>, %32, %cst_19 [1] : vector<6x128xf32> to vector<6xf32>
    %36 = vector.shape_cast %35 : vector<6xf32> to vector<6x1xf32>
    %cst_20 = arith.constant 1.280000e+02 : f32
    %37 = vector.broadcast %cst_20 : f32 to vector<6x1xf32>
    %38 = arith.divf %36, %37 : vector<6x1xf32>
    %39 = vector.broadcast %38 : vector<6x1xf32> to vector<6x128xf32>
    %40 = arith.subf %32, %39 : vector<6x128xf32>
    %41 = arith.mulf %40, %40 : vector<6x128xf32>
    %cst_21 = arith.constant dense<0.000000e+00> : vector<6xf32>
    %42 = vector.multi_reduction <add>, %41, %cst_21 [1] : vector<6x128xf32> to vector<6xf32>
    %43 = vector.shape_cast %42 : vector<6xf32> to vector<6x1xf32>
    %cst_22 = arith.constant 1.280000e+02 : f32
    %44 = vector.broadcast %cst_22 : f32 to vector<6x1xf32>
    %45 = arith.divf %43, %44 : vector<6x1xf32>
    %cst_23 = arith.constant 9.99999974E-6 : f32
    %46 = vector.broadcast %cst_23 : f32 to vector<6x1xf32>
    %47 = arith.addf %45, %46 : vector<6x1xf32>
    %48 = math.rsqrt %47 : vector<6x1xf32>
    %49 = vector.broadcast %48 : vector<6x1xf32> to vector<6x128xf32>
    %50 = arith.mulf %40, %49 : vector<6x128xf32>
    %51 = vector.broadcast %33 : vector<1x128xf32> to vector<6x128xf32>
    %52 = arith.mulf %50, %51 : vector<6x128xf32>
    %53 = vector.broadcast %34 : vector<1x128xf32> to vector<6x128xf32>
    %54 = arith.addf %52, %53 : vector<6x128xf32>
    %55 = arith.truncf %54 : vector<6x128xf32> to vector<6x128xbf16>
    %c1 = arith.constant 1 : index
    %c0_24 = arith.constant 0 : index
    %c0_25 = arith.constant 0 : index
    %56 = vector.load %arg4[%c1, %c0_24, %c0_25] : memref<8x128x12xbf16, #tpu.memory_space<vmem>>, vector<1x128x12xbf16>
    %57 = vector.shape_cast %56 : vector<1x128x12xbf16> to vector<128x12xbf16>
    %cst_26 = arith.constant dense<0.000000e+00> : vector<6x12xf32>
    %58 = tpu.matmul %55, %57, %cst_26 {dimension_numbers = #tpu.dot_dimension_numbers<[1], [0], [0], [1], [0, 0, 1, 1], [], []>} : vector<6x128xbf16>, vector<128x12xbf16>, vector<6x12xf32> -> vector<6x12xf32>
    %59 = arith.addf %30, %58 : vector<6x12xf32>
    %60 = vector.extract_strided_slice %0 {offsets = [0, 2, 0], sizes = [6, 1, 128], strides = [1, 1, 1]} : vector<6x8x128xf32> to vector<6x1x128xf32>
    %61 = vector.shape_cast %60 : vector<6x1x128xf32> to vector<6x128xf32>
    %c0_27 = arith.constant 0 : index
    %c0_28 = arith.constant 0 : index
    %62 = vector.load %arg2[%c0_27, %c0_28] : memref<1x128xf32, #tpu.memory_space<vmem>>, vector<1x128xf32>
    %c0_29 = arith.constant 0 : index
    %c0_30 = arith.constant 0 : index
    %63 = vector.load %arg3[%c0_29, %c0_30] : memref<1x128xf32, #tpu.memory_space<vmem>>, vector<1x128xf32>
    %cst_31 = arith.constant dense<0.000000e+00> : vector<6xf32>
    %64 = vector.multi_reduction <add>, %61, %cst_31 [1] : vector<6x128xf32> to vector<6xf32>
    %65 = vector.shape_cast %64 : vector<6xf32> to vector<6x1xf32>
    %cst_32 = arith.constant 1.280000e+02 : f32
    %66 = vector.broadcast %cst_32 : f32 to vector<6x1xf32>
    %67 = arith.divf %65, %66 : vector<6x1xf32>
    %68 = vector.broadcast %67 : vector<6x1xf32> to vector<6x128xf32>
    %69 = arith.subf %61, %68 : vector<6x128xf32>
    %70 = arith.mulf %69, %69 : vector<6x128xf32>
    %cst_33 = arith.constant dense<0.000000e+00> : vector<6xf32>
    %71 = vector.multi_reduction <add>, %70, %cst_33 [1] : vector<6x128xf32> to vector<6xf32>
    %72 = vector.shape_cast %71 : vector<6xf32> to vector<6x1xf32>
    %cst_34 = arith.constant 1.280000e+02 : f32
    %73 = vector.broadcast %cst_34 : f32 to vector<6x1xf32>
    %74 = arith.divf %72, %73 : vector<6x1xf32>
    %cst_35 = arith.constant 9.99999974E-6 : f32
    %75 = vector.broadcast %cst_35 : f32 to vector<6x1xf32>
    %76 = arith.addf %74, %75 : vector<6x1xf32>
    %77 = math.rsqrt %76 : vector<6x1xf32>
    %78 = vector.broadcast %77 : vector<6x1xf32> to vector<6x128xf32>
    %79 = arith.mulf %69, %78 : vector<6x128xf32>
    %80 = vector.broadcast %62 : vector<1x128xf32> to vector<6x128xf32>
    %81 = arith.mulf %79, %80 : vector<6x128xf32>
    %82 = vector.broadcast %63 : vector<1x128xf32> to vector<6x128xf32>
    %83 = arith.addf %81, %82 : vector<6x128xf32>
    %84 = arith.truncf %83 : vector<6x128xf32> to vector<6x128xbf16>
    %c2 = arith.constant 2 : index
    %c0_36 = arith.constant 0 : index
    %c0_37 = arith.constant 0 : index
    %85 = vector.load %arg4[%c2, %c0_36, %c0_37] : memref<8x128x12xbf16, #tpu.memory_space<vmem>>, vector<1x128x12xbf16>
    %86 = vector.shape_cast %85 : vector<1x128x12xbf16> to vector<128x12xbf16>
    %cst_38 = arith.constant dense<0.000000e+00> : vector<6x12xf32>
    %87 = tpu.matmul %84, %86, %cst_38 {dimension_numbers = #tpu.dot_dimension_numbers<[1], [0], [0], [1], [0, 0, 1, 1], [], []>} : vector<6x128xbf16>, vector<128x12xbf16>, vector<6x12xf32> -> vector<6x12xf32>
    %88 = arith.addf %59, %87 : vector<6x12xf32>
    %89 = vector.extract_strided_slice %0 {offsets = [0, 3, 0], sizes = [6, 1, 128], strides = [1, 1, 1]} : vector<6x8x128xf32> to vector<6x1x128xf32>
    %90 = vector.shape_cast %89 : vector<6x1x128xf32> to vector<6x128xf32>
    %c0_39 = arith.constant 0 : index
    %c0_40 = arith.constant 0 : index
    %91 = vector.load %arg2[%c0_39, %c0_40] : memref<1x128xf32, #tpu.memory_space<vmem>>, vector<1x128xf32>
    %c0_41 = arith.constant 0 : index
    %c0_42 = arith.constant 0 : index
    %92 = vector.load %arg3[%c0_41, %c0_42] : memref<1x128xf32, #tpu.memory_space<vmem>>, vector<1x128xf32>
    %cst_43 = arith.constant dense<0.000000e+00> : vector<6xf32>
    %93 = vector.multi_reduction <add>, %90, %cst_43 [1] : vector<6x128xf32> to vector<6xf32>
    %94 = vector.shape_cast %93 : vector<6xf32> to vector<6x1xf32>
    %cst_44 = arith.constant 1.280000e+02 : f32
    %95 = vector.broadcast %cst_44 : f32 to vector<6x1xf32>
    %96 = arith.divf %94, %95 : vector<6x1xf32>
    %97 = vector.broadcast %96 : vector<6x1xf32> to vector<6x128xf32>
    %98 = arith.subf %90, %97 : vector<6x128xf32>
    %99 = arith.mulf %98, %98 : vector<6x128xf32>
    %cst_45 = arith.constant dense<0.000000e+00> : vector<6xf32>
    %100 = vector.multi_reduction <add>, %99, %cst_45 [1] : vector<6x128xf32> to vector<6xf32>
    %101 = vector.shape_cast %100 : vector<6xf32> to vector<6x1xf32>
    %cst_46 = arith.constant 1.280000e+02 : f32
    %102 = vector.broadcast %cst_46 : f32 to vector<6x1xf32>
    %103 = arith.divf %101, %102 : vector<6x1xf32>
    %cst_47 = arith.constant 9.99999974E-6 : f32
    %104 = vector.broadcast %cst_47 : f32 to vector<6x1xf32>
    %105 = arith.addf %103, %104 : vector<6x1xf32>
    %106 = math.rsqrt %105 : vector<6x1xf32>
    %107 = vector.broadcast %106 : vector<6x1xf32> to vector<6x128xf32>
    %108 = arith.mulf %98, %107 : vector<6x128xf32>
    %109 = vector.broadcast %91 : vector<1x128xf32> to vector<6x128xf32>
    %110 = arith.mulf %108, %109 : vector<6x128xf32>
    %111 = vector.broadcast %92 : vector<1x128xf32> to vector<6x128xf32>
    %112 = arith.addf %110, %111 : vector<6x128xf32>
    %113 = arith.truncf %112 : vector<6x128xf32> to vector<6x128xbf16>
    %c3 = arith.constant 3 : index
    %c0_48 = arith.constant 0 : index
    %c0_49 = arith.constant 0 : index
    %114 = vector.load %arg4[%c3, %c0_48, %c0_49] : memref<8x128x12xbf16, #tpu.memory_space<vmem>>, vector<1x128x12xbf16>
    %115 = vector.shape_cast %114 : vector<1x128x12xbf16> to vector<128x12xbf16>
    %cst_50 = arith.constant dense<0.000000e+00> : vector<6x12xf32>
    %116 = tpu.matmul %113, %115, %cst_50 {dimension_numbers = #tpu.dot_dimension_numbers<[1], [0], [0], [1], [0, 0, 1, 1], [], []>} : vector<6x128xbf16>, vector<128x12xbf16>, vector<6x12xf32> -> vector<6x12xf32>
    %117 = arith.addf %88, %116 : vector<6x12xf32>
    %118 = vector.extract_strided_slice %0 {offsets = [0, 4, 0], sizes = [6, 1, 128], strides = [1, 1, 1]} : vector<6x8x128xf32> to vector<6x1x128xf32>
    %119 = vector.shape_cast %118 : vector<6x1x128xf32> to vector<6x128xf32>
    %c0_51 = arith.constant 0 : index
    %c0_52 = arith.constant 0 : index
    %120 = vector.load %arg2[%c0_51, %c0_52] : memref<1x128xf32, #tpu.memory_space<vmem>>, vector<1x128xf32>
    %c0_53 = arith.constant 0 : index
    %c0_54 = arith.constant 0 : index
    %121 = vector.load %arg3[%c0_53, %c0_54] : memref<1x128xf32, #tpu.memory_space<vmem>>, vector<1x128xf32>
    %cst_55 = arith.constant dense<0.000000e+00> : vector<6xf32>
    %122 = vector.multi_reduction <add>, %119, %cst_55 [1] : vector<6x128xf32> to vector<6xf32>
    %123 = vector.shape_cast %122 : vector<6xf32> to vector<6x1xf32>
    %cst_56 = arith.constant 1.280000e+02 : f32
    %124 = vector.broadcast %cst_56 : f32 to vector<6x1xf32>
    %125 = arith.divf %123, %124 : vector<6x1xf32>
    %126 = vector.broadcast %125 : vector<6x1xf32> to vector<6x128xf32>
    %127 = arith.subf %119, %126 : vector<6x128xf32>
    %128 = arith.mulf %127, %127 : vector<6x128xf32>
    %cst_57 = arith.constant dense<0.000000e+00> : vector<6xf32>
    %129 = vector.multi_reduction <add>, %128, %cst_57 [1] : vector<6x128xf32> to vector<6xf32>
    %130 = vector.shape_cast %129 : vector<6xf32> to vector<6x1xf32>
    %cst_58 = arith.constant 1.280000e+02 : f32
    %131 = vector.broadcast %cst_58 : f32 to vector<6x1xf32>
    %132 = arith.divf %130, %131 : vector<6x1xf32>
    %cst_59 = arith.constant 9.99999974E-6 : f32
    %133 = vector.broadcast %cst_59 : f32 to vector<6x1xf32>
    %134 = arith.addf %132, %133 : vector<6x1xf32>
    %135 = math.rsqrt %134 : vector<6x1xf32>
    %136 = vector.broadcast %135 : vector<6x1xf32> to vector<6x128xf32>
    %137 = arith.mulf %127, %136 : vector<6x128xf32>
    %138 = vector.broadcast %120 : vector<1x128xf32> to vector<6x128xf32>
    %139 = arith.mulf %137, %138 : vector<6x128xf32>
    %140 = vector.broadcast %121 : vector<1x128xf32> to vector<6x128xf32>
    %141 = arith.addf %139, %140 : vector<6x128xf32>
    %142 = arith.truncf %141 : vector<6x128xf32> to vector<6x128xbf16>
    %c4 = arith.constant 4 : index
    %c0_60 = arith.constant 0 : index
    %c0_61 = arith.constant 0 : index
    %143 = vector.load %arg4[%c4, %c0_60, %c0_61] : memref<8x128x12xbf16, #tpu.memory_space<vmem>>, vector<1x128x12xbf16>
    %144 = vector.shape_cast %143 : vector<1x128x12xbf16> to vector<128x12xbf16>
    %cst_62 = arith.constant dense<0.000000e+00> : vector<6x12xf32>
    %145 = tpu.matmul %142, %144, %cst_62 {dimension_numbers = #tpu.dot_dimension_numbers<[1], [0], [0], [1], [0, 0, 1, 1], [], []>} : vector<6x128xbf16>, vector<128x12xbf16>, vector<6x12xf32> -> vector<6x12xf32>
    %146 = arith.addf %117, %145 : vector<6x12xf32>
    %147 = vector.extract_strided_slice %0 {offsets = [0, 5, 0], sizes = [6, 1, 128], strides = [1, 1, 1]} : vector<6x8x128xf32> to vector<6x1x128xf32>
    %148 = vector.shape_cast %147 : vector<6x1x128xf32> to vector<6x128xf32>
    %c0_63 = arith.constant 0 : index
    %c0_64 = arith.constant 0 : index
    %149 = vector.load %arg2[%c0_63, %c0_64] : memref<1x128xf32, #tpu.memory_space<vmem>>, vector<1x128xf32>
    %c0_65 = arith.constant 0 : index
    %c0_66 = arith.constant 0 : index
    %150 = vector.load %arg3[%c0_65, %c0_66] : memref<1x128xf32, #tpu.memory_space<vmem>>, vector<1x128xf32>
    %cst_67 = arith.constant dense<0.000000e+00> : vector<6xf32>
    %151 = vector.multi_reduction <add>, %148, %cst_67 [1] : vector<6x128xf32> to vector<6xf32>
    %152 = vector.shape_cast %151 : vector<6xf32> to vector<6x1xf32>
    %cst_68 = arith.constant 1.280000e+02 : f32
    %153 = vector.broadcast %cst_68 : f32 to vector<6x1xf32>
    %154 = arith.divf %152, %153 : vector<6x1xf32>
    %155 = vector.broadcast %154 : vector<6x1xf32> to vector<6x128xf32>
    %156 = arith.subf %148, %155 : vector<6x128xf32>
    %157 = arith.mulf %156, %156 : vector<6x128xf32>
    %cst_69 = arith.constant dense<0.000000e+00> : vector<6xf32>
    %158 = vector.multi_reduction <add>, %157, %cst_69 [1] : vector<6x128xf32> to vector<6xf32>
    %159 = vector.shape_cast %158 : vector<6xf32> to vector<6x1xf32>
    %cst_70 = arith.constant 1.280000e+02 : f32
    %160 = vector.broadcast %cst_70 : f32 to vector<6x1xf32>
    %161 = arith.divf %159, %160 : vector<6x1xf32>
    %cst_71 = arith.constant 9.99999974E-6 : f32
    %162 = vector.broadcast %cst_71 : f32 to vector<6x1xf32>
    %163 = arith.addf %161, %162 : vector<6x1xf32>
    %164 = math.rsqrt %163 : vector<6x1xf32>
    %165 = vector.broadcast %164 : vector<6x1xf32> to vector<6x128xf32>
    %166 = arith.mulf %156, %165 : vector<6x128xf32>
    %167 = vector.broadcast %149 : vector<1x128xf32> to vector<6x128xf32>
    %168 = arith.mulf %166, %167 : vector<6x128xf32>
    %169 = vector.broadcast %150 : vector<1x128xf32> to vector<6x128xf32>
    %170 = arith.addf %168, %169 : vector<6x128xf32>
    %171 = arith.truncf %170 : vector<6x128xf32> to vector<6x128xbf16>
    %c5 = arith.constant 5 : index
    %c0_72 = arith.constant 0 : index
    %c0_73 = arith.constant 0 : index
    %172 = vector.load %arg4[%c5, %c0_72, %c0_73] : memref<8x128x12xbf16, #tpu.memory_space<vmem>>, vector<1x128x12xbf16>
    %173 = vector.shape_cast %172 : vector<1x128x12xbf16> to vector<128x12xbf16>
    %cst_74 = arith.constant dense<0.000000e+00> : vector<6x12xf32>
    %174 = tpu.matmul %171, %173, %cst_74 {dimension_numbers = #tpu.dot_dimension_numbers<[1], [0], [0], [1], [0, 0, 1, 1], [], []>} : vector<6x128xbf16>, vector<128x12xbf16>, vector<6x12xf32> -> vector<6x12xf32>
    %175 = arith.addf %146, %174 : vector<6x12xf32>
    %176 = vector.extract_strided_slice %0 {offsets = [0, 6, 0], sizes = [6, 1, 128], strides = [1, 1, 1]} : vector<6x8x128xf32> to vector<6x1x128xf32>
    %177 = vector.shape_cast %176 : vector<6x1x128xf32> to vector<6x128xf32>
    %c0_75 = arith.constant 0 : index
    %c0_76 = arith.constant 0 : index
    %178 = vector.load %arg2[%c0_75, %c0_76] : memref<1x128xf32, #tpu.memory_space<vmem>>, vector<1x128xf32>
    %c0_77 = arith.constant 0 : index
    %c0_78 = arith.constant 0 : index
    %179 = vector.load %arg3[%c0_77, %c0_78] : memref<1x128xf32, #tpu.memory_space<vmem>>, vector<1x128xf32>
    %cst_79 = arith.constant dense<0.000000e+00> : vector<6xf32>
    %180 = vector.multi_reduction <add>, %177, %cst_79 [1] : vector<6x128xf32> to vector<6xf32>
    %181 = vector.shape_cast %180 : vector<6xf32> to vector<6x1xf32>
    %cst_80 = arith.constant 1.280000e+02 : f32
    %182 = vector.broadcast %cst_80 : f32 to vector<6x1xf32>
    %183 = arith.divf %181, %182 : vector<6x1xf32>
    %184 = vector.broadcast %183 : vector<6x1xf32> to vector<6x128xf32>
    %185 = arith.subf %177, %184 : vector<6x128xf32>
    %186 = arith.mulf %185, %185 : vector<6x128xf32>
    %cst_81 = arith.constant dense<0.000000e+00> : vector<6xf32>
    %187 = vector.multi_reduction <add>, %186, %cst_81 [1] : vector<6x128xf32> to vector<6xf32>
    %188 = vector.shape_cast %187 : vector<6xf32> to vector<6x1xf32>
    %cst_82 = arith.constant 1.280000e+02 : f32
    %189 = vector.broadcast %cst_82 : f32 to vector<6x1xf32>
    %190 = arith.divf %188, %189 : vector<6x1xf32>
    %cst_83 = arith.constant 9.99999974E-6 : f32
    %191 = vector.broadcast %cst_83 : f32 to vector<6x1xf32>
    %192 = arith.addf %190, %191 : vector<6x1xf32>
    %193 = math.rsqrt %192 : vector<6x1xf32>
    %194 = vector.broadcast %193 : vector<6x1xf32> to vector<6x128xf32>
    %195 = arith.mulf %185, %194 : vector<6x128xf32>
    %196 = vector.broadcast %178 : vector<1x128xf32> to vector<6x128xf32>
    %197 = arith.mulf %195, %196 : vector<6x128xf32>
    %198 = vector.broadcast %179 : vector<1x128xf32> to vector<6x128xf32>
    %199 = arith.addf %197, %198 : vector<6x128xf32>
    %200 = arith.truncf %199 : vector<6x128xf32> to vector<6x128xbf16>
    %c6 = arith.constant 6 : index
    %c0_84 = arith.constant 0 : index
    %c0_85 = arith.constant 0 : index
    %201 = vector.load %arg4[%c6, %c0_84, %c0_85] : memref<8x128x12xbf16, #tpu.memory_space<vmem>>, vector<1x128x12xbf16>
    %202 = vector.shape_cast %201 : vector<1x128x12xbf16> to vector<128x12xbf16>
    %cst_86 = arith.constant dense<0.000000e+00> : vector<6x12xf32>
    %203 = tpu.matmul %200, %202, %cst_86 {dimension_numbers = #tpu.dot_dimension_numbers<[1], [0], [0], [1], [0, 0, 1, 1], [], []>} : vector<6x128xbf16>, vector<128x12xbf16>, vector<6x12xf32> -> vector<6x12xf32>
    %204 = arith.addf %175, %203 : vector<6x12xf32>
    %205 = vector.extract_strided_slice %0 {offsets = [0, 7, 0], sizes = [6, 1, 128], strides = [1, 1, 1]} : vector<6x8x128xf32> to vector<6x1x128xf32>
    %206 = vector.shape_cast %205 : vector<6x1x128xf32> to vector<6x128xf32>
    %c0_87 = arith.constant 0 : index
    %c0_88 = arith.constant 0 : index
    %207 = vector.load %arg2[%c0_87, %c0_88] : memref<1x128xf32, #tpu.memory_space<vmem>>, vector<1x128xf32>
    %c0_89 = arith.constant 0 : index
    %c0_90 = arith.constant 0 : index
    %208 = vector.load %arg3[%c0_89, %c0_90] : memref<1x128xf32, #tpu.memory_space<vmem>>, vector<1x128xf32>
    %cst_91 = arith.constant dense<0.000000e+00> : vector<6xf32>
    %209 = vector.multi_reduction <add>, %206, %cst_91 [1] : vector<6x128xf32> to vector<6xf32>
    %210 = vector.shape_cast %209 : vector<6xf32> to vector<6x1xf32>
    %cst_92 = arith.constant 1.280000e+02 : f32
    %211 = vector.broadcast %cst_92 : f32 to vector<6x1xf32>
    %212 = arith.divf %210, %211 : vector<6x1xf32>
    %213 = vector.broadcast %212 : vector<6x1xf32> to vector<6x128xf32>
    %214 = arith.subf %206, %213 : vector<6x128xf32>
    %215 = arith.mulf %214, %214 : vector<6x128xf32>
    %cst_93 = arith.constant dense<0.000000e+00> : vector<6xf32>
    %216 = vector.multi_reduction <add>, %215, %cst_93 [1] : vector<6x128xf32> to vector<6xf32>
    %217 = vector.shape_cast %216 : vector<6xf32> to vector<6x1xf32>
    %cst_94 = arith.constant 1.280000e+02 : f32
    %218 = vector.broadcast %cst_94 : f32 to vector<6x1xf32>
    %219 = arith.divf %217, %218 : vector<6x1xf32>
    %cst_95 = arith.constant 9.99999974E-6 : f32
    %220 = vector.broadcast %cst_95 : f32 to vector<6x1xf32>
    %221 = arith.addf %219, %220 : vector<6x1xf32>
    %222 = math.rsqrt %221 : vector<6x1xf32>
    %223 = vector.broadcast %222 : vector<6x1xf32> to vector<6x128xf32>
    %224 = arith.mulf %214, %223 : vector<6x128xf32>
    %225 = vector.broadcast %207 : vector<1x128xf32> to vector<6x128xf32>
    %226 = arith.mulf %224, %225 : vector<6x128xf32>
    %227 = vector.broadcast %208 : vector<1x128xf32> to vector<6x128xf32>
    %228 = arith.addf %226, %227 : vector<6x128xf32>
    %229 = arith.truncf %228 : vector<6x128xf32> to vector<6x128xbf16>
    %c7 = arith.constant 7 : index
    %c0_96 = arith.constant 0 : index
    %c0_97 = arith.constant 0 : index
    %230 = vector.load %arg4[%c7, %c0_96, %c0_97] : memref<8x128x12xbf16, #tpu.memory_space<vmem>>, vector<1x128x12xbf16>
    %231 = vector.shape_cast %230 : vector<1x128x12xbf16> to vector<128x12xbf16>
    %cst_98 = arith.constant dense<0.000000e+00> : vector<6x12xf32>
    %232 = tpu.matmul %229, %231, %cst_98 {dimension_numbers = #tpu.dot_dimension_numbers<[1], [0], [0], [1], [0, 0, 1, 1], [], []>} : vector<6x128xbf16>, vector<128x12xbf16>, vector<6x12xf32> -> vector<6x12xf32>
    %233 = arith.addf %204, %232 : vector<6x12xf32>
    %c0_99 = arith.constant 0 : index
    %c0_100 = arith.constant 0 : index
    %234 = vector.load %arg5[%c0_99, %c0_100] : memref<1x12xf32, #tpu.memory_space<vmem>>, vector<1x12xf32>
    %235 = vector.broadcast %234 : vector<1x12xf32> to vector<6x12xf32>
    %236 = arith.addf %233, %235 : vector<6x12xf32>
    %c0_101 = arith.constant 0 : index
    %c0_102 = arith.constant 0 : index
    %237 = vector.load %arg7[%c0_101, %c0_102] : memref<6x1xf32, #tpu.memory_space<vmem>>, vector<6x1xf32>
    %238 = vector.broadcast %237 : vector<6x1xf32> to vector<6x12xf32>
    %239 = arith.subf %236, %238 : vector<6x12xf32>
    %c0_103 = arith.constant 0 : index
    %c0_104 = arith.constant 0 : index
    %240 = vector.load %arg6[%c0_103, %c0_104] : memref<6x1xf32, #tpu.memory_space<vmem>>, vector<6x1xf32>
    %cst_105 = arith.constant 1.000000e-10 : f32
    %241 = vector.broadcast %cst_105 : f32 to vector<6x1xf32>
    %242 = arith.addf %240, %241 : vector<6x1xf32>
    %243 = vector.broadcast %242 : vector<6x1xf32> to vector<6x12xf32>
    %244 = arith.divf %239, %243 : vector<6x12xf32>
    %c0_106 = arith.constant 0 : index
    %c0_107 = arith.constant 0 : index
    %245 = vector.load %arg9[%c0_106, %c0_107] : memref<6x1xf32, #tpu.memory_space<vmem>>, vector<6x1xf32>
    %246 = vector.broadcast %245 : vector<6x1xf32> to vector<6x12xf32>
    %247 = arith.mulf %244, %246 : vector<6x12xf32>
    %c0_108 = arith.constant 0 : index
    %c0_109 = arith.constant 0 : index
    %248 = vector.load %arg8[%c0_108, %c0_109] : memref<6x1xf32, #tpu.memory_space<vmem>>, vector<6x1xf32>
    %249 = vector.broadcast %248 : vector<6x1xf32> to vector<6x12xf32>
    %250 = arith.addf %247, %249 : vector<6x12xf32>
    %c0_110 = arith.constant 0 : index
    %c0_111 = arith.constant 0 : index
    %251 = vector.load %arg10[%c0_110, %c0_111] : memref<6x12xf32, #tpu.memory_space<vmem>>, vector<6x12xf32>
    tpu.vector_store %arg10[%c0_110, %c0_111], %250 {strides = array<i32>} : memref<6x12xf32, #tpu.memory_space<vmem>>, vector<6x12xf32>,
    return
  }
  func.func @transform_0(%arg0: i32) -> (i32, i32, i32) {
    %c0_i32 = arith.constant 0 : i32
    %c0_i32_0 = arith.constant 0 : i32
    %c0_i32_1 = arith.constant 0 : i32
    return %arg0, %c0_i32, %c0_i32_0 : i32, i32, i32
  }
  func.func @transform_1(%arg0: i32) -> (i32, i32) {
    %c0_i32 = arith.constant 0 : i32
    %c0_i32_0 = arith.constant 0 : i32
    %c0_i32_1 = arith.constant 0 : i32
    return %c0_i32, %c0_i32_0 : i32, i32
  }
  func.func @transform_2(%arg0: i32) -> (i32, i32) {
    %c0_i32 = arith.constant 0 : i32
    %c0_i32_0 = arith.constant 0 : i32
    %c0_i32_1 = arith.constant 0 : i32
    return %c0_i32, %c0_i32_0 : i32, i32
  }
  func.func @transform_3(%arg0: i32) -> (i32, i32, i32) {
    %c0_i32 = arith.constant 0 : i32
    %c0_i32_0 = arith.constant 0 : i32
    %c0_i32_1 = arith.constant 0 : i32
    %c0_i32_2 = arith.constant 0 : i32
    return %c0_i32, %c0_i32_0, %c0_i32_1 : i32, i32, i32
  }
  func.func @transform_4(%arg0: i32) -> (i32, i32) {
    %c0_i32 = arith.constant 0 : i32
    %c0_i32_0 = arith.constant 0 : i32
    %c0_i32_1 = arith.constant 0 : i32
    return %c0_i32, %c0_i32_0 : i32, i32
  }
  func.func @transform_5(%arg0: i32) -> (i32, i32) {
    %c0_i32 = arith.constant 0 : i32
    %c0_i32_0 = arith.constant 0 : i32
    return %arg0, %c0_i32 : i32, i32
  }
  func.func @transform_6(%arg0: i32) -> (i32, i32) {
    %c0_i32 = arith.constant 0 : i32
    %c0_i32_0 = arith.constant 0 : i32
    return %arg0, %c0_i32 : i32, i32
  }
  func.func @transform_7(%arg0: i32) -> (i32, i32) {
    %c0_i32 = arith.constant 0 : i32
    %c0_i32_0 = arith.constant 0 : i32
    return %arg0, %c0_i32 : i32, i32
  }
  func.func @transform_8(%arg0: i32) -> (i32, i32) {
    %c0_i32 = arith.constant 0 : i32
    %c0_i32_0 = arith.constant 0 : i32
    return %arg0, %c0_i32 : i32, i32
  }
  func.func @transform_9(%arg0: i32) -> (i32, i32) {
    %c0_i32 = arith.constant 0 : i32
    %c0_i32_0 = arith.constant 0 : i32
    return %arg0, %c0_i32 : i32, i32
  }
}

</mosaic_0001>

<bundles_post_ra>
// kernel: tile.18
= control target key start
LH: loop header
LB: loop body
LE: loop exit
PB: predicated region body
PF: predicated region fallthrough
CT: control target
= control target key end

     0   :  { %s22_s0 = inlined_call_operand.vmem [shape: f32[8], index: 0, kind: input, shape index: {}]   ;;  %s23_s1 = inlined_call_operand.vmem [shape: f32[4,8], index: 1, kind: output, shape index: {}]  }
   0x1   :  { %v4_v0 = vld [vmem:[%s22_s0] ss:$0 sm:$0xff] }
   0x2   :  { %5 = vst [vmem:[%s23_s1] sm:$0xf] %v4_v0 }

// kernel: tile.19
= control target key start
LH: loop header
LB: loop body
LE: loop exit
PB: predicated region body
PF: predicated region fallthrough
CT: control target
= control target key end

     0   :  { %vm8_vm0 = vcmask 64512   ;;  %s40_s8 = smov 8   ;;  %s41_s9 = smov 16   ;;  %vm14_vm1 = vcmask 261312   ;;  %vm20_vm2 = vcmask 195712   ;;  %vm26_vm3 = vcmask 130112   ;;  %s58_s0 = inlined_call_operand.vmem [shape: f32[4,8], index: 0, kind: input, shape index: {}]   ;;  %s59_s1 = inlined_call_operand.vmem [shape: f32[1,32], index: 1, kind: output, shape index: {}]  }
   0x1   :  { %v5_v0 = vld [vmem:[%s58_s0] sm:$0xf]  ;;  %s39_s0 = smov 24  }
   0x2   :  { %6 = vst [vmem:[#allocation1] sm:$0xf] %v5_v0 }
   0x9   :  { %v11_v1 = vld [vmem:[#allocation1 + $0x3] sm:$0x1]   ;;  %v23_v2 = vld [vmem:[#allocation1 + $0x1] sm:$0x1]   ;;  %v7_v3 = vld [vmem:[#allocation1] sm:$0x1]  }
   0xa   :  { %12 = vrot.lane.b32.xlu0 %v11_v1, %s39_s0  ;;  %24 = vrot.lane.b32.xlu1 %v23_v2, %s40_s8  ;;  %v17_v4 = vld [vmem:[#allocation1 + $0x2] sm:$0x1]   ;;  %9 = vst.msk [vmem:[#allocation0] sm:$0x1] %vm8_vm0, %v7_v3  }
   0xe   :  { %18 = vrot.lane.b32.xlu0 %v17_v4, %s41_s9 }
  0x7c   :  { %v13_v5 = vpop.permute.xlu0 %12   ;;  %v25_v6 = vpop.permute.xlu1 %24  }
  0x7d   :  { %15 = vst.msk [vmem:[#allocation0] sm:$0x1] %vm14_vm1, %v13_v5  }
  0x80   :  { %v19_v7 = vpop.permute.xlu0 %18  }
  0x81   :  { %21 = vst.msk [vmem:[#allocation0] sm:$0x1] %vm20_vm2, %v19_v7  }
  0x82   :  { %27 = vst.msk [vmem:[#allocation0] sm:$0x1] %vm26_vm3, %v25_v6  }
  0x89   :  { %v32_v8 = vld [vmem:[#allocation0] sm:$0x1] }
  0x8a   :  { %35 = vst [vmem:[%s59_s1] sm:$0x1] %v32_v8 }

// kernel: patchtst_forward.5
= control target key start
LH: loop header
LB: loop body
LE: loop exit
PB: predicated region body
PF: predicated region fallthrough
CT: control target
= control target key end

     0   :  { %vm19_vm0 = vcmask 256000   ;;  %v107_v4 = vmov 0   ;;  %vm79_vm1 = vcmask 2048   ;;  %s178_s0 = inlined_call_operand.vmem [shape: f32[2,3,32], index: 0, kind: input, shape index: {}]   ;;  %s179_s1 = inlined_call_operand.vmem [shape: f32[1,3,1], index: 1, kind: input, shape index: {}]   ;;  %s180_s4 = inlined_call_operand.vmem [shape: f32[2,3,1], index: 4, kind: output, shape index: {1}]   ;;  %s181_s2 = inlined_call_operand.vmem [shape: f32[1,3,1], index: 2, kind: input, shape index: {}]   ;;  %s182_s5 = inlined_call_operand.vmem [shape: f32[2,3,1], index: 5, kind: output, shape index: {2}]   ;;  %s183_s3 = inlined_call_operand.vmem [shape: f32[2,3,32], index: 3, kind: output, shape index: {0}]  }
   0x1   :  { %v17_v0 = vld [vmem:[%s178_s0] sm:$0x7]  ;;  %v18_v1 = vld [vmem:[%s178_s0 + $0x4] sm:$0x7]  ;;  %97 = vset.pattern.permute.xlu0 %v107_v4  ;;  %98 = vset.pattern.permute.xlu1 %v107_v4 }
   0x2   :  { %v20_v2 = vsel %vm19_vm0, %v17_v0, 0.0  ;;  %v23_v3 = vsel %vm19_vm0, %v18_v1, 0.0  ;;  %v61_v5 = vld [vmem:[%s179_s1] sm:$0x7] }
   0x3   :  { %21 = vadd.xlane.f32.xlu0 %v20_v2  ;;  %v69_v16 = vld [vmem:[%s181_s2] sm:$0x7] }
   0x7   :  { %24 = vadd.xlane.f32.xlu0 %v23_v3 }
  0x1d   :  { %64 = vperm.xlu0 %97, %v61_v5  }
  0x8c   :  { %v22_v6 = vpop.xlane.xlu0 %21 }
  0x8d   :  { %v27_v7 = vmul.f32 0.03125, %v22_v6 }
  0x8f   :  { %v29_v8 = vsub.f32 %v17_v0, %v27_v7  ;;  %80 = vst.msk [vmem:[%s180_s4] sm:$0x7] %vm79_vm1, %v27_v7 }
  0x90   :  { %v25_v9 = vpop.xlane.xlu0 %24 }
  0x91   :  { %v28_v10 = vmul.f32 0.03125, %v25_v9  ;;  %v31_v11 = vmul.f32 %v29_v8, %v29_v8 }
  0x93   :  { %v30_v12 = vsub.f32 %v18_v1, %v28_v10  ;;  %81 = vst.msk [vmem:[%s180_s4 + $0x4] sm:$0x7] %vm79_vm1, %v28_v10  ;;  %v33_v13 = vsel %vm19_vm0, %v31_v11, 0.0 }
  0x94   :  { %34 = vadd.xlane.f32.xlu1 %v33_v13 }
  0x95   :  { %v32_v14 = vmul.f32 %v30_v12, %v30_v12 }
  0x97   :  { %v36_v15 = vsel %vm19_vm0, %v32_v14, 0.0 }
  0x98   :  { %37 = vadd.xlane.f32.xlu1 %v36_v15  ;;  %v65_v34 = vpop.permute.xlu0 %64 }
  0xa9   :  { %72 = vperm.xlu1 %98, %v69_v16  }
 0x11d   :  { %v35_v17 = vpop.xlane.xlu1 %34 }
 0x11e   :  { %v39_v18 = vmul.f32 0.03125, %v35_v17 }
 0x120   :  { %v41_v19 = vadd.f32 1e-05, %v39_v18 }
 0x121   :  { %v38_v20 = vpop.xlane.xlu1 %37 }
 0x122   :  { %99 = vrsqrt.f32 %v41_v19  ;;  %v40_v21 = vmul.f32 0.03125, %v38_v20  ;;  %vm45_vm2 = vcmp.eq.f32.partialorder %v41_v19, inf  ;;  %v48_v25 = vand.u32 2147483648, %v41_v19 }
 0x123   :  { %vm47_vm3 = vcmp.eq.f32.partialorder %v41_v19, 0.0 }
 0x124   :  { %v42_v22 = vadd.f32 1e-05, %v40_v21 }
 0x125   :  { %v73_v36 = vpop.permute.xlu1 %72 }
 0x126   :  { %101 = vrsqrt.f32 %v42_v22  ;;  %vm52_vm4 = vcmp.eq.f32.partialorder %v42_v22, inf  ;;  %v55_v30 = vand.u32 2147483648, %v42_v22  ;;  %vm54_vm5 = vcmp.eq.f32.partialorder %v42_v22, 0.0 }
 0x12f   :  { %v100_v23 = vpop.eup %99 }
 0x130   :  { %v44_v24 = vmul.f32 %v100_v23, %v41_v19 }
 0x132   :  { %v46_v26 = vsel %vm45_vm2, %v41_v19, %v44_v24 }
 0x133   :  { %v49_v27 = vsel %vm47_vm3, %v48_v25, %v46_v26  ;;  %v102_v28 = vpop.eup %101 }
 0x134   :  { %103 = vrcp.f32 %v49_v27  ;;  %82 = vst.msk [vmem:[%s182_s5] sm:$0x7] %vm79_vm1, %v49_v27  ;;  %v51_v29 = vmul.f32 %v102_v28, %v42_v22 }
 0x136   :  { %v53_v31 = vsel %vm52_vm4, %v42_v22, %v51_v29 }
 0x137   :  { %v56_v32 = vsel %vm54_vm5, %v55_v30, %v53_v31 }
 0x138   :  { %105 = vrcp.f32 %v56_v32  ;;  %83 = vst.msk [vmem:[%s182_s5 + $0x4] sm:$0x7] %vm79_vm1, %v56_v32 }
 0x141   :  { %v104_v33 = vpop.eup %103 }
 0x142   :  { %v58_v35 = vmul.f32 %v104_v33, %v29_v8 }
 0x144   :  { %v67_v37 = vmul.f32 %v65_v34, %v58_v35 }
 0x145   :  { %v106_v38 = vpop.eup %105 }
 0x146   :  { %v75_v39 = vadd.f32 %v73_v36, %v67_v37  ;;  %v60_v40 = vmul.f32 %v106_v38, %v30_v12 }
 0x148   :  { %77 = vst.msk [vmem:[%s183_s3] sm:$0x7] %vm19_vm0, %v75_v39  ;;  %v68_v41 = vmul.f32 %v65_v34, %v60_v40 }
 0x14a   :  { %v76_v42 = vadd.f32 %v73_v36, %v68_v41 }
 0x14c   :  { %78 = vst.msk [vmem:[%s183_s3 + $0x4] sm:$0x7] %vm19_vm0, %v76_v42 }

// kernel: patchtst_forward.6
= control target key start
LH: loop header
LB: loop body
LE: loop exit
PB: predicated region body
PF: predicated region fallthrough
CT: control target
= control target key end

     0   :  { %vm51_vm0 = vcmask 1041408   ;;  %v287_v0 = vmov 0.0   ;;  %vm288_vm1 = vmmov 0   ;;  %vm41_vm2 = vcmask 31744   ;;  %s387_s1 = inlined_call_operand.vmem [shape: bf16[4,32], index: 1, kind: input, shape index: {}]   ;;  %s388_s0 = inlined_call_operand.vmem [shape: f32[6,8,4], index: 0, kind: input, shape index: {}]   ;;  %s389_s3 = inlined_call_operand.vmem [shape: bf16[32,128], index: 3, kind: input, shape index: {}]   ;;  %s390_s2 = inlined_call_operand.vmem [shape: f32[1,32], index: 2, kind: input, shape index: {}]   ;;  %s391_s4 = inlined_call_operand.vmem [shape: f32[1,128], index: 4, kind: input, shape index: {}]   ;;  %s392_s5 = inlined_call_operand.vmem [shape: f32[1,8,128], index: 5, kind: input, shape index: {}]   ;;  %s393_s6 = inlined_call_operand.vmem [shape: f32[6,8,128], index: 6, kind: output, shape index: {}]  }
   0x1   :  { %253 = vmatprep.subr.bf16.mxu0 %v287_v0  ;;  %v33_v1 = vld [vmem:[%s387_s1] sm:$0x3]  ;;  %255 = vmatprep.mubr.msk.bf16.mxu0 %vm288_vm1, %v287_v0  ;;  %v25_v3 = vld [vmem:[%s388_s0 + $0x8] sm:$0xff]  ;;  %v26_v6 = vld [vmem:[%s388_s0 + $0x10] sm:$0xff]  ;;  %vm144_vm3 = vcmask 261120  }
   0x2   :  { %v24_v2 = vld [vmem:[%s388_s0] sm:$0xff]  ;;  %v53_v4 = vsel %vm51_vm0, %v33_v1, 0  ;;  %267 = vmatprep.subr.bf16.mxu1 %v287_v0  ;;  %271 = vmatprep.mubr.msk.bf16.mxu1 %vm288_vm1, %v287_v0  ;;  %v27_v7 = vld [vmem:[%s388_s0 + $0x18] sm:$0xff]  ;;  %v29_v10 = vld [vmem:[%s388_s0 + $0x28] sm:$0xff] }
   0x3   :  { %v30_v5 = vpack.c.bf16 %v25_v3, %v24_v2  ;;  %254 = vmatpush3.bf16.msra.mxu0 %v53_v4  ;;  %v31_v8 = vpack.c.bf16 %v27_v7, %v26_v6  ;;  %v28_v9 = vld [vmem:[%s388_s0 + $0x20] sm:$0xff]  ;;  %v285_v12 = vld [vmem:[%s389_s3 + $0x8] sm:$0xff]  }
   0x4   :  { %v32_v11 = vpack.c.bf16 %v29_v10, %v28_v9  ;;  %268 = vmatpush3.bf16.msra.mxu1 %v285_v12  ;;  %v286_v13 = vld [vmem:[%s389_s3] sm:$0xff]  }
   0x5   :  { %269 = vmatprep.subr.bf16.mxu1 %v287_v0  ;;  %v234_v14 = vld [vmem:[%s390_s2] ss:$0 sm:$0xff] }
   0x6   :  { %256 = vmatmul.mubr.msk.bf16.vlgmr.msra.gmra.mxu0 %vm41_vm2, %v30_v5  ;;  %v238_v42 = vld [vmem:[%s391_s4] ss:$0 sm:$0xff] }
   0x7   :  { %259 = vmatprep.mubr.msk.bf16.mxu0 %vm288_vm1, %v287_v0  ;;  %v217_v45 = vld [vmem:[%s392_s5] sm:$0xff] }
   0x8   :  { %270 = vmatpush3.bf16.msra.mxu1 %v286_v13 }
   0xe   :  { %260 = vmatmul.mubr.msk.bf16.gmra.mxu0 %vm41_vm2, %v31_v8 }
   0xf   :  { %263 = vmatprep.mubr.msk.bf16.mxu0 %vm288_vm1, %v287_v0 }
  0x16   :  { %264 = vmatmul.mubr.msk.bf16.gmra.mxu0 %vm41_vm2, %v32_v11 }
  0xc6   :  { %v89_v15 = vpop.f32.mrf.mxu0 }
  0xc7   :  { %v90_v17 = vadd.f32 %v234_v14, %v89_v15 }
  0xc8   :  { %v257_v16 = vpop.f32.mrf.mxu0 }
  0xc9   :  { %v112_v21 = vmax.f32 %v90_v17, 0.0 }
  0xca   :  { %v92_v18 = vpop.f32.mrf.mxu0 }
  0xcb   :  { %v93_v19 = vadd.f32 %v234_v14, %v92_v18 }
  0xcc   :  { %v258_v20 = vpop.f32.mrf.mxu0 }
  0xcd   :  { %v113_v22 = vmax.f32 %v93_v19, 0.0 }
  0xce   :  { %v97_v23 = vpop.f32.mrf.mxu0 }
  0xcf   :  { %v118_v24 = vpack.c.bf16 %v113_v22, %v112_v21  ;;  %v98_v26 = vadd.f32 %v234_v14, %v97_v23 }
  0xd0   :  { %v261_v25 = vpop.f32.mrf.mxu0 }
  0xd1   :  { %272 = vmatmul.mubr.msk.bf16.vlgmr.msra.gmra.mxu1 %vm144_vm3, %v118_v24  ;;  %v114_v30 = vmax.f32 %v98_v26, 0.0 }
  0xd2   :  { %v100_v27 = vpop.f32.mrf.mxu0  ;;  %275 = vmatprep.mubr.msk.bf16.mxu1 %vm288_vm1, %v287_v0 }
  0xd3   :  { %v101_v28 = vadd.f32 %v234_v14, %v100_v27 }
  0xd4   :  { %v262_v29 = vpop.f32.mrf.mxu0 }
  0xd5   :  { %v115_v31 = vmax.f32 %v101_v28, 0.0 }
  0xd6   :  { %v105_v32 = vpop.f32.mrf.mxu0 }
  0xd7   :  { %v119_v33 = vpack.c.bf16 %v115_v31, %v114_v30  ;;  %v106_v35 = vadd.f32 %v234_v14, %v105_v32 }
  0xd8   :  { %v265_v34 = vpop.f32.mrf.mxu0 }
  0xd9   :  { %276 = vmatmul.mubr.msk.bf16.gmra.mxu1 %vm144_vm3, %v119_v33  ;;  %v116_v39 = vmax.f32 %v106_v35, 0.0 }
  0xda   :  { %v108_v36 = vpop.f32.mrf.mxu0  ;;  %279 = vmatprep.mubr.msk.bf16.mxu1 %vm288_vm1, %v287_v0 }
  0xdb   :  { %v109_v37 = vadd.f32 %v234_v14, %v108_v36 }
  0xdc   :  { %v266_v38 = vpop.f32.mrf.mxu0 }
  0xdd   :  { %v117_v40 = vmax.f32 %v109_v37, 0.0 }
  0xdf   :  { %v120_v41 = vpack.c.bf16 %v117_v40, %v116_v39 }
  0xe1   :  { %280 = vmatmul.mubr.msk.bf16.gmra.mxu1 %vm144_vm3, %v120_v41 }
 0x191   :  { %v188_v43 = vpop.f32.mrf.mxu1 }
 0x192   :  { %v189_v44 = vadd.f32 %v238_v42, %v188_v43 }
 0x193   :  { %v273_v46 = vpop.f32.mrf.mxu1 }
 0x194   :  { %v211_v47 = vmax.f32 %v189_v44, 0.0 }
 0x195   :  { %v191_v48 = vpop.f32.mrf.mxu1 }
 0x196   :  { %v218_v49 = vadd.f32 %v217_v45, %v211_v47  ;;  %v192_v50 = vadd.f32 %v238_v42, %v191_v48 }
 0x197   :  { %v274_v51 = vpop.f32.mrf.mxu1 }
 0x198   :  { %224 = vst [vmem:[%s393_s6] sm:$0xff] %v218_v49  ;;  %v212_v52 = vmax.f32 %v192_v50, 0.0 }
 0x199   :  { %v196_v53 = vpop.f32.mrf.mxu1 }
 0x19a   :  { %v219_v54 = vadd.f32 %v217_v45, %v212_v52  ;;  %v197_v55 = vadd.f32 %v238_v42, %v196_v53 }
 0x19b   :  { %v277_v56 = vpop.f32.mrf.mxu1 }
 0x19c   :  { %225 = vst [vmem:[%s393_s6 + $0x8] sm:$0xff] %v219_v54  ;;  %v213_v57 = vmax.f32 %v197_v55, 0.0 }
 0x19d   :  { %v199_v58 = vpop.f32.mrf.mxu1 }
 0x19e   :  { %v220_v59 = vadd.f32 %v217_v45, %v213_v57  ;;  %v200_v60 = vadd.f32 %v238_v42, %v199_v58 }
 0x19f   :  { %v278_v61 = vpop.f32.mrf.mxu1 }
 0x1a0   :  { %226 = vst [vmem:[%s393_s6 + $0x10] sm:$0xff] %v220_v59  ;;  %v214_v62 = vmax.f32 %v200_v60, 0.0 }
 0x1a1   :  { %v204_v63 = vpop.f32.mrf.mxu1 }
 0x1a2   :  { %v221_v0 = vadd.f32 %v217_v45, %v214_v62  ;;  %v205_v1 = vadd.f32 %v238_v42, %v204_v63 }
 0x1a3   :  { %v281_v2 = vpop.f32.mrf.mxu1 }
 0x1a4   :  { %227 = vst [vmem:[%s393_s6 + $0x18] sm:$0xff] %v221_v0  ;;  %v215_v3 = vmax.f32 %v205_v1, 0.0 }
 0x1a5   :  { %v207_v4 = vpop.f32.mrf.mxu1 }
 0x1a6   :  { %v222_v5 = vadd.f32 %v217_v45, %v215_v3  ;;  %v208_v6 = vadd.f32 %v238_v42, %v207_v4 }
 0x1a7   :  { %v282_v7 = vpop.f32.mrf.mxu1 }
 0x1a8   :  { %228 = vst [vmem:[%s393_s6 + $0x20] sm:$0xff] %v222_v5  ;;  %v216_v8 = vmax.f32 %v208_v6, 0.0 }
 0x1aa   :  { %v223_v9 = vadd.f32 %v217_v45, %v216_v8 }
 0x1ac   :  { %229 = vst [vmem:[%s393_s6 + $0x28] sm:$0xff] %v223_v9 }

// kernel: tile.23
= control target key start
LH: loop header
LB: loop body
LE: loop exit
PB: predicated region body
PF: predicated region fallthrough
CT: control target
= control target key end

     0   :  { %s22_s0 = inlined_call_operand.vmem [shape: f32[3], index: 0, kind: input, shape index: {}]   ;;  %s23_s1 = inlined_call_operand.vmem [shape: f32[2,3], index: 1, kind: output, shape index: {}]  }
   0x1   :  { %v4_v0 = vld [vmem:[%s22_s0] ss:$0 sm:$0xff] }
   0x2   :  { %5 = vst [vmem:[%s23_s1] sm:$0x3] %v4_v0 }

// kernel: patchtst_forward.9
= control target key start
LH: loop header
LB: loop body
LE: loop exit
PB: predicated region body
PF: predicated region fallthrough
CT: control target
= control target key end

     0   :  { %vm51_vm0 = vcmask 1042434   ;;  %vm54_vm1 = vcmask 1043459   ;;  %vm57_vm2 = vcmask 1044484   ;;  %vm60_vm3 = vcmask 1045509   ;;  %s3481_s0 = inlined_call_operand.vmem [shape: f32[6,8,128], index: 0, kind: input, shape index: {}]   ;;  %s3482_s3 = inlined_call_operand.vmem [shape: bf16[8,128,12], index: 3, kind: input, shape index: {}]   ;;  %s3483_s1 = inlined_call_operand.vmem [shape: f32[1,128], index: 1, kind: input, shape index: {}]   ;;  %s3484_s2 = inlined_call_operand.vmem [shape: f32[1,128], index: 2, kind: input, shape index: {}]   ;;  %s3485_s5 = inlined_call_operand.vmem [shape: f32[6,1], index: 5, kind: input, shape index: {}]   ;;  %s3486_s6 = inlined_call_operand.vmem [shape: f32[6,1], index: 6, kind: input, shape index: {}]   ;;  %s3487_s8 = inlined_call_operand.vmem [shape: f32[6,1], index: 8, kind: input, shape index: {}]   ;;  %s3488_s7 = inlined_call_operand.vmem [shape: f32[6,1], index: 7, kind: input, shape index: {}]   ;;  %s3489_s4 = inlined_call_operand.vmem [shape: f32[1,12], index: 4, kind: input, shape index: {}]   ;;  %s3490_s9 = inlined_call_operand.vmem [shape: f32[6,12], index: 9, kind: output, shape index: {}]  }
   0x1   :  { %v2539_v0 = vld [vmem:[%s3481_s0] sm:$0xff]  ;;  %v2544_v1 = vld [vmem:[%s3481_s0 + $0x8] sm:$0xff]  ;;  %v2549_v2 = vld [vmem:[%s3481_s0 + $0x10] sm:$0xff]  ;;  %vm184_vm4 = vcmask 1046534   ;;  %vm187_vm5 = vcmask 1046529   ;;  %vm48_vm6 = vcmask 1041409  }
   0x2   :  { %v2554_v3 = vld [vmem:[%s3481_s0 + $0x18] sm:$0xff]  ;;  %v2559_v4 = vld [vmem:[%s3481_s0 + $0x20] sm:$0xff]  ;;  %v2564_v5 = vld [vmem:[%s3481_s0 + $0x28] sm:$0xff]  ;;  %v2567_v6 = vrot.slane %v2544_v1, 7  ;;  %v50_v7 = vrot.slane %v2549_v2, 6  ;;  %vm63_vm7 = vcmask 1045504  }
   0x3   :  { %v53_v8 = vrot.slane %v2554_v3, 5  ;;  %v56_v9 = vrot.slane %v2559_v4, 4  ;;  %v59_v10 = vrot.slane %v2564_v5, 3  ;;  %vm520_vm8 = vcmask 1047559  }
   0x4   :  { %v180_v11 = vsel %vm51_vm0, %v2567_v6, %v2539_v0  ;;  %v49_v12 = vsel %vm48_vm6, %v2567_v6, %v2539_v0  ;;  %v516_v13 = vsel %vm54_vm1, %v2567_v6, %v2539_v0  ;;  %vm523_vm9 = vcmask 1047554  }
   0x5   :  { %v181_v14 = vsel %vm54_vm1, %v50_v7, %v180_v11  ;;  %v52_v15 = vsel %vm51_vm0, %v50_v7, %v49_v12  ;;  %v517_v16 = vsel %vm57_vm2, %v50_v7, %v516_v13  ;;  %v741_v17 = vsel %vm57_vm2, %v2567_v6, %v2539_v0 }
   0x6   :  { %v182_v18 = vsel %vm57_vm2, %v53_v8, %v181_v14  ;;  %v55_v19 = vsel %vm54_vm1, %v53_v8, %v52_v15  ;;  %v518_v20 = vsel %vm60_vm3, %v53_v8, %v517_v16  ;;  %v742_v21 = vsel %vm60_vm3, %v50_v7, %v741_v17 }
   0x7   :  { %v183_v22 = vsel %vm60_vm3, %v56_v9, %v182_v18  ;;  %v58_v23 = vsel %vm57_vm2, %v56_v9, %v55_v19  ;;  %v519_v24 = vsel %vm184_vm4, %v56_v9, %v518_v20  ;;  %v743_v25 = vsel %vm184_vm4, %v53_v8, %v742_v21 }
   0x8   :  { %v185_v26 = vsel %vm184_vm4, %v59_v10, %v183_v22  ;;  %v61_v27 = vsel %vm60_vm3, %v59_v10, %v58_v23  ;;  %v521_v28 = vsel %vm520_vm8, %v59_v10, %v519_v24  ;;  %v744_v29 = vsel %vm520_vm8, %v56_v9, %v743_v25 }
   0x9   :  { %v188_v30 = vsel %vm187_vm5, %v185_v26, 0.0  ;;  %v524_v31 = vsel %vm523_vm9, %v521_v28, 0.0  ;;  %vm747_vm10 = vcmask 1047555   ;;  %v978_v32 = vsel %vm60_vm3, %v2567_v6, %v2539_v0 }
   0xa   :  { %189 = vadd.xlane.f32.xlu0 %v188_v30  ;;  %525 = vadd.xlane.f32.xlu1 %v524_v31  ;;  %v64_v33 = vsel %vm63_vm7, %v61_v27, 0.0  ;;  %v748_v34 = vsel %vm747_vm10, %v744_v29, 0.0  ;;  %v979_v35 = vsel %vm184_vm4, %v50_v7, %v978_v32  ;;  %vm751_vm11 = vcmask 1040384  }
   0xb   :  { %v980_v36 = vsel %vm520_vm8, %v53_v8, %v979_v35  ;;  %vm984_vm12 = vcmask 1047556   ;;  %v1215_v37 = vsel %vm184_vm4, %v2567_v6, %v2539_v0  ;;  %v1217_v38 = vsel %vm48_vm6, %v56_v9, %v53_v8 }
   0xc   :  { %v752_v39 = vsel %vm751_vm11, %v59_v10, 0.0  ;;  %v985_v40 = vsel %vm984_vm12, %v980_v36, 0.0  ;;  %v1216_v41 = vsel %vm520_vm8, %v50_v7, %v1215_v37  ;;  %vm3493_vm13 = vcmask 1047557  }
   0xd   :  { %v1218_v42 = vsel %vm51_vm0, %v59_v10, %v1217_v38  ;;  %vm3491_vm14 = vcmask 1042432   ;;  %v1222_v43 = vsel %vm3493_vm13, %v1216_v41, 0.0  ;;  %v981_v45 = vsel %vm48_vm6, %v59_v10, %v56_v9 }
   0xe   :  { %65 = vadd.xlane.f32.xlu0 %v64_v33  ;;  %749 = vadd.xlane.f32.xlu1 %v748_v34  ;;  %v1226_v44 = vsel %vm3491_vm14, %v1218_v42, 0.0  ;;  %vm3492_vm15 = vcmask 1041408   ;;  %v1453_v47 = vsel %vm48_vm6, %v53_v8, %v50_v7  ;;  %v1690_v50 = vsel %vm48_vm6, %v50_v7, %v2567_v6 }
   0xf   :  { %v989_v46 = vsel %vm3492_vm15, %v981_v45, 0.0  ;;  %v1454_v48 = vsel %vm51_vm0, %v56_v9, %v1453_v47  ;;  %v1691_v51 = vsel %vm51_vm0, %v53_v8, %v1690_v50  ;;  %vm1462_vm14 = vcmask 1043456  }
  0x10   :  { %v1455_v49 = vsel %vm54_vm1, %v59_v10, %v1454_v48  ;;  %v1692_v52 = vsel %vm54_vm1, %v56_v9, %v1691_v51  ;;  %v1452_v54 = vsel %vm520_vm8, %v2567_v6, %v2539_v0  ;;  %vm1458_vm15 = vcmask 1047558  }
  0x11   :  { %v1693_v53 = vsel %vm57_vm2, %v59_v10, %v1692_v52  ;;  %vm1699_vm13 = vcmask 1044480   ;;  %v2635_v59 = vsel %vm1462_vm14, %v1455_v49, 0.0  ;;  %v2638_v60 = vsel %vm1458_vm15, %v1452_v54, 0.0 }
  0x12   :  { %753 = vadd.xlane.f32.xlu0 %v752_v39  ;;  %986 = vadd.xlane.f32.xlu1 %v985_v40  ;;  %v2641_v61 = vsel %vm1699_vm13, %v1693_v53, 0.0  ;;  %v2645_v62 = vsel %vm520_vm8, %v2539_v0, 0.0 }
  0x16   :  { %1223 = vadd.xlane.f32.xlu0 %v1222_v43  ;;  %1227 = vadd.xlane.f32.xlu1 %v1226_v44 }
  0x1a   :  { %990 = vadd.xlane.f32.xlu0 %v989_v46 }
  0x93   :  { %v190_v55 = vpop.xlane.xlu0 %189  ;;  %v526_v56 = vpop.xlane.xlu1 %525 }
  0x94   :  { %v191_v57 = vmul.f32 0.0078125, %v190_v55  ;;  %v2632_v58 = vmul.f32 0.0078125, %v526_v56 }
  0x96   :  { %v193_v63 = vrot.slane %v191_v57, 1  ;;  %v529_v6 = vrot.slane %v2632_v58, 1  ;;  %v194_v7 = vrot.slane %v191_v57, 2  ;;  %v195_v8 = vrot.slane %v191_v57, 3 }
  0x97   :  { %v66_v9 = vpop.xlane.xlu0 %65  ;;  %v750_v10 = vpop.xlane.xlu1 %749  ;;  %v196_v11 = vrot.slane %v191_v57, 4  ;;  %v197_v12 = vrot.slane %v191_v57, 5  ;;  %v2649_v13 = vsub.f32 %v2539_v0, %v191_v57  ;;  %v530_v14 = vrot.slane %v2632_v58, 2 }
  0x98   :  { %v68_v15 = vmul.f32 0.0078125, %v66_v9  ;;  %v2652_v16 = vmul.f32 0.0078125, %v750_v10  ;;  %v2655_v17 = vsub.f32 %v2544_v1, %v193_v63  ;;  %v2658_v18 = vsub.f32 %v2549_v2, %v194_v7 }
  0x99   :  { %v2661_v19 = vsub.f32 %v2554_v3, %v195_v8  ;;  %v2664_v20 = vsub.f32 %v2559_v4, %v196_v11  ;;  %v2667_v21 = vsub.f32 %v2564_v5, %v197_v12  ;;  %v210_v22 = vmul.f32 %v2649_v13, %v2649_v13 }
  0x9a   :  { %v70_v23 = vrot.slane %v68_v15, 1  ;;  %v759_v24 = vrot.slane %v2652_v16, 1  ;;  %v760_v25 = vrot.slane %v2652_v16, 2  ;;  %v2675_v26 = vsub.f32 %v2539_v0, %v2652_v16 }
  0x9b   :  { %v211_v27 = vmul.f32 %v2655_v17, %v2655_v17  ;;  %v212_v28 = vmul.f32 %v2658_v18, %v2658_v18  ;;  %v213_v29 = vmul.f32 %v2661_v19, %v2661_v19  ;;  %v214_v30 = vmul.f32 %v2664_v20, %v2664_v20  ;;  %v754_v31 = vpop.xlane.xlu0 %753  ;;  %v987_v44 = vpop.xlane.xlu1 %986 }
  0x9c   :  { %v2686_v32 = vsub.f32 %v2544_v1, %v759_v24  ;;  %v215_v33 = vmul.f32 %v2667_v21, %v2667_v21  ;;  %v756_v34 = vmul.f32 0.0078125, %v754_v31  ;;  %v71_v35 = vrot.slane %v68_v15, 2 }
  0x9d   :  { %v222_v36 = vrot.slane %v211_v27, 7  ;;  %v224_v37 = vrot.slane %v212_v28, 6  ;;  %v226_v38 = vrot.slane %v213_v29, 5  ;;  %v228_v39 = vrot.slane %v214_v30, 4 }
  0x9e   :  { %v230_v40 = vrot.slane %v215_v33, 3  ;;  %v763_v41 = vrot.slane %v756_v34, 5  ;;  %v72_v42 = vrot.slane %v68_v15, 3  ;;  %v73_v43 = vrot.slane %v68_v15, 4 }
  0x9f   :  { %v223_v45 = vsel %vm51_vm0, %v222_v36, %v210_v22  ;;  %v74_v46 = vrot.slane %v68_v15, 5  ;;  %v2692_v47 = vsub.f32 %v2539_v0, %v68_v15  ;;  %v2695_v48 = vsub.f32 %v2544_v1, %v70_v23  ;;  %v1224_v15 = vpop.xlane.xlu0 %1223  ;;  %v1228_v28 = vpop.xlane.xlu1 %1227 }
  0xa0   :  { %v225_v49 = vsel %vm54_vm1, %v224_v37, %v223_v45  ;;  %v2699_v50 = vsub.f32 %v2564_v5, %v763_v41  ;;  %v2702_v51 = vsub.f32 %v2549_v2, %v71_v35  ;;  %v2705_v52 = vsub.f32 %v2554_v3, %v72_v42 }
  0xa1   :  { %v227_v53 = vsel %vm57_vm2, %v226_v38, %v225_v49  ;;  %v2709_v54 = vsub.f32 %v2559_v4, %v73_v43  ;;  %v2712_v55 = vsub.f32 %v2564_v5, %v74_v46  ;;  %v87_v56 = vmul.f32 %v2692_v47, %v2692_v47 }
  0xa2   :  { %v229_v57 = vsel %vm60_vm3, %v228_v39, %v227_v53  ;;  %v88_v63 = vmul.f32 %v2695_v48, %v2695_v48  ;;  %v89_v7 = vmul.f32 %v2702_v51, %v2702_v51  ;;  %v90_v8 = vmul.f32 %v2705_v52, %v2705_v52 }
  0xa3   :  { %v231_v9 = vsel %vm184_vm4, %v230_v40, %v229_v57  ;;  %v91_v10 = vmul.f32 %v2709_v54, %v2709_v54  ;;  %v92_v11 = vmul.f32 %v2712_v55, %v2712_v55  ;;  %v2728_v12 = vmul.f32 0.0078125, %v987_v44  ;;  %v991_v57 = vpop.xlane.xlu0 %990 }
  0xa4   :  { %v233_v22 = vsel %vm187_vm5, %v231_v9, 0.0  ;;  %v99_v23 = vrot.slane %v88_v63, 7  ;;  %v101_v24 = vrot.slane %v89_v7, 6  ;;  %v103_v27 = vrot.slane %v90_v8, 5 }
  0xa5   :  { %234 = vadd.xlane.f32.xlu1 %v233_v22  ;;  %v105_v29 = vrot.slane %v91_v10, 4  ;;  %v107_v30 = vrot.slane %v92_v11, 3  ;;  %v996_v31 = vrot.slane %v2728_v12, 1  ;;  %v997_v33 = vrot.slane %v2728_v12, 2 }
  0xa6   :  { %v100_v34 = vsel %vm48_vm6, %v99_v23, %v87_v56  ;;  %v998_v35 = vrot.slane %v2728_v12, 3  ;;  %v2737_v36 = vsub.f32 %v2539_v0, %v2728_v12  ;;  %v1229_v37 = vmul.f32 0.0078125, %v1224_v15 }
  0xa7   :  { %v102_v38 = vsel %vm51_vm0, %v101_v24, %v100_v34  ;;  %v2741_v39 = vsub.f32 %v2544_v1, %v996_v31  ;;  %v2744_v40 = vsub.f32 %v2549_v2, %v997_v33  ;;  %v1230_v41 = vmul.f32 0.0078125, %v1228_v28 }
  0xa8   :  { %v104_v42 = vsel %vm54_vm1, %v103_v27, %v102_v38  ;;  %v1233_v43 = vrot.slane %v1229_v37, 1  ;;  %v1234_v44 = vrot.slane %v1229_v37, 2  ;;  %v2748_v45 = vsub.f32 %v2539_v0, %v1229_v37 }
  0xa9   :  { %1464 = vadd.xlane.f32.xlu1 %v2635_v59  ;;  %v106_v46 = vsel %vm57_vm2, %v105_v29, %v104_v42  ;;  %v1235_v49 = vrot.slane %v1230_v41, 3  ;;  %v1236_v53 = vrot.slane %v1230_v41, 4  ;;  %v1237_v56 = vrot.slane %v1230_v41, 5 }
  0xaa   :  { %v108_v63 = vsel %vm60_vm3, %v107_v30, %v106_v46  ;;  %v2754_v7 = vsub.f32 %v2544_v1, %v1233_v43  ;;  %v2757_v8 = vsub.f32 %v2549_v2, %v1234_v44  ;;  %v2761_v9 = vmul.f32 %v2748_v45, %v2748_v45 }
  0xab   :  { %v110_v59 = vsel %vm63_vm7, %v108_v63, 0.0  ;;  %v2765_v10 = vsub.f32 %v2554_v3, %v1235_v49  ;;  %v2768_v11 = vsub.f32 %v2559_v4, %v1236_v53  ;;  %v2771_v15 = vsub.f32 %v2564_v5, %v1237_v56 }
  0xac   :  { %111 = vadd.xlane.f32.xlu0 %v110_v59  ;;  %v993_v22 = vmul.f32 0.0078125, %v991_v57  ;;  %v531_v23 = vrot.slane %v2632_v58, 3  ;;  %v532_v24 = vrot.slane %v2632_v58, 4  ;;  %v533_v27 = vrot.slane %v2632_v58, 5 }
  0xad   :  { %1460 = vadd.xlane.f32.xlu1 %v2638_v60  ;;  %v2779_v28 = vsub.f32 %v2539_v0, %v2632_v58  ;;  %v2784_v29 = vsub.f32 %v2544_v1, %v529_v6  ;;  %v2789_v30 = vsub.f32 %v2549_v2, %v530_v14  ;;  %v761_v31 = vrot.slane %v2652_v16, 3 }
  0xae   :  { %v999_v33 = vrot.slane %v993_v22, 4  ;;  %v1000_v34 = vrot.slane %v993_v22, 5  ;;  %v2793_v60 = vsub.f32 %v2554_v3, %v531_v23  ;;  %v2796_v37 = vsub.f32 %v2559_v4, %v532_v24 }
  0xaf   :  { %v2799_v38 = vsub.f32 %v2564_v5, %v533_v27  ;;  %v546_v6 = vmul.f32 %v2779_v28, %v2779_v28  ;;  %v547_v58 = vmul.f32 %v2784_v29, %v2784_v29  ;;  %v548_v14 = vmul.f32 %v2789_v30, %v2789_v30 }
  0xb0   :  { %1701 = vadd.xlane.f32.xlu0 %v2641_v61  ;;  %v2809_v41 = vsub.f32 %v2559_v4, %v999_v33  ;;  %v2812_v42 = vsub.f32 %v2564_v5, %v1000_v34  ;;  %v549_v43 = vmul.f32 %v2793_v60, %v2793_v60  ;;  %v550_v44 = vmul.f32 %v2796_v37, %v2796_v37 }
  0xb1   :  { %v551_v46 = vmul.f32 %v2799_v38, %v2799_v38  ;;  %v558_v49 = vrot.slane %v547_v58, 7  ;;  %v560_v53 = vrot.slane %v548_v14, 6  ;;  %v762_v56 = vrot.slane %v2652_v16, 4 }
  0xb2   :  { %v562_v61 = vrot.slane %v549_v43, 5  ;;  %v564_v57 = vrot.slane %v550_v44, 4  ;;  %v2824_v63 = vsub.f32 %v2549_v2, %v760_v25  ;;  %v2827_v59 = vsub.f32 %v2554_v3, %v761_v31 }
  0xb3   :  { %v559_v22 = vsel %vm54_vm1, %v558_v49, %v546_v6  ;;  %v566_v23 = vrot.slane %v551_v46, 3  ;;  %v2831_v24 = vsub.f32 %v2559_v4, %v762_v56  ;;  %v776_v27 = vmul.f32 %v2675_v26, %v2675_v26 }
  0xb4   :  { %v561_v33 = vsel %vm57_vm2, %v560_v53, %v559_v22  ;;  %1697 = vadd.xlane.f32.xlu0 %v2645_v62  ;;  %v777_v16 = vmul.f32 %v2686_v32, %v2686_v32  ;;  %v778_v25 = vmul.f32 %v2824_v63, %v2824_v63  ;;  %v779_v31 = vmul.f32 %v2827_v59, %v2827_v59 }
  0xb5   :  { %v563_v34 = vsel %vm60_vm3, %v562_v61, %v561_v33  ;;  %v780_v6 = vmul.f32 %v2831_v24, %v2831_v24  ;;  %v781_v58 = vmul.f32 %v2699_v50, %v2699_v50  ;;  %v2851_v62 = vsub.f32 %v2554_v3, %v998_v35 }
  0xb6   :  { %v565_v14 = vsel %vm184_vm4, %v564_v57, %v563_v34  ;;  %v788_v43 = vrot.slane %v777_v16, 7  ;;  %v790_v44 = vrot.slane %v778_v25, 6  ;;  %v792_v46 = vrot.slane %v779_v31, 5 }
  0xb7   :  { %v567_v49 = vsel %vm520_vm8, %v566_v23, %v565_v14  ;;  %v794_v53 = vrot.slane %v780_v6, 4  ;;  %v796_v56 = vrot.slane %v781_v58, 3  ;;  %v1013_v61 = vmul.f32 %v2737_v36, %v2737_v36 }
  0xb8   :  { %v569_v22 = vsel %vm523_vm9, %v567_v49, 0.0  ;;  %v789_v33 = vsel %vm57_vm2, %v788_v43, %v776_v27  ;;  %v1014_v12 = vmul.f32 %v2741_v39, %v2741_v39  ;;  %v1015_v35 = vmul.f32 %v2744_v40, %v2744_v40 }
  0xb9   :  { %570 = vadd.xlane.f32.xlu1 %v569_v22  ;;  %v791_v57 = vsel %vm60_vm3, %v790_v44, %v789_v33  ;;  %v802_v23 = vsel %vm751_vm11, %v796_v56, 0.0  ;;  %v1016_v16 = vmul.f32 %v2851_v62, %v2851_v62  ;;  %v1251_v25 = vmul.f32 %v2754_v7, %v2754_v7 }
  0xba   :  { %v793_v31 = vsel %vm184_vm4, %v792_v46, %v791_v57  ;;  %v1025_v27 = vrot.slane %v1014_v12, 7  ;;  %v1027_v34 = vrot.slane %v1015_v35, 6  ;;  %v1252_v6 = vmul.f32 %v2757_v8, %v2757_v8 }
  0xbb   :  { %v795_v58 = vsel %vm520_vm8, %v794_v53, %v793_v31  ;;  %v1029_v14 = vrot.slane %v1016_v16, 5  ;;  %v1262_v43 = vrot.slane %v1251_v25, 7  ;;  %v1253_v44 = vmul.f32 %v2765_v10, %v2765_v10 }
  0xbc   :  { %v799_v49 = vsel %vm747_vm10, %v795_v58, 0.0  ;;  %v1026_v56 = vsel %vm60_vm3, %v1025_v27, %v1013_v61  ;;  %v1264_v22 = vrot.slane %v1252_v6, 6  ;;  %v1254_v46 = vmul.f32 %v2768_v11, %v2768_v11  ;;  %v2389_v6 = vld [vmem:[%s3482_s3 + $0x38] sm:$0xff]  }
  0xbd   :  { %800 = vadd.xlane.f32.xlu0 %v799_v49  ;;  %803 = vadd.xlane.f32.xlu1 %v802_v23  ;;  %v1028_v33 = vsel %vm184_vm4, %v1027_v34, %v1026_v56  ;;  %v1263_v53 = vsel %vm184_vm4, %v1262_v43, %v2761_v9  ;;  %v1255_v12 = vmul.f32 %v2771_v15, %v2771_v15  ;;  %v1266_v35 = vrot.slane %v1253_v44, 5  ;;  %v2387_v23 = vld [vmem:[%s3482_s3 + $0x78] sm:$0xff]  }
  0xbe   :  { %v1030_v57 = vsel %vm520_vm8, %v1029_v14, %v1028_v33  ;;  %v1265_v16 = vsel %vm520_vm8, %v1264_v22, %v1263_v53  ;;  %v1267_v61 = vrot.slane %v1254_v46, 4  ;;  %v1017_v25 = vmul.f32 %v2809_v41, %v2809_v41  ;;  %v2388_v46 = vld [vmem:[%s3482_s3 + $0x70] sm:$0xff]  }
  0xbf   :  { %v1036_v31 = vsel %vm984_vm12, %v1030_v57, 0.0  ;;  %vm3504_vm5 = vcmask 1047557   ;;  %v1269_v27 = vrot.slane %v1255_v12, 3  ;;  %v1018_v34 = vmul.f32 %v2812_v42, %v2812_v42  ;;  %v2391_v53 = vld [vmem:[%s3482_s3 + $0x30] sm:$0xff]   ;;  %v2390_v12 = vld [vmem:[%s3482_s3 + $0x68] sm:$0xff]  }
  0xc0   :  { %v1273_v9 = vsel %vm3504_vm5, %v1265_v16, 0.0  ;;  %v1268_v58 = vsel %vm48_vm6, %v1267_v61, %v1266_v35  ;;  %v1031_v14 = vrot.slane %v1017_v25, 4  ;;  %vm3505_vm4 = vcmask 1042432   ;;  %v2392_v35 = vld [vmem:[%s3482_s3 + $0x60] sm:$0xff]   ;;  %v2393_v57 = vld [vmem:[%s3482_s3 + $0x28] sm:$0xff]   ;;  %v2394_v16 = vld [vmem:[%s3482_s3 + $0x58] sm:$0xff]  }
  0xc1   :  { %1037 = vadd.xlane.f32.xlu0 %v1036_v31  ;;  %1274 = vadd.xlane.f32.xlu1 %v1273_v9  ;;  %v1270_v43 = vsel %vm51_vm0, %v1269_v27, %v1268_v58  ;;  %v1032_v44 = vrot.slane %v1018_v34, 3  ;;  %v3494_v56 = vmov 0.0   ;;  %vm3506_vm7 = vcmask 1041408   ;;  %v2395_v61 = vld [vmem:[%s3482_s3 + $0x20] sm:$0xff]   ;;  %v2396_v25 = vld [vmem:[%s3482_s3 + $0x50] sm:$0xff]   ;;  %v2398_v31 = vld [vmem:[%s3482_s3 + $0x48] sm:$0xff]  }
  0xc2   :  { %v1276_v49 = vsel %vm3505_vm4, %v1270_v43, 0.0  ;;  %2222 = vmatprep.subr.bf16.mxu0 %v3494_v56  ;;  %2242 = vmatprep.subr.bf16.mxu1 %v3494_v56  ;;  %v2399_v9 = vld [vmem:[%s3482_s3 + $0x10] sm:$0xff]   ;;  %v2400_v27 = vld [vmem:[%s3482_s3 + $0x40] sm:$0xff]   ;;  %v2401_v34 = vld [vmem:[%s3482_s3 + $0x8] sm:$0xff]   ;;  %vm2484_vm9 = vmmov 0  }
  0xc3   :  { %v1033_v22 = vsel %vm48_vm6, %v1032_v44, %v1031_v14  ;;  %2223 = vmatpush3.bf16.msra.mxu0 %v2387_v23  ;;  %2243 = vmatpush3.bf16.msra.mxu1 %v2389_v6  ;;  %v2397_v23 = vld [vmem:[%s3482_s3 + $0x18] sm:$0xff]   ;;  %v2403_v6 = vld [vmem:[%s3482_s3] sm:$0xff]  }
  0xc4   :  { %v1039_v33 = vsel %vm3506_vm7, %v1033_v22, 0.0  ;;  %2224 = vmatprep.subr.bf16.mxu0 %v3494_v56  ;;  %2244 = vmatprep.subr.bf16.mxu1 %v3494_v56 }
  0xc5   :  { %1277 = vadd.xlane.f32.xlu1 %v1276_v49  ;;  %1040 = vadd.xlane.f32.xlu0 %v1039_v33 }
  0xc6   :  { %2238 = vmatprep.mubr.msk.bf16.mxu0 %vm2484_vm9, %v3494_v56  ;;  %2258 = vmatprep.mubr.msk.bf16.mxu1 %vm2484_vm9, %v3494_v56 }
  0xc7   :  { %2225 = vmatpush3.bf16.msra.mxu0 %v2388_v46  ;;  %2245 = vmatpush3.bf16.msra.mxu1 %v2391_v53 }
  0xc8   :  { %2226 = vmatprep.subr.bf16.mxu0 %v3494_v56  ;;  %2246 = vmatprep.subr.bf16.mxu1 %v3494_v56 }
  0xcb   :  { %2227 = vmatpush3.bf16.msra.mxu0 %v2390_v12  ;;  %2247 = vmatpush3.bf16.msra.mxu1 %v2393_v57 }
  0xcc   :  { %2228 = vmatprep.subr.bf16.mxu0 %v3494_v56  ;;  %2248 = vmatprep.subr.bf16.mxu1 %v3494_v56 }
  0xcf   :  { %2229 = vmatpush3.bf16.msra.mxu0 %v2392_v35  ;;  %2249 = vmatpush3.bf16.msra.mxu1 %v2395_v61 }
  0xd0   :  { %2230 = vmatprep.subr.bf16.mxu0 %v3494_v56  ;;  %2250 = vmatprep.subr.bf16.mxu1 %v3494_v56 }
  0xd3   :  { %2231 = vmatpush3.bf16.msra.mxu0 %v2394_v16  ;;  %2251 = vmatpush3.bf16.msra.mxu1 %v2397_v23 }
  0xd4   :  { %2232 = vmatprep.subr.bf16.mxu0 %v3494_v56  ;;  %2252 = vmatprep.subr.bf16.mxu1 %v3494_v56 }
  0xd7   :  { %2233 = vmatpush3.bf16.msra.mxu0 %v2396_v25  ;;  %2253 = vmatpush3.bf16.msra.mxu1 %v2399_v9 }
  0xd8   :  { %2234 = vmatprep.subr.bf16.mxu0 %v3494_v56  ;;  %2254 = vmatprep.subr.bf16.mxu1 %v3494_v56 }
  0xdb   :  { %2235 = vmatpush3.bf16.msra.mxu0 %v2398_v31  ;;  %2255 = vmatpush3.bf16.msra.mxu1 %v2401_v34 }
  0xdc   :  { %2236 = vmatprep.subr.bf16.mxu0 %v3494_v56  ;;  %2256 = vmatprep.subr.bf16.mxu1 %v3494_v56 }
  0xdf   :  { %2237 = vmatpush3.bf16.msra.mxu0 %v2400_v27  ;;  %2257 = vmatpush3.bf16.msra.mxu1 %v2403_v6 }
  0xe0   :  { %2262 = vmatprep.subr.bf16.mxu0 %v3494_v56  ;;  %2282 = vmatprep.subr.bf16.mxu1 %v3494_v56 }
 0x12e   :  { %v235_v58 = vpop.xlane.xlu1 %234 }
 0x12f   :  { %v236_v14 = vmul.f32 0.0078125, %v235_v58 }
 0x131   :  { %v237_v43 = vadd.f32 1e-05, %v236_v14 }
 0x132   :  { %v1465_v44 = vpop.xlane.xlu1 %1464 }
 0x133   :  { %v1467_v49 = vmul.f32 0.0078125, %v1465_v44  ;;  %2451 = vrsqrt.f32 %v237_v43 }
 0x135   :  { %v1471_v22 = vrot.slane %v1467_v49, 2  ;;  %v1472_v46 = vrot.slane %v1467_v49, 3  ;;  %v1473_v33 = vrot.slane %v1467_v49, 4  ;;  %v1474_v53 = vrot.slane %v1467_v49, 5  ;;  %v112_v12 = vpop.xlane.xlu0 %111 }
 0x136   :  { %v113_v35 = vmul.f32 0.0078125, %v112_v12  ;;  %v1461_v57 = vpop.xlane.xlu1 %1460 }
 0x137   :  { %v2968_v16 = vsub.f32 %v2549_v2, %v1471_v22  ;;  %v2971_v61 = vsub.f32 %v2554_v3, %v1472_v46  ;;  %v2974_v25 = vsub.f32 %v2559_v4, %v1473_v33  ;;  %v1466_v23 = vmul.f32 0.0078125, %v1461_v57 }
 0x138   :  { %v2977_v31 = vsub.f32 %v2564_v5, %v1474_v53  ;;  %v114_v14 = vadd.f32 1e-05, %v113_v35 }
 0x139   :  { %3507 = vst [vmem:[#allocation2_spill] sm:$0xff] %v2968_v16  ;;  %3508 = vst [vmem:[#allocation3_spill] sm:$0xff] %v2971_v61  ;;  %v1470_v9 = vrot.slane %v1466_v23, 1  ;;  %v2980_v27 = vsub.f32 %v2539_v0, %v1466_v23  ;;  %v1702_v34 = vpop.xlane.xlu0 %1701  ;;  %v1489_v6 = vmul.f32 %v2968_v16, %v2968_v16  ;;  %v1490_v58 = vmul.f32 %v2971_v61, %v2971_v61 }
 0x13a   :  { %3509 = vst [vmem:[#allocation4_spill] sm:$0xff] %v2974_v25  ;;  %3510 = vst [vmem:[#allocation5_spill] sm:$0xff] %v2977_v31  ;;  %v1704_v43 = vmul.f32 0.0078125, %v1702_v34  ;;  %v1491_v44 = vmul.f32 %v2974_v25, %v2974_v25  ;;  %v1492_v5 = vmul.f32 %v2977_v31, %v2977_v31  ;;  %2453 = vrsqrt.f32 %v114_v14 }
 0x13b   :  { %v2991_v49 = vsub.f32 %v2544_v1, %v1470_v9  ;;  %v1487_v0 = vmul.f32 %v2980_v27, %v2980_v27  ;;  %v1501_v22 = vrot.slane %v1489_v6, 6  ;;  %v1502_v46 = vrot.slane %v1490_v58, 5 }
 0x13c   :  { %v1707_v33 = vrot.slane %v1704_v43, 1  ;;  %v1708_v53 = vrot.slane %v1704_v43, 2  ;;  %v1709_v12 = vrot.slane %v1704_v43, 3  ;;  %v1504_v57 = vrot.slane %v1491_v44, 4 }
 0x13d   :  { %v1698_v35 = vpop.xlane.xlu0 %1697  ;;  %v1503_v23 = vsel %vm48_vm6, %v1502_v46, %v1501_v22  ;;  %v1506_v34 = vrot.slane %v1492_v5, 3  ;;  %v1488_v56 = vmul.f32 %v2991_v49, %v2991_v49  ;;  %v1710_v31 = vrot.slane %v1704_v43, 4  ;;  %v2479_v5 = vld [vmem:[%s3481_s0] sm:$0xff] }
 0x13e   :  { %v2999_v9 = vsub.f32 %v2544_v1, %v1707_v33  ;;  %v3002_v25 = vsub.f32 %v2549_v2, %v1708_v53  ;;  %v1703_v6 = vmul.f32 0.0078125, %v1698_v35  ;;  %v1505_v58 = vsel %vm51_vm0, %v1504_v57, %v1503_v23 }
 0x13f   :  { %v1507_v61 = vsel %vm54_vm1, %v1506_v34, %v1505_v58  ;;  %v1499_v44 = vrot.slane %v1488_v56, 7  ;;  %v1711_v16 = vrot.slane %v1704_v43, 5  ;;  %v3007_v22 = vsub.f32 %v2554_v3, %v1709_v12  ;;  %v2480_v3 = vld [vmem:[%s3481_s0 + $0x28] sm:$0xff] }
 0x140   :  { %3511 = vst [vmem:[#allocation6_spill] sm:$0xff] %v3002_v25  ;;  %v3012_v46 = vsub.f32 %v2479_v5, %v1703_v6  ;;  %v1513_v1 = vsel %vm1462_vm14, %v1507_v61, 0.0  ;;  %v3016_v2 = vsub.f32 %v2559_v4, %v1710_v31  ;;  %v1725_v33 = vmul.f32 %v2999_v9, %v2999_v9  ;;  %v2452_v53 = vpop.eup %2451 }
 0x141   :  { %3512 = vst [vmem:[#allocation7_spill] sm:$0xff] %v3007_v22  ;;  %1514 = vadd.xlane.f32.xlu1 %v1513_v1  ;;  %v1500_v56 = vsel %vm520_vm8, %v1499_v44, %v1487_v0  ;;  %v3024_v43 = vsub.f32 %v2480_v3, %v1711_v16  ;;  %v1726_v12 = vmul.f32 %v3002_v25, %v3002_v25  ;;  %v240_v44 = vrot.slane %v2452_v53, 1 }
 0x142   :  { %3513 = vst [vmem:[#allocation8_spill] sm:$0xff] %v3016_v2  ;;  %v1727_v4 = vmul.f32 %v3007_v22, %v3007_v22  ;;  %v571_v61 = vpop.xlane.xlu1 %570  ;;  %v1510_v31 = vsel %vm1458_vm15, %v1500_v56, 0.0  ;;  %v1724_v57 = vmul.f32 %v3012_v46, %v3012_v46  ;;  %v1728_v0 = vmul.f32 %v3016_v2, %v3016_v2 }
 0x143   :  { %3514 = vst [vmem:[#allocation9_spill] sm:$0xff] %v3024_v43  ;;  %v1736_v35 = vrot.slane %v1725_v33, 7  ;;  %1511 = vadd.xlane.f32.xlu0 %v1510_v31  ;;  %v1729_v16 = vmul.f32 %v3024_v43, %v3024_v43  ;;  %v1737_v23 = vrot.slane %v1726_v12, 6  ;;  %v241_v5 = vrot.slane %v2452_v53, 2 }
 0x144   :  { %v1739_v34 = vrot.slane %v1727_v4, 5  ;;  %v1747_v6 = vsel %vm520_vm8, %v1724_v57, 0.0  ;;  %v1741_v58 = vrot.slane %v1728_v0, 4  ;;  %v572_v1 = vmul.f32 0.0078125, %v571_v61  ;;  %v3044_v4 = vld [vmem:[%s3483_s1] ss:$0 sm:$0xff] }
 0x145   :  { %1748 = vadd.xlane.f32.xlu1 %v1747_v6  ;;  %v1738_v56 = vsel %vm48_vm6, %v1737_v23, %v1736_v35  ;;  %v1743_v3 = vrot.slane %v1729_v16, 3  ;;  %v242_v22 = vrot.slane %v2452_v53, 3  ;;  %v243_v31 = vrot.slane %v2452_v53, 4 }
 0x146   :  { %v804_v2 = vpop.xlane.xlu1 %803  ;;  %v801_v33 = vpop.xlane.xlu0 %800  ;;  %v1740_v14 = vsel %vm51_vm0, %v1739_v34, %v1738_v56  ;;  %v244_v25 = vrot.slane %v2452_v53, 5  ;;  %v251_v12 = vmul.f32 %v2452_v53, %v2649_v13  ;;  %v252_v35 = vmul.f32 %v240_v44, %v2655_v17  ;;  %v3054_v13 = vld [vmem:[%s3484_s2] ss:$0 sm:$0xff] }
 0x147   :  { %v806_v57 = vmul.f32 0.0078125, %v804_v2  ;;  %v1742_v61 = vsel %vm54_vm1, %v1741_v58, %v1740_v14  ;;  %v253_v16 = vmul.f32 %v241_v5, %v2658_v18  ;;  %v254_v23 = vmul.f32 %v242_v22, %v2661_v19 }
 0x148   :  { %v1744_v0 = vsel %vm57_vm2, %v1743_v3, %v1742_v61  ;;  %v573_v34 = vadd.f32 1e-05, %v572_v1  ;;  %v805_v53 = vmul.f32 0.0078125, %v801_v33  ;;  %v255_v2 = vmul.f32 %v243_v31, %v2664_v20 }
 0x149   :  { %v1750_v6 = vsel %vm1699_vm13, %v1744_v0, 0.0  ;;  %v256_v58 = vmul.f32 %v244_v25, %v2667_v21  ;;  %v257_v17 = vmul.f32 %v3044_v4, %v251_v12  ;;  %v258_v18 = vmul.f32 %v3044_v4, %v252_v35  ;;  %v2454_v35 = vpop.eup %2453 }
 0x14a   :  { %1751 = vadd.xlane.f32.xlu0 %v1750_v6  ;;  %v259_v19 = vmul.f32 %v3044_v4, %v253_v16  ;;  %v808_v22 = vadd.f32 1e-05, %v806_v57  ;;  %v260_v44 = vmul.f32 %v3044_v4, %v254_v23  ;;  %v1275_v5 = vpop.xlane.xlu1 %1274  ;;  %v261_v1 = vmul.f32 %v3044_v4, %v255_v2  ;;  %v1038_v33 = vpop.xlane.xlu0 %1037 }
 0x14b   :  { %v262_v56 = vmul.f32 %v3044_v4, %v256_v58  ;;  %v263_v3 = vadd.f32 %v3054_v13, %v257_v17  ;;  %2455 = vrsqrt.f32 %v573_v34  ;;  %v807_v20 = vadd.f32 1e-05, %v805_v53 }
 0x14c   :  { %v264_v21 = vadd.f32 %v3054_v13, %v258_v18  ;;  %v265_v25 = vadd.f32 %v3054_v13, %v259_v19  ;;  %v266_v14 = vadd.f32 %v3054_v13, %v260_v44  ;;  %v267_v31 = vadd.f32 %v3054_v13, %v261_v1 }
 0x14d   :  { %v268_v12 = vadd.f32 %v3054_v13, %v262_v56  ;;  %v269_v57 = vpack.c.bf16 %v263_v3, %v263_v3  ;;  %2457 = vrsqrt.f32 %v808_v22  ;;  %v1279_v61 = vmul.f32 0.0078125, %v1275_v5 }
 0x14e   :  { %v270_v0 = vpack.c.bf16 %v264_v21, %v264_v21  ;;  %v1042_v16 = vmul.f32 0.0078125, %v1038_v33  ;;  %v271_v23 = vpack.c.bf16 %v265_v25, %v265_v25  ;;  %v272_v34 = vpack.c.bf16 %v266_v14, %v266_v14 }
 0x14f   :  { %v273_v53 = vpack.c.bf16 %v267_v31, %v267_v31  ;;  %2459 = vrsqrt.f32 %v807_v20  ;;  %v274_v6 = vpack.c.bf16 %v268_v12, %v268_v12  ;;  %v298_v2 = vunpack.c.l.b16 %v269_v57  ;;  %v1041_v20 = vpop.xlane.xlu0 %1040 }
 0x150   :  { %v299_v58 = vunpack.c.l.b16 %v270_v0  ;;  %v300_v17 = vunpack.c.l.b16 %v271_v23  ;;  %v301_v18 = vunpack.c.l.b16 %v272_v34  ;;  %v1281_v44 = vadd.f32 1e-05, %v1279_v61 }
 0x151   :  { %v302_v19 = vunpack.c.l.b16 %v273_v53  ;;  %v303_v1 = vunpack.c.l.b16 %v274_v6  ;;  %v304_v43 = vrot.slane %v298_v2, 1  ;;  %v117_v56 = vrot.slane %v2454_v35, 1 }
 0x152   :  { %v1044_v3 = vadd.f32 1e-05, %v1042_v16  ;;  %v306_v22 = vrot.slane %v300_v17, 7  ;;  %v308_v5 = vrot.slane %v301_v18, 6  ;;  %v118_v14 = vrot.slane %v2454_v35, 2  ;;  %v1278_v17 = vpop.xlane.xlu1 %1277 }
 0x153   :  { %v310_v21 = vrot.slane %v302_v19, 5  ;;  %v305_v33 = vsel %vm48_vm6, %v299_v58, %v304_v43  ;;  %v312_v25 = vrot.slane %v303_v1, 4  ;;  %v119_v31 = vrot.slane %v2454_v35, 3 }
 0x154   :  { %v307_v12 = vsel %vm51_vm0, %v306_v22, %v305_v33  ;;  %v120_v57 = vrot.slane %v2454_v35, 4  ;;  %v121_v0 = vrot.slane %v2454_v35, 5  ;;  %v128_v23 = vmul.f32 %v2454_v35, %v2692_v47 }
 0x155   :  { %v309_v61 = vsel %vm54_vm1, %v308_v5, %v307_v12  ;;  %v129_v34 = vmul.f32 %v117_v56, %v2695_v48  ;;  %v130_v16 = vmul.f32 %v118_v14, %v2702_v51  ;;  %v131_v53 = vmul.f32 %v119_v31, %v2705_v52  ;;  %v2402_v48 = vld [vmem:[%s3482_s3 + $0xb8] sm:$0xff]  }
 0x156   :  { %v311_v43 = vsel %vm57_vm2, %v310_v21, %v309_v61  ;;  %v132_v6 = vmul.f32 %v120_v57, %v2709_v54  ;;  %v133_v2 = vmul.f32 %v121_v0, %v2712_v55  ;;  %v140_v58 = vmul.f32 %v3044_v4, %v128_v23 }
 0x157   :  { %v1043_v18 = vmul.f32 0.0078125, %v1041_v20  ;;  %v313_v47 = vsel %vm60_vm3, %v312_v25, %v311_v43  ;;  %v141_v51 = vmul.f32 %v3044_v4, %v129_v34  ;;  %v142_v52 = vmul.f32 %v3044_v4, %v130_v16 }
 0x158   :  { %v3088_v35 = vpop.eup %2455  ;;  %v314_v19 = vpack.c.b16 %v313_v47, %v313_v47  ;;  %v143_v54 = vmul.f32 %v3044_v4, %v131_v53  ;;  %v144_v55 = vmul.f32 %v3044_v4, %v132_v6  ;;  %v145_v1 = vmul.f32 %v3044_v4, %v133_v2 }
 0x159   :  { %2461 = vrsqrt.f32 %v1281_v44  ;;  %v152_v56 = vadd.f32 %v3054_v13, %v140_v58  ;;  %v153_v22 = vadd.f32 %v3054_v13, %v141_v51  ;;  %v154_v5 = vadd.f32 %v3054_v13, %v142_v52  ;;  %v2404_v44 = vld [vmem:[%s3482_s3 + $0xb0] sm:$0xff]  }
 0x15a   :  { %v2458_v21 = vpop.eup %2457  ;;  %v1280_v33 = vmul.f32 0.0078125, %v1278_v17  ;;  %2239 = vmatmul.mubr.bf16.vlgmr.msra.gmra.mxu0 %v314_v19  ;;  %v155_v25 = vadd.f32 %v3054_v13, %v143_v54  ;;  %v156_v14 = vadd.f32 %v3054_v13, %v144_v55  ;;  %v157_v31 = vadd.f32 %v3054_v13, %v145_v1  ;;  %v2406_v19 = vld [vmem:[%s3482_s3 + $0xa8] sm:$0xff]  }
 0x15b   :  { %2463 = vrsqrt.f32 %v1044_v3  ;;  %2263 = vmatpush3.bf16.msra.mxu0 %v2402_v48  ;;  %v158_v20 = vpack.c.bf16 %v152_v56, %v152_v56  ;;  %v159_v12 = vpack.c.bf16 %v153_v22, %v153_v22  ;;  %v160_v57 = vpack.c.bf16 %v154_v5, %v154_v5 }
 0x15c   :  { %v3102_v0 = vpop.eup %2459  ;;  %v1045_v23 = vadd.f32 1e-05, %v1043_v18  ;;  %v3515_v61 = vmov 0.0   ;;  %v161_v34 = vpack.c.bf16 %v155_v25, %v155_v25  ;;  %v162_v16 = vpack.c.bf16 %v156_v14, %v156_v14 }
 0x15d   :  { %2264 = vmatprep.subr.bf16.mxu0 %v3515_v61  ;;  %v163_v53 = vpack.c.bf16 %v157_v31, %v157_v31  ;;  %2278 = vmatprep.mubr.msk.bf16.mxu0 %vm2484_vm9, %v3515_v61  ;;  %v817_v3 = vrot.slane %v2458_v21, 5  ;;  %v411_v43 = vunpack.c.l.b16 %v159_v12  ;;  %v412_v6 = vunpack.c.l.b16 %v160_v57 }
 0x15e   :  { %v576_v2 = vrot.slane %v3088_v35, 1  ;;  %v413_v58 = vunpack.c.l.b16 %v161_v34  ;;  %v414_v17 = vunpack.c.l.b16 %v162_v16  ;;  %v577_v48 = vrot.slane %v3088_v35, 2 }
 0x15f   :  { %v415_v47 = vunpack.c.l.b16 %v163_v53  ;;  %2265 = vmatpush3.bf16.msra.mxu0 %v2404_v44  ;;  %v410_v18 = vunpack.c.l.b16 %v158_v20  ;;  %v416_v51 = vrot.slane %v411_v43, 7  ;;  %v418_v52 = vrot.slane %v412_v6, 6  ;;  %v2408_v20 = vld [vmem:[%s3482_s3 + $0xa0] sm:$0xff]  }
 0x160   :  { %v578_v54 = vrot.slane %v3088_v35, 3  ;;  %v1282_v55 = vadd.f32 1e-05, %v1280_v33  ;;  %2465 = vrsqrt.f32 %v1045_v23  ;;  %2266 = vmatprep.subr.bf16.mxu0 %v3515_v61  ;;  %v579_v1 = vrot.slane %v3088_v35, 4 }
 0x161   :  { %v829_v56 = vmul.f32 %v817_v3, %v2699_v50  ;;  %v417_v22 = vsel %vm48_vm6, %v416_v51, %v410_v18  ;;  %v420_v5 = vrot.slane %v413_v58, 5  ;;  %v580_v21 = vrot.slane %v3088_v35, 5 }
 0x162   :  { %v419_v25 = vsel %vm51_vm0, %v418_v52, %v417_v22  ;;  %v422_v14 = vrot.slane %v414_v17, 4  ;;  %v424_v31 = vrot.slane %v415_v47, 3  ;;  %v587_v44 = vmul.f32 %v3088_v35, %v2779_v28 }
 0x163   :  { %v421_v33 = vsel %vm54_vm1, %v420_v5, %v419_v25  ;;  %2267 = vmatpush3.bf16.msra.mxu0 %v2406_v19  ;;  %v588_v50 = vmul.f32 %v576_v2, %v2784_v29  ;;  %v589_v12 = vmul.f32 %v577_v48, %v2789_v30  ;;  %v590_v57 = vmul.f32 %v578_v54, %v2793_v60  ;;  %v2405_v29 = vld [vmem:[%s3482_s3 + $0xf8] sm:$0xff]  }
 0x164   :  { %v423_v23 = vsel %vm57_vm2, %v422_v14, %v421_v33  ;;  %2268 = vmatprep.subr.bf16.mxu0 %v3515_v61  ;;  %v591_v34 = vmul.f32 %v579_v1, %v2796_v37  ;;  %v592_v28 = vmul.f32 %v580_v21, %v2799_v38  ;;  %v593_v35 = vmul.f32 %v3044_v4, %v587_v44  ;;  %v2410_v2 = vld [vmem:[%s3482_s3 + $0x98] sm:$0xff]   ;;  %v2407_v1 = vld [vmem:[%s3482_s3 + $0xf0] sm:$0xff]  }
 0x165   :  { %v425_v16 = vsel %vm60_vm3, %v424_v31, %v423_v23  ;;  %v594_v30 = vmul.f32 %v3044_v4, %v588_v50  ;;  %v595_v60 = vmul.f32 %v3044_v4, %v589_v12  ;;  %v596_v53 = vmul.f32 %v3044_v4, %v590_v57 }
 0x166   :  { %v3140_v3 = vpop.eup %2461  ;;  %v426_v43 = vpack.c.b16 %v425_v16, %v425_v16  ;;  %v597_v37 = vmul.f32 %v3044_v4, %v591_v34  ;;  %v598_v38 = vmul.f32 %v3044_v4, %v592_v28  ;;  %v599_v6 = vadd.f32 %v3054_v13, %v593_v35 }
 0x167   :  { %2269 = vmatpush3.bf16.msra.mxu0 %v2408_v20  ;;  %v600_v58 = vadd.f32 %v3054_v13, %v594_v30  ;;  %v601_v17 = vadd.f32 %v3054_v13, %v595_v60  ;;  %v602_v47 = vadd.f32 %v3054_v13, %v596_v53  ;;  %v813_v48 = vrot.slane %v3102_v0, 1  ;;  %v2412_v20 = vld [vmem:[%s3482_s3 + $0x90] sm:$0xff]  }
 0x168   :  { %v3152_v18 = vpop.eup %2463  ;;  %2259 = vmatmul.mubr.bf16.vlgmr.msra.gmra.mxu1 %v426_v43  ;;  %2270 = vmatprep.subr.bf16.mxu0 %v3515_v61  ;;  %v603_v51 = vadd.f32 %v3054_v13, %v597_v37  ;;  %v604_v52 = vadd.f32 %v3054_v13, %v598_v38  ;;  %v605_v19 = vpack.c.bf16 %v599_v6, %v599_v6  ;;  %v814_v54 = vrot.slane %v3102_v0, 2  ;;  %v2414_v43 = vld [vmem:[%s3482_s3 + $0x88] sm:$0xff]  }
 0x169   :  { %2283 = vmatpush3.bf16.msra.mxu1 %v2405_v29  ;;  %v606_v22 = vpack.c.bf16 %v600_v58, %v600_v58  ;;  %v607_v5 = vpack.c.bf16 %v601_v17, %v601_v17  ;;  %v608_v21 = vpack.c.bf16 %v602_v47, %v602_v47  ;;  %2298 = vmatprep.mubr.msk.bf16.mxu1 %vm2484_vm9, %v3515_v61  ;;  %v815_v25 = vrot.slane %v3102_v0, 3  ;;  %v2411_v17 = vld [vmem:[%s3482_s3 + $0xe0] sm:$0xff]  }
 0x16a   :  { %2284 = vmatprep.subr.bf16.mxu1 %v3515_v61  ;;  %v609_v14 = vpack.c.bf16 %v603_v51, %v603_v51  ;;  %v610_v31 = vpack.c.bf16 %v604_v52, %v604_v52  ;;  %v634_v44 = vunpack.c.l.b16 %v605_v19  ;;  %v816_v33 = vrot.slane %v3102_v0, 4 }
 0x16b   :  { %2467 = vrsqrt.f32 %v1282_v55  ;;  %2271 = vmatpush3.bf16.msra.mxu0 %v2410_v2  ;;  %v635_v50 = vunpack.c.l.b16 %v606_v22  ;;  %v637_v12 = vunpack.c.l.b16 %v608_v21  ;;  %v824_v57 = vmul.f32 %v3102_v0, %v2675_v26  ;;  %v2409_v55 = vld [vmem:[%s3482_s3 + $0xe8] sm:$0xff]  }
 0x16c   :  { %v835_v23 = vmul.f32 %v3044_v4, %v829_v56  ;;  %2272 = vmatprep.subr.bf16.mxu0 %v3515_v61  ;;  %v636_v34 = vunpack.c.l.b16 %v607_v5  ;;  %v638_v28 = vunpack.c.l.b16 %v609_v14  ;;  %v825_v35 = vmul.f32 %v813_v48, %v2686_v32  ;;  %v2416_v5 = vld [vmem:[%s3482_s3 + $0x80] sm:$0xff]  }
 0x16d   :  { %v3174_v16 = vpop.eup %2465  ;;  %2285 = vmatpush3.bf16.msra.mxu1 %v2407_v1  ;;  %v640_v29 = vrot.slane %v634_v44, 2  ;;  %v641_v30 = vrot.slane %v635_v50, 1  ;;  %v826_v60 = vmul.f32 %v814_v54, %v2824_v63  ;;  %v827_v26 = vmul.f32 %v815_v25, %v2827_v59 }
 0x16e   :  { %2286 = vmatprep.subr.bf16.mxu1 %v3515_v61  ;;  %v639_v0 = vunpack.c.l.b16 %v610_v31  ;;  %v644_v56 = vrot.slane %v637_v12, 7  ;;  %v828_v53 = vmul.f32 %v816_v33, %v2831_v24  ;;  %v830_v32 = vmul.f32 %v3044_v4, %v824_v57 }
 0x16f   :  { %2273 = vmatpush3.bf16.msra.mxu0 %v2412_v20  ;;  %v642_v37 = vsel %vm48_vm6, %v641_v30, %v640_v29  ;;  %v831_v38 = vmul.f32 %v3044_v4, %v825_v35  ;;  %v832_v63 = vmul.f32 %v3044_v4, %v826_v60  ;;  %v833_v59 = vmul.f32 %v3044_v4, %v827_v26  ;;  %v2413_v20 = vld [vmem:[%s3482_s3 + $0xd8] sm:$0xff]  }
 0x170   :  { %2274 = vmatprep.subr.bf16.mxu0 %v3515_v61  ;;  %v643_v6 = vsel %vm51_vm0, %v636_v34, %v642_v37  ;;  %v646_v24 = vrot.slane %v638_v28, 6  ;;  %v834_v2 = vmul.f32 %v3044_v4, %v828_v53  ;;  %v836_v58 = vadd.f32 %v3054_v13, %v830_v32  ;;  %v2418_v29 = vld [vmem:[%s3482_s3 + $0x138] sm:$0xff]  }
 0x171   :  { %2287 = vmatpush3.bf16.msra.mxu1 %v2409_v55  ;;  %v645_v47 = vsel %vm54_vm1, %v644_v56, %v643_v6  ;;  %v837_v48 = vadd.f32 %v3054_v13, %v831_v38  ;;  %v838_v51 = vadd.f32 %v3054_v13, %v832_v63  ;;  %v839_v52 = vadd.f32 %v3054_v13, %v833_v59 }
 0x172   :  { %2288 = vmatprep.subr.bf16.mxu1 %v3515_v61  ;;  %v647_v19 = vsel %vm57_vm2, %v646_v24, %v645_v47  ;;  %v840_v54 = vadd.f32 %v3054_v13, %v834_v2  ;;  %v842_v1 = vpack.c.bf16 %v836_v58, %v836_v58  ;;  %v1050_v22 = vrot.slane %v3152_v18, 1  ;;  %v2420_v58 = vld [vmem:[%s3482_s3 + $0x130] sm:$0xff]  }
 0x173   :  { %2275 = vmatpush3.bf16.msra.mxu0 %v2414_v43  ;;  %v648_v21 = vrot.slane %v639_v0, 5  ;;  %v843_v25 = vpack.c.bf16 %v837_v48, %v837_v48  ;;  %v844_v14 = vpack.c.bf16 %v838_v51, %v838_v51  ;;  %v841_v31 = vadd.f32 %v3054_v13, %v835_v23  ;;  %v2415_v43 = vld [vmem:[%s3482_s3 + $0xd0] sm:$0xff]   ;;  %v2417_v48 = vld [vmem:[%s3482_s3 + $0xc8] sm:$0xff]  }
 0x174   :  { %2276 = vmatprep.subr.bf16.mxu0 %v3515_v61  ;;  %v871_v44 = vunpack.c.l.b16 %v842_v1  ;;  %v1051_v33 = vrot.slane %v3152_v18, 2  ;;  %v1052_v34 = vrot.slane %v3152_v18, 3  ;;  %v845_v28 = vpack.c.bf16 %v839_v52, %v839_v52 }
 0x175   :  { %2289 = vmatpush3.bf16.msra.mxu1 %v2411_v17  ;;  %v649_v50 = vsel %vm60_vm3, %v648_v21, %v647_v19  ;;  %v872_v12 = vunpack.c.l.b16 %v843_v25  ;;  %v873_v57 = vunpack.c.l.b16 %v844_v14  ;;  %v846_v23 = vpack.c.bf16 %v840_v54, %v840_v54 }
 0x176   :  { %2290 = vmatprep.subr.bf16.mxu1 %v3515_v61  ;;  %v1061_v35 = vmul.f32 %v3152_v18, %v2737_v36  ;;  %v1062_v55 = vmul.f32 %v1050_v22, %v2741_v39  ;;  %v877_v30 = vrot.slane %v871_v44, 3  ;;  %v1063_v0 = vmul.f32 %v1051_v33, %v2744_v40  ;;  %v2422_v22 = vld [vmem:[%s3482_s3 + $0x128] sm:$0xff]  }
 0x177   :  { %2277 = vmatpush3.bf16.msra.mxu0 %v2416_v5  ;;  %v878_v60 = vrot.slane %v872_v12, 2  ;;  %v880_v26 = vrot.slane %v873_v57, 1  ;;  %v1054_v53 = vrot.slane %v3174_v16, 5  ;;  %v650_v32 = vpack.c.b16 %v649_v50, %v649_v50 }
 0x178   :  { %v3225_v56 = vpop.eup %2467  ;;  %2302 = vmatprep.subr.bf16.mxu0 %v3515_v61  ;;  %v1067_v36 = vmul.f32 %v3044_v4, %v1061_v35  ;;  %v1068_v39 = vmul.f32 %v3044_v4, %v1062_v55  ;;  %v847_v18 = vpack.c.bf16 %v841_v31, %v841_v31  ;;  %v1064_v40 = vmul.f32 %v1052_v34, %v2851_v62  ;;  %v2419_v31 = vld [vmem:[%s3482_s3 + $0xc0] sm:$0xff]  }
 0x179   :  { %2291 = vmatpush3.bf16.msra.mxu1 %v2413_v20  ;;  %v879_v37 = vsel %vm48_vm6, %v878_v60, %v877_v30  ;;  %v1069_v38 = vmul.f32 %v3044_v4, %v1063_v0  ;;  %v1053_v63 = vrot.slane %v3174_v16, 4  ;;  %v875_v59 = vunpack.c.l.b16 %v846_v23  ;;  %v2421_v60 = vld [vmem:[%s3482_s3 + $0x178] sm:$0xff]  }
 0x17a   :  { %2292 = vmatprep.subr.bf16.mxu1 %v3515_v61  ;;  %2279 = vmatmul.mubr.bf16.vlgmr.msra.gmra.mxu0 %v650_v32  ;;  %v881_v6 = vsel %vm51_vm0, %v880_v26, %v879_v37  ;;  %v1074_v24 = vadd.f32 %v3054_v13, %v1068_v39  ;;  %v874_v2 = vunpack.c.l.b16 %v845_v28  ;;  %v1073_v62 = vadd.f32 %v3054_v13, %v1067_v36  ;;  %v2424_v28 = vld [vmem:[%s3482_s3 + $0x120] sm:$0xff]  }
 0x17b   :  { %2303 = vmatpush3.bf16.msra.mxu0 %v2418_v29  ;;  %2318 = vmatprep.mubr.msk.bf16.mxu0 %vm2484_vm9, %v3515_v61  ;;  %v1066_v16 = vmul.f32 %v1054_v53, %v2812_v42  ;;  %v1075_v17 = vadd.f32 %v3054_v13, %v1069_v38  ;;  %v876_v47 = vunpack.c.l.b16 %v847_v18  ;;  %v1070_v52 = vmul.f32 %v3044_v4, %v1064_v40  ;;  %v2423_v40 = vld [vmem:[%s3482_s3 + $0x170] sm:$0xff]  }
 0x17c   :  { %2304 = vmatprep.subr.bf16.mxu0 %v3515_v61  ;;  %v882_v51 = vsel %vm54_vm1, %v874_v2, %v881_v6  ;;  %v1080_v19 = vpack.c.bf16 %v1074_v24, %v1074_v24  ;;  %v1065_v54 = vmul.f32 %v1053_v63, %v2809_v41  ;;  %v883_v42 = vrot.slane %v875_v59, 7  ;;  %v2428_v24 = vld [vmem:[%s3482_s3 + $0x110] sm:$0xff]  }
 0x17d   :  { %2293 = vmatpush3.bf16.msra.mxu1 %v2415_v43  ;;  %v1287_v1 = vrot.slane %v3140_v3, 1  ;;  %v1079_v5 = vpack.c.bf16 %v1073_v62, %v1073_v62  ;;  %v1072_v25 = vmul.f32 %v3044_v4, %v1066_v16  ;;  %v1081_v14 = vpack.c.bf16 %v1075_v17, %v1075_v17 }
 0x17e   :  { %2294 = vmatprep.subr.bf16.mxu1 %v3515_v61  ;;  %v884_v21 = vsel %vm57_vm2, %v883_v42, %v882_v51  ;;  %v1288_v41 = vrot.slane %v3140_v3, 2  ;;  %v885_v44 = vrot.slane %v876_v47, 6  ;;  %v1076_v33 = vadd.f32 %v3054_v13, %v1070_v52  ;;  %v2425_v47 = vld [vmem:[%s3482_s3 + $0x168] sm:$0xff]  }
 0x17f   :  { %2305 = vmatpush3.bf16.msra.mxu0 %v2420_v58  ;;  %v1109_v20 = vunpack.c.l.b16 %v1080_v19  ;;  %v1289_v50 = vrot.slane %v3225_v56, 3  ;;  %v1071_v12 = vmul.f32 %v3044_v4, %v1065_v54  ;;  %v1299_v57 = vmul.f32 %v1287_v1, %v2754_v7  ;;  %v2430_v42 = vld [vmem:[%s3482_s3 + $0x108] sm:$0xff]  }
 0x180   :  { %2306 = vmatprep.subr.bf16.mxu0 %v3515_v61  ;;  %v886_v34 = vsel %vm60_vm3, %v885_v44, %v884_v21  ;;  %v1108_v23 = vunpack.c.l.b16 %v1079_v5  ;;  %v1298_v35 = vmul.f32 %v3140_v3, %v2748_v45  ;;  %v1078_v55 = vadd.f32 %v3054_v13, %v1072_v25 }
 0x181   :  { %2295 = vmatpush3.bf16.msra.mxu1 %v2417_v48  ;;  %v1110_v29 = vunpack.c.l.b16 %v1081_v14  ;;  %v1290_v30 = vrot.slane %v3225_v56, 4  ;;  %v1300_v7 = vmul.f32 %v1288_v41, %v2757_v8  ;;  %v1082_v26 = vpack.c.bf16 %v1076_v33, %v1076_v33  ;;  %v2426_v8 = vld [vmem:[%s3482_s3 + $0x118] sm:$0xff]   ;;  %v2432_v33 = vld [vmem:[%s3482_s3 + $0x100] sm:$0xff]  }
 0x182   :  { %2296 = vmatprep.subr.bf16.mxu1 %v3515_v61  ;;  %v1115_v0 = vrot.slane %v1109_v20, 3  ;;  %v1301_v53 = vmul.f32 %v1289_v50, %v2765_v10  ;;  %v1305_v45 = vmul.f32 %v3044_v4, %v1299_v57  ;;  %v887_v3 = vpack.c.b16 %v886_v34, %v886_v34 }
 0x183   :  { %2307 = vmatpush3.bf16.msra.mxu0 %v2422_v22  ;;  %v1077_v32 = vadd.f32 %v3054_v13, %v1071_v12  ;;  %v1114_v36 = vrot.slane %v1108_v23, 4  ;;  %v1304_v39 = vmul.f32 %v3044_v4, %v1298_v35  ;;  %v1084_v18 = vpack.c.bf16 %v1078_v55, %v1078_v55  ;;  %v2435_v55 = vld [vmem:[%s3482_s3 + $0x1b8] sm:$0xff]  }
 0x184   :  { %2308 = vmatprep.subr.bf16.mxu0 %v3515_v61  ;;  %v1117_v10 = vrot.slane %v1110_v29, 2  ;;  %v1302_v43 = vmul.f32 %v1290_v30, %v2768_v11  ;;  %v1306_v37 = vmul.f32 %v3044_v4, %v1300_v7  ;;  %v1111_v38 = vunpack.c.l.b16 %v1082_v26 }
 0x185   :  { %2297 = vmatpush3.bf16.msra.mxu1 %v2419_v31  ;;  %v1116_v63 = vsel %vm48_vm6, %v1115_v0, %v1114_v36  ;;  %v1307_v59 = vmul.f32 %v3044_v4, %v1301_v53  ;;  %v1311_v6 = vadd.f32 %v3054_v13, %v1305_v45  ;;  %v1083_v11 = vpack.c.bf16 %v1077_v32, %v1077_v32  ;;  %v2436_v45 = vld [vmem:[%s3482_s3 + $0x1b0] sm:$0xff]  }
 0x186   :  { %2322 = vmatprep.subr.bf16.mxu1 %v3515_v61  ;;  %v1310_v2 = vadd.f32 %v3054_v13, %v1304_v39  ;;  %v1113_v58 = vunpack.c.l.b16 %v1084_v18  ;;  %v1118_v62 = vsel %vm51_vm0, %v1117_v10, %v1116_v63  ;;  %v1308_v16 = vmul.f32 %v3044_v4, %v1302_v43  ;;  %v2438_v18 = vld [vmem:[%s3482_s3 + $0x1a8] sm:$0xff]   ;;  %v2434_v43 = vld [vmem:[%s3482_s3 + $0x140] sm:$0xff]   ;;  %v2437_v63 = vld [vmem:[%s3482_s3 + $0x1f8] sm:$0xff]  }
 0x187   :  { %2309 = vmatpush3.bf16.msra.mxu0 %v2424_v28  ;;  %v1312_v17 = vadd.f32 %v3054_v13, %v1306_v37  ;;  %v1119_v48 = vrot.slane %v1111_v38, 1  ;;  %v1291_v51 = vrot.slane %v3225_v56, 5  ;;  %v1313_v52 = vadd.f32 %v3054_v13, %v1307_v59  ;;  %v2427_v56 = vld [vmem:[%s3482_s3 + $0x160] sm:$0xff]  }
 0x188   :  { %2299 = vmatmul.mubr.bf16.vlgmr.msra.gmra.mxu1 %v887_v3  ;;  %2310 = vmatprep.subr.bf16.mxu0 %v3515_v61  ;;  %v1317_v19 = vpack.c.bf16 %v1311_v6, %v1311_v6  ;;  %v1112_v54 = vunpack.c.l.b16 %v1083_v11  ;;  %v1316_v22 = vpack.c.bf16 %v1310_v2, %v1310_v2  ;;  %v1314_v5 = vadd.f32 %v3054_v13, %v1308_v16  ;;  %v2440_v38 = vld [vmem:[%s3482_s3 + $0x1a0] sm:$0xff]   ;;  %v2442_v6 = vld [vmem:[%s3482_s3 + $0x198] sm:$0xff]   ;;  %v2439_v11 = vld [vmem:[%s3482_s3 + $0x1f0] sm:$0xff]  }
 0x189   :  { %2323 = vmatpush3.bf16.msra.mxu1 %v2421_v60  ;;  %2338 = vmatprep.mubr.msk.bf16.mxu1 %vm2484_vm9, %v3515_v61  ;;  %v1120_v1 = vsel %vm54_vm1, %v1119_v48, %v1118_v62  ;;  %v1318_v21 = vpack.c.bf16 %v1312_v17, %v1312_v17  ;;  %v1122_v25 = vrot.slane %v1113_v58, 7  ;;  %v1303_v14 = vmul.f32 %v1291_v51, %v2771_v15  ;;  %v2429_v15 = vld [vmem:[%s3482_s3 + $0x158] sm:$0xff]   ;;  %v2431_v60 = vld [vmem:[%s3482_s3 + $0x150] sm:$0xff]   ;;  %v2441_v2 = vld [vmem:[%s3482_s3 + $0x1e8] sm:$0xff]  }
 0x18a   :  { %2324 = vmatprep.subr.bf16.mxu1 %v3515_v61  ;;  %v1319_v41 = vpack.c.bf16 %v1313_v52, %v1313_v52  ;;  %v1346_v31 = vunpack.c.l.b16 %v1317_v19  ;;  %v1121_v44 = vsel %vm57_vm2, %v1112_v54, %v1120_v1  ;;  %v1345_v20 = vunpack.c.l.b16 %v1316_v22  ;;  %v2446_v58 = vld [vmem:[%s3482_s3 + $0x188] sm:$0xff]   ;;  %v2443_v16 = vld [vmem:[%s3482_s3 + $0x1e0] sm:$0xff]   ;;  %v2447_v48 = vld [vmem:[%s3482_s3 + $0x1d0] sm:$0xff]  }
 0x18b   :  { %2311 = vmatpush3.bf16.msra.mxu0 %v2426_v8  ;;  %v1320_v50 = vpack.c.bf16 %v1314_v5, %v1314_v5  ;;  %v1347_v12 = vunpack.c.l.b16 %v1318_v21  ;;  %v1123_v57 = vsel %vm60_vm3, %v1122_v25, %v1121_v44  ;;  %v1309_v34 = vmul.f32 %v3044_v4, %v1303_v14  ;;  %v2433_v8 = vld [vmem:[%s3482_s3 + $0x148] sm:$0xff]   ;;  %v2448_v17 = vld [vmem:[%s3482_s3 + $0x180] sm:$0xff]  }
 0x18c   :  { %2312 = vmatprep.subr.bf16.mxu0 %v3515_v61  ;;  %v1348_v28 = vunpack.c.l.b16 %v1319_v41  ;;  %v1352_v23 = vrot.slane %v1346_v31, 4  ;;  %v1351_v35 = vrot.slane %v1345_v20, 5  ;;  %v1124_v29 = vpack.c.b16 %v1123_v57, %v1123_v57  ;;  %v1942_v51 = vld [vmem:[%s3485_s5] sm:$0x3f]  ;;  %v2449_v52 = vld [vmem:[%s3482_s3 + $0x1c8] sm:$0xff]  }
 0x18d   :  { %2325 = vmatpush3.bf16.msra.mxu1 %v2423_v40  ;;  %v1349_v30 = vunpack.c.l.b16 %v1320_v50  ;;  %v1354_v7 = vrot.slane %v1347_v12, 3  ;;  %v1315_v26 = vadd.f32 %v3054_v13, %v1309_v34  ;;  %v2485_v62 = vmov 0   ;;  %v1935_v54 = vld [vmem:[%s3486_s6] sm:$0x3f] }
 0x18e   :  { %2326 = vmatprep.subr.bf16.mxu1 %v3515_v61  ;;  %v1353_v0 = vsel %vm48_vm6, %v1352_v23, %v1351_v35  ;;  %v1356_v53 = vrot.slane %v1348_v28, 2  ;;  %2385 = vset.pattern.permute.xlu0 %v2485_v62  ;;  %v1943_v19 = vadd.f32 1e-10, %v1942_v51  ;;  %v1951_v21 = vld [vmem:[%s3487_s8] sm:$0x3f] }
 0x18f   :  { %2313 = vmatpush3.bf16.msra.mxu0 %v2428_v24  ;;  %v1355_v3 = vsel %vm51_vm0, %v1354_v7, %v1353_v0  ;;  %v1358_v32 = vrot.slane %v1349_v30, 1  ;;  %v1321_v36 = vpack.c.bf16 %v1315_v26, %v1315_v26  ;;  %v2444_v24 = vld [vmem:[%s3482_s3 + $0x190] sm:$0xff]   ;;  %2386 = vset.pattern.permute.xlu1 %v2485_v62  ;;  %v1958_v44 = vld [vmem:[%s3488_s7] sm:$0x3f]  ;;  %v3517_v7 = vld [vmem:[#allocation3_spill] sm:$0xff] }
 0x190   :  { %2314 = vmatprep.subr.bf16.mxu0 %v3515_v61  ;;  %v1357_v39 = vsel %vm54_vm1, %v1356_v53, %v1355_v3  ;;  %1938 = vperm.xlu1 %2386, %v1935_v54   ;;  %v3518_v0 = vld [vmem:[#allocation4_spill] sm:$0xff] }
 0x191   :  { %2327 = vmatpush3.bf16.msra.mxu1 %v2425_v47  ;;  %v1359_v10 = vsel %vm57_vm2, %v1358_v32, %v1357_v39  ;;  %v1350_v37 = vunpack.c.l.b16 %v1321_v36  ;;  %v2445_v47 = vld [vmem:[%s3482_s3 + $0x1d8] sm:$0xff]   ;;  %1946 = vperm.xlu0 %2385, %v1943_v19  }
 0x192   :  { %2328 = vmatprep.subr.bf16.mxu1 %v3515_v61 }
 0x193   :  { %2315 = vmatpush3.bf16.msra.mxu0 %v2430_v42  ;;  %v1360_v40 = vsel %vm60_vm3, %v1350_v37, %v1359_v10  ;;  %v2450_v42 = vld [vmem:[%s3482_s3 + $0x1c0] sm:$0xff]  }
 0x194   :  { %2316 = vmatprep.subr.bf16.mxu0 %v3515_v61  ;;  %v1361_v59 = vpack.c.b16 %v1360_v40, %v1360_v40  ;;  %1954 = vperm.xlu1 %2386, %v1951_v21  }
 0x195   :  { %2329 = vmatpush3.bf16.msra.mxu1 %v2427_v56 }
 0x196   :  { %2330 = vmatprep.subr.bf16.mxu1 %v3515_v61 }
 0x197   :  { %2317 = vmatpush3.bf16.msra.mxu0 %v2432_v33 }
 0x198   :  { %2342 = vmatprep.subr.bf16.mxu0 %v3515_v61  ;;  %1961 = vperm.xlu1 %2386, %v1958_v44  }
 0x199   :  { %2331 = vmatpush3.bf16.msra.mxu1 %v2429_v15 }
 0x19a   :  { %2332 = vmatprep.subr.bf16.mxu1 %v3515_v61  ;;  %2319 = vmatmul.mubr.bf16.vlgmr.msra.gmra.mxu0 %v1124_v29  ;;  %v3516_v29 = vld [vmem:[#allocation2_spill] sm:$0xff] }
 0x19b   :  { %2343 = vmatpush3.bf16.msra.mxu0 %v2435_v55  ;;  %2358 = vmatprep.mubr.msk.bf16.mxu0 %vm2484_vm9, %v3515_v61 }
 0x19c   :  { %2344 = vmatprep.subr.bf16.mxu0 %v3515_v61 }
 0x19d   :  { %2333 = vmatpush3.bf16.msra.mxu1 %v2431_v60 }
 0x19e   :  { %2334 = vmatprep.subr.bf16.mxu1 %v3515_v61 }
 0x19f   :  { %2345 = vmatpush3.bf16.msra.mxu0 %v2436_v45  ;;  %v3519_v45 = vld [vmem:[#allocation5_spill] sm:$0xff] }
 0x1a0   :  { %2346 = vmatprep.subr.bf16.mxu0 %v3515_v61 }
 0x1a1   :  { %2335 = vmatpush3.bf16.msra.mxu1 %v2433_v8 }
 0x1a2   :  { %2336 = vmatprep.subr.bf16.mxu1 %v3515_v61 }
 0x1a3   :  { %2347 = vmatpush3.bf16.msra.mxu0 %v2438_v18 }
 0x1a4   :  { %2348 = vmatprep.subr.bf16.mxu0 %v3515_v61 }
 0x1a5   :  { %2337 = vmatpush3.bf16.msra.mxu1 %v2434_v43 }
 0x1a6   :  { %2362 = vmatprep.subr.bf16.mxu1 %v3515_v61 }
 0x1a7   :  { %2349 = vmatpush3.bf16.msra.mxu0 %v2440_v38 }
 0x1a8   :  { %2339 = vmatmul.mubr.bf16.vlgmr.msra.gmra.mxu1 %v1361_v59  ;;  %2350 = vmatprep.subr.bf16.mxu0 %v3515_v61 }
 0x1a9   :  { %2363 = vmatpush3.bf16.msra.mxu1 %v2437_v63  ;;  %2378 = vmatprep.mubr.msk.bf16.mxu1 %vm2484_vm9, %v3515_v61 }
 0x1aa   :  { %2364 = vmatprep.subr.bf16.mxu1 %v3515_v61 }
 0x1ab   :  { %2351 = vmatpush3.bf16.msra.mxu0 %v2442_v6 }
 0x1ac   :  { %2352 = vmatprep.subr.bf16.mxu0 %v3515_v61 }
 0x1ad   :  { %2365 = vmatpush3.bf16.msra.mxu1 %v2439_v11 }
 0x1ae   :  { %2366 = vmatprep.subr.bf16.mxu1 %v3515_v61 }
 0x1af   :  { %2353 = vmatpush3.bf16.msra.mxu0 %v2444_v24 }
 0x1b0   :  { %2354 = vmatprep.subr.bf16.mxu0 %v3515_v61 }
 0x1b1   :  { %2367 = vmatpush3.bf16.msra.mxu1 %v2441_v2 }
 0x1b2   :  { %2368 = vmatprep.subr.bf16.mxu1 %v3515_v61 }
 0x1b3   :  { %2355 = vmatpush3.bf16.msra.mxu0 %v2446_v58 }
 0x1b4   :  { %2356 = vmatprep.subr.bf16.mxu0 %v3515_v61 }
 0x1b5   :  { %2369 = vmatpush3.bf16.msra.mxu1 %v2443_v16 }
 0x1b6   :  { %2370 = vmatprep.subr.bf16.mxu1 %v3515_v61 }
 0x1b7   :  { %2357 = vmatpush3.bf16.msra.mxu0 %v2448_v17 }
 0x1b9   :  { %2371 = vmatpush3.bf16.msra.mxu1 %v2445_v47 }
 0x1ba   :  { %2372 = vmatprep.subr.bf16.mxu1 %v3515_v61 }
 0x1bd   :  { %2373 = vmatpush3.bf16.msra.mxu1 %v2447_v48 }
 0x1be   :  { %2374 = vmatprep.subr.bf16.mxu1 %v3515_v61 }
 0x1c1   :  { %2375 = vmatpush3.bf16.msra.mxu1 %v2449_v52 }
 0x1c2   :  { %2376 = vmatprep.subr.bf16.mxu1 %v3515_v61 }
 0x1c5   :  { %2377 = vmatpush3.bf16.msra.mxu1 %v2450_v42 }
 0x1ca   :  { %v1515_v1 = vpop.xlane.xlu1 %1514 }
 0x1cb   :  { %v1517_v22 = vmul.f32 0.0078125, %v1515_v1 }
 0x1cc   :  { %v1512_v5 = vpop.xlane.xlu0 %1511 }
 0x1cd   :  { %v1519_v56 = vadd.f32 1e-05, %v1517_v22  ;;  %v1516_v25 = vmul.f32 0.0078125, %v1512_v5 }
 0x1ce   :  { %v1749_v14 = vpop.xlane.xlu1 %1748 }
 0x1cf   :  { %2469 = vrsqrt.f32 %v1519_v56  ;;  %v1518_v41 = vadd.f32 1e-05, %v1516_v25  ;;  %v1753_v31 = vmul.f32 0.0078125, %v1749_v14 }
 0x1d1   :  { %2471 = vrsqrt.f32 %v1518_v41  ;;  %v1755_v61 = vadd.f32 1e-05, %v1753_v31 }
 0x1d3   :  { %2473 = vrsqrt.f32 %v1755_v61  ;;  %v1752_v33 = vpop.xlane.xlu0 %1751  ;;  %v3520_v61 = vld [vmem:[#allocation6_spill] sm:$0xff] }
 0x1d4   :  { %v1754_v20 = vmul.f32 0.0078125, %v1752_v33 }
 0x1d6   :  { %v1756_v50 = vadd.f32 1e-05, %v1754_v20  ;;  %v3521_v20 = vld [vmem:[#allocation7_spill] sm:$0xff] }
 0x1d8   :  { %2475 = vrsqrt.f32 %v1756_v50 }
 0x1dc   :  { %v2470_v12 = vpop.eup %2469 }
 0x1dd   :  { %v1525_v15 = vrot.slane %v2470_v12, 2  ;;  %v1526_v57 = vrot.slane %v2470_v12, 3  ;;  %v1527_v34 = vrot.slane %v2470_v12, 4  ;;  %v1528_v28 = vrot.slane %v2470_v12, 5 }
 0x1de   :  { %v2472_v23 = vpop.eup %2471 }
 0x1df   :  { %v1524_v35 = vrot.slane %v2472_v23, 1  ;;  %v1535_v55 = vmul.f32 %v2472_v23, %v2980_v27  ;;  %v1537_v30 = vmul.f32 %v1525_v15, %v3516_v29  ;;  %v1538_v60 = vmul.f32 %v1526_v57, %v3517_v7  ;;  %v2481_v27 = vld [vmem:[%s3483_s1] ss:$0 sm:$0xff]  ;;  %v3522_v57 = vld [vmem:[#allocation8_spill] sm:$0xff] }
 0x1e0   :  { %v2474_v26 = vpop.eup %2473  ;;  %v1539_v53 = vmul.f32 %v1527_v34, %v3518_v0  ;;  %v1540_v3 = vmul.f32 %v1528_v28, %v3519_v45  ;;  %v3523_v28 = vld [vmem:[#allocation9_spill] sm:$0xff] }
 0x1e1   :  { %v1536_v32 = vmul.f32 %v1524_v35, %v2991_v49  ;;  %v1541_v8 = vmul.f32 %v3044_v4, %v1535_v55  ;;  %v1772_v36 = vmul.f32 %v2474_v26, %v3012_v46  ;;  %v1543_v39 = vmul.f32 %v3044_v4, %v1537_v30 }
 0x1e2   :  { %v1544_v18 = vmul.f32 %v3044_v4, %v1538_v60  ;;  %v1545_v10 = vmul.f32 %v2481_v27, %v1539_v53  ;;  %v1546_v43 = vmul.f32 %v2481_v27, %v1540_v3  ;;  %v2482_v4 = vld [vmem:[%s3484_s2] ss:$0 sm:$0xff] }
 0x1e3   :  { %v1542_v37 = vmul.f32 %v2481_v27, %v1536_v32  ;;  %v1547_v40 = vadd.f32 %v3054_v13, %v1541_v8  ;;  %v1778_v38 = vmul.f32 %v2481_v27, %v1772_v36  ;;  %v1549_v49 = vadd.f32 %v3054_v13, %v1543_v39 }
 0x1e4   :  { %v1550_v63 = vadd.f32 %v3054_v13, %v1544_v18  ;;  %v1551_v46 = vadd.f32 %v3054_v13, %v1545_v10  ;;  %v1552_v59 = vadd.f32 %v2482_v4, %v1546_v43 }
 0x1e5   :  { %v2476_v6 = vpop.eup %2475  ;;  %v1548_v11 = vadd.f32 %v2482_v4, %v1542_v37  ;;  %v1553_v24 = vpack.c.bf16 %v1547_v40, %v1547_v40  ;;  %v1555_v2 = vpack.c.bf16 %v1549_v49, %v1549_v49  ;;  %v1784_v58 = vadd.f32 %v2482_v4, %v1778_v38 }
 0x1e6   :  { %v1556_v62 = vpack.c.bf16 %v1550_v63, %v1550_v63  ;;  %v1557_v16 = vpack.c.bf16 %v1551_v46, %v1551_v46  ;;  %v1558_v17 = vpack.c.bf16 %v1552_v59, %v1552_v59  ;;  %v1761_v19 = vrot.slane %v2476_v6, 1 }
 0x1e7   :  { %v1554_v47 = vpack.c.bf16 %v1548_v11, %v1548_v11  ;;  %v1582_v48 = vunpack.c.l.b16 %v1553_v24  ;;  %v1584_v51 = vunpack.c.l.b16 %v1555_v2  ;;  %v1762_v54 = vrot.slane %v2476_v6, 2 }
 0x1e8   :  { %v1585_v52 = vunpack.c.l.b16 %v1556_v62  ;;  %v1586_v42 = vunpack.c.l.b16 %v1557_v16  ;;  %v1790_v22 = vpack.c.bf16 %v1784_v58, %v1784_v58  ;;  %v1587_v5 = vunpack.c.l.b16 %v1558_v17 }
 0x1e9   :  { %v1583_v13 = vunpack.c.l.b16 %v1554_v47  ;;  %v1588_v1 = vrot.slane %v1582_v48, 6  ;;  %v1763_v21 = vrot.slane %v2476_v6, 3  ;;  %v1591_v25 = vrot.slane %v1584_v51, 4 }
 0x1ea   :  { %v1764_v14 = vrot.slane %v2476_v6, 4  ;;  %v1765_v41 = vrot.slane %v2476_v6, 5  ;;  %v1593_v31 = vrot.slane %v1585_v52, 3  ;;  %v1773_v44 = vmul.f32 %v1761_v19, %v2999_v9 }
 0x1eb   :  { %v1589_v56 = vrot.slane %v1583_v13, 5  ;;  %v1774_v33 = vmul.f32 %v1762_v54, %v3520_v61  ;;  %v1775_v50 = vmul.f32 %v1763_v21, %v3521_v20  ;;  %v1595_v15 = vrot.slane %v1586_v42, 2 }
 0x1ec   :  { %v1776_v34 = vmul.f32 %v1764_v14, %v3522_v57  ;;  %v1777_v23 = vmul.f32 %v1765_v41, %v3523_v28  ;;  %v1779_v55 = vmul.f32 %v2481_v27, %v1773_v44  ;;  %v1597_v60 = vrot.slane %v1587_v5, 1 }
 0x1ed   :  { %v1590_v12 = vsel %vm48_vm6, %v1589_v56, %v1588_v1  ;;  %v1780_v29 = vmul.f32 %v2481_v27, %v1774_v33  ;;  %v1781_v30 = vmul.f32 %v2481_v27, %v1775_v50  ;;  %v1819_v32 = vunpack.c.l.b16 %v1790_v22 }
 0x1ee   :  { %v1592_v35 = vsel %vm51_vm0, %v1591_v25, %v1590_v12  ;;  %v1782_v9 = vmul.f32 %v2481_v27, %v1776_v34  ;;  %v1783_v26 = vmul.f32 %v2481_v27, %v1777_v23  ;;  %v1785_v53 = vadd.f32 %v2482_v4, %v1779_v55 }
 0x1ef   :  { %v1594_v7 = vsel %vm54_vm1, %v1593_v31, %v1592_v35  ;;  %v1786_v45 = vadd.f32 %v2482_v4, %v1780_v29  ;;  %v1787_v3 = vadd.f32 %v2482_v4, %v1781_v30  ;;  %v1825_v59 = vrot.slane %v1819_v32, 7  ;;  %v2149_v32 = vld [vmem:[%s3489_s4] ss:$0 sm:$0xff] }
 0x1f0   :  { %v1596_v0 = vsel %vm57_vm2, %v1595_v15, %v1594_v7  ;;  %v1788_v36 = vadd.f32 %v2482_v4, %v1782_v9  ;;  %v1789_v39 = vadd.f32 %v2482_v4, %v1783_v26  ;;  %v1791_v10 = vpack.c.bf16 %v1785_v53, %v1785_v53 }
 0x1f1   :  { %v1598_v8 = vsel %vm60_vm3, %v1597_v60, %v1596_v0  ;;  %v1792_v43 = vpack.c.bf16 %v1786_v45, %v1786_v45  ;;  %v1793_v37 = vpack.c.bf16 %v1787_v3, %v1787_v3 }
 0x1f2   :  { %v1599_v18 = vpack.c.b16 %v1598_v8, %v1598_v8  ;;  %v1794_v40 = vpack.c.bf16 %v1788_v36, %v1788_v36  ;;  %v1795_v38 = vpack.c.bf16 %v1789_v39, %v1789_v39  ;;  %v1820_v49 = vunpack.c.l.b16 %v1791_v10 }
 0x1f3   :  { %v1821_v63 = vunpack.c.l.b16 %v1792_v43  ;;  %v1822_v27 = vunpack.c.l.b16 %v1793_v37 }
 0x1f4   :  { %2359 = vmatmul.mubr.bf16.vlgmr.msra.gmra.mxu0 %v1599_v18  ;;  %v1823_v46 = vunpack.c.l.b16 %v1794_v40  ;;  %v1824_v6 = vunpack.c.l.b16 %v1795_v38  ;;  %v1826_v11 = vrot.slane %v1820_v49, 6 }
 0x1f5   :  { %v1828_v24 = vrot.slane %v1821_v63, 5  ;;  %v1830_v58 = vrot.slane %v1822_v27, 4 }
 0x1f6   :  { %v1827_v2 = vsel %vm48_vm6, %v1826_v11, %v1825_v59  ;;  %v1832_v62 = vrot.slane %v1823_v46, 3  ;;  %v1834_v17 = vrot.slane %v1824_v6, 2 }
 0x1f7   :  { %v1829_v4 = vsel %vm51_vm0, %v1828_v24, %v1827_v2  ;;  %vm1965_vm0 = vcmask 95232  }
 0x1f8   :  { %v1831_v16 = vsel %vm54_vm1, %v1830_v58, %v1829_v4 }
 0x1f9   :  { %v1833_v47 = vsel %vm57_vm2, %v1832_v62, %v1831_v16 }
 0x1fa   :  { %v1835_v48 = vsel %vm60_vm3, %v1834_v17, %v1833_v47 }
 0x1fb   :  { %v1836_v51 = vpack.c.b16 %v1835_v48, %v1835_v48 }
 0x1fd   :  { %2379 = vmatmul.mubr.bf16.vlgmr.msra.gmra.mxu1 %v1836_v51 }
 0x20b   :  { %v1939_v53 = vpop.permute.xlu1 %1938 }
 0x20c   :  { %v1947_v7 = vpop.permute.xlu0 %1946 }
 0x20d   :  { %2477 = vrcp.f32 %v1947_v7 }
 0x20f   :  { %v1955_v10 = vpop.permute.xlu1 %1954 }
 0x213   :  { %v1962_v63 = vpop.permute.xlu1 %1961 }
 0x21a   :  { %v398_v52 = vpop.f32.mrf.mxu0  ;;  %v2478_v18 = vpop.eup %2477 }
 0x21c   :  { %v2240_v19 = vpop.f32.mrf.mxu0 }
 0x21e   :  { %v401_v54 = vpop.f32.mrf.mxu0 }
 0x220   :  { %v2241_v13 = vpop.f32.mrf.mxu0 }
 0x228   :  { %v510_v42 = vpop.f32.mrf.mxu1 }
 0x229   :  { %v511_v1 = vadd.f32 %v510_v42, %v398_v52 }
 0x22a   :  { %v2260_v22 = vpop.f32.mrf.mxu1 }
 0x22c   :  { %v513_v5 = vpop.f32.mrf.mxu1 }
 0x22e   :  { %v2261_v21 = vpop.f32.mrf.mxu1 }
 0x23a   :  { %v734_v56 = vpop.f32.mrf.mxu0 }
 0x23b   :  { %v740_v25 = vadd.f32 %v734_v56, %v511_v1 }
 0x23c   :  { %v2280_v14 = vpop.f32.mrf.mxu0 }
 0x23e   :  { %v737_v41 = vpop.f32.mrf.mxu0 }
 0x240   :  { %v2281_v31 = vpop.f32.mrf.mxu0 }
 0x248   :  { %v971_v44 = vpop.f32.mrf.mxu1 }
 0x249   :  { %v977_v61 = vadd.f32 %v971_v44, %v740_v25 }
 0x24a   :  { %v2300_v33 = vpop.f32.mrf.mxu1 }
 0x24c   :  { %v974_v20 = vpop.f32.mrf.mxu1 }
 0x24e   :  { %v2301_v50 = vpop.f32.mrf.mxu1 }
 0x25a   :  { %v1208_v12 = vpop.f32.mrf.mxu0 }
 0x25b   :  { %v1214_v15 = vadd.f32 %v1208_v12, %v977_v61 }
 0x25c   :  { %v2320_v57 = vpop.f32.mrf.mxu0 }
 0x25e   :  { %v1211_v34 = vpop.f32.mrf.mxu0 }
 0x260   :  { %v2321_v28 = vpop.f32.mrf.mxu0 }
 0x268   :  { %v1445_v23 = vpop.f32.mrf.mxu1 }
 0x269   :  { %v1451_v35 = vadd.f32 %v1445_v23, %v1214_v15 }
 0x26a   :  { %v2340_v55 = vpop.f32.mrf.mxu1 }
 0x26c   :  { %v1448_v29 = vpop.f32.mrf.mxu1 }
 0x26e   :  { %v2341_v30 = vpop.f32.mrf.mxu1 }
 0x2b4   :  { %v1683_v60 = vpop.f32.mrf.mxu0 }
 0x2b5   :  { %v1689_v45 = vadd.f32 %v1683_v60, %v1451_v35 }
 0x2b6   :  { %v2360_v9 = vpop.f32.mrf.mxu0 }
 0x2b8   :  { %v1686_v26 = vpop.f32.mrf.mxu0 }
 0x2ba   :  { %v2361_v0 = vpop.f32.mrf.mxu0 }
 0x2bd   :  { %v1920_v3 = vpop.f32.mrf.mxu1 }
 0x2be   :  { %v1926_v8 = vadd.f32 %v1920_v3, %v1689_v45 }
 0x2bf   :  { %v2380_v36 = vpop.f32.mrf.mxu1 }
 0x2c0   :  { %v1934_v39 = vadd.f32 %v2149_v32, %v1926_v8 }
 0x2c1   :  { %v1923_v43 = vpop.f32.mrf.mxu1 }
 0x2c2   :  { %v1941_v37 = vsub.f32 %v1934_v39, %v1939_v53 }
 0x2c3   :  { %v2381_v40 = vpop.f32.mrf.mxu1 }
 0x2c4   :  { %v1950_v38 = vmul.f32 %v2478_v18, %v1941_v37 }
 0x2c6   :  { %v1957_v49 = vmul.f32 %v1955_v10, %v1950_v38 }
 0x2c8   :  { %v1964_v27 = vadd.f32 %v1962_v63, %v1957_v49 }
 0x2ca   :  { %1966 = vst.msk [vmem:[%s3490_s9] sm:$0x3f] %vm1965_vm0, %v1964_v27 }

// kernel: patchtst_forward.7
= control target key start
LH: loop header
LB: loop body
LE: loop exit
PB: predicated region body
PF: predicated region fallthrough
CT: control target
= control target key end

     0   :  { %v8077_v7 = vmov 0.0   ;;  %v8075_v53 = vmov 0   ;;  %vm6591_vm0 = vmmov 0   ;;  %vm895_vm9 = vcmask 64512   ;;  %s8052_s0 = inlined_call_operand.vmem [shape: f32[6,8,128], index: 0, kind: input, shape index: {}]   ;;  %s8053_s3 = inlined_call_operand.vmem [shape: bf16[128,384], index: 3, kind: input, shape index: {}]   ;;  %s8054_s1 = inlined_call_operand.vmem [shape: f32[1,128], index: 1, kind: input, shape index: {}]   ;;  %s8055_s2 = inlined_call_operand.vmem [shape: f32[1,128], index: 2, kind: input, shape index: {}]   ;;  %s8056_s4 = inlined_call_operand.vmem [shape: f32[1,384], index: 4, kind: input, shape index: {}]   ;;  %s8057_s5 = inlined_call_operand.vmem [shape: bf16[128,128], index: 5, kind: input, shape index: {}]   ;;  %s8058_s6 = inlined_call_operand.vmem [shape: f32[1,128], index: 6, kind: input, shape index: {}]   ;;  %s8059_s7 = inlined_call_operand.vmem [shape: f32[1,128], index: 7, kind: input, shape index: {}]   ;;  %s8060_s8 = inlined_call_operand.vmem [shape: f32[1,128], index: 8, kind: input, shape index: {}]   ;;  %s8061_s11 = inlined_call_operand.vmem [shape: bf16[128,512], index: 11, kind: input, shape index: {}]   ;;  %s8062_s9 = inlined_call_operand.vmem [shape: f32[1,128], index: 9, kind: input, shape index: {}]   ;;  %s8063_s10 = inlined_call_operand.vmem [shape: f32[1,128], index: 10, kind: input, shape index: {}]   ;;  %s8064_s13 = inlined_call_operand.vmem [shape: bf16[512,128], index: 13, kind: input, shape index: {}]   ;;  %s8065_s12 = inlined_call_operand.vmem [shape: f32[1,512], index: 12, kind: input, shape index: {}]   ;;  %s8066_s14 = inlined_call_operand.vmem [shape: f32[1,128], index: 14, kind: input, shape index: {}]   ;;  %s8067_s15 = inlined_call_operand.vmem [shape: f32[1,128], index: 15, kind: input, shape index: {}]   ;;  %s8068_s16 = inlined_call_operand.vmem [shape: f32[1,128], index: 16, kind: input, shape index: {}]   ;;  %s8069_s17 = inlined_call_operand.vmem [shape: f32[6,8,128], index: 17, kind: output, shape index: {}]  }
   0x1   :  { %8092 = sst [smem:[#allocation13_spill]] %s8052_s0  ;;  %5956 = vmatprep.subr.bf16.mxu1 %v8077_v7  ;;  %368 = vmatprep.mubr.bf16.mxu0 %v8075_v53 }
   0x2   :  { %8093 = sst [smem:[#allocation14_spill]] %s8053_s3  ;;  %5972 = vmatprep.mubr.msk.bf16.mxu1 %vm6591_vm0, %v8077_v7 }
   0x3   :  { %s8094_s26 = sld [smem:[#allocation13_spill]] }
   0x4   :  { %s8095_s24 = sld [smem:[#allocation14_spill]] }
   0x9   :  { %v57_v0 = vld [vmem:[%s8094_s26] sm:$0xff]  ;;  %v59_v1 = vld [vmem:[%s8094_s26 + $0x10] sm:$0xff]  ;;  %v58_v2 = vld [vmem:[%s8094_s26 + $0x8] sm:$0xff] }
   0xa   :  { %65 = vadd.xlane.f32.xlu0 %v57_v0  ;;  %69 = vadd.xlane.f32.xlu1 %v59_v1  ;;  %v60_v3 = vld [vmem:[%s8094_s26 + $0x18] sm:$0xff]  ;;  %v61_v4 = vld [vmem:[%s8094_s26 + $0x20] sm:$0xff]  ;;  %v62_v5 = vld [vmem:[%s8094_s26 + $0x28] sm:$0xff] }
   0xb   :  { %v6271_v6 = vld [vmem:[%s8095_s24 + $0xac] ss:$12 sps:$4 sm:$0xff]   ;;  %v6273_v8 = vld [vmem:[%s8095_s24 + $0xa8] ss:$12 sps:$4 sm:$0xff]   ;;  %v6274_v9 = vld [vmem:[%s8095_s24 + $0xb0] ss:$12 sps:$4 sm:$0xff]  }
   0xc   :  { %336 = vmatprep.subr.bf16.mxu0 %v6271_v6  ;;  %5957 = vmatpush3.bf16.msra.mxu1 %v6274_v9  ;;  %v6275_v34 = vld [vmem:[%s8095_s24 + $0x94] ss:$12 sps:$4 sm:$0xff]   ;;  %v6277_v35 = vld [vmem:[%s8095_s24 + $0x90] ss:$12 sps:$4 sm:$0xff]   ;;  %v6278_v36 = vld [vmem:[%s8095_s24 + $0x98] ss:$12 sps:$4 sm:$0xff]  }
   0xd   :  { %337 = vmatpush1.bf16.msra.mxu0 %v6273_v8  ;;  %5958 = vmatprep.subr.bf16.mxu1 %v8077_v7  ;;  %v6279_v37 = vld [vmem:[%s8095_s24 + $0x7c] ss:$12 sps:$4 sm:$0xff]   ;;  %v6281_v38 = vld [vmem:[%s8095_s24 + $0x78] ss:$12 sps:$4 sm:$0xff]   ;;  %v6282_v39 = vld [vmem:[%s8095_s24 + $0x80] ss:$12 sps:$4 sm:$0xff]  }
   0xe   :  { %67 = vadd.xlane.f32.xlu0 %v58_v2  ;;  %71 = vadd.xlane.f32.xlu1 %v60_v3  ;;  %v6283_v40 = vld [vmem:[%s8095_s24 + $0x64] ss:$12 sps:$4 sm:$0xff]   ;;  %v6285_v41 = vld [vmem:[%s8095_s24 + $0x60] ss:$12 sps:$4 sm:$0xff]   ;;  %v6286_v42 = vld [vmem:[%s8095_s24 + $0x68] ss:$12 sps:$4 sm:$0xff]  }
   0xf   :  { %338 = vmatprep.subr.bf16.mxu0 %v6275_v34  ;;  %v6287_v43 = vld [vmem:[%s8095_s24 + $0x4c] ss:$12 sps:$4 sm:$0xff]   ;;  %v6289_v44 = vld [vmem:[%s8095_s24 + $0x48] ss:$12 sps:$4 sm:$0xff]   ;;  %v6290_v45 = vld [vmem:[%s8095_s24 + $0x50] ss:$12 sps:$4 sm:$0xff]  }
  0x10   :  { %5959 = vmatpush3.bf16.msra.mxu1 %v6278_v36  ;;  %v6291_v46 = vld [vmem:[%s8095_s24 + $0x34] ss:$12 sps:$4 sm:$0xff]   ;;  %v6293_v47 = vld [vmem:[%s8095_s24 + $0x30] ss:$12 sps:$4 sm:$0xff]   ;;  %v6294_v48 = vld [vmem:[%s8095_s24 + $0x38] ss:$12 sps:$4 sm:$0xff]  }
  0x11   :  { %339 = vmatpush1.bf16.msra.mxu0 %v6277_v35  ;;  %5960 = vmatprep.subr.bf16.mxu1 %v8077_v7  ;;  %v6295_v49 = vld [vmem:[%s8095_s24 + $0x1c] ss:$12 sps:$4 sm:$0xff]   ;;  %v6297_v50 = vld [vmem:[%s8095_s24 + $0x18] ss:$12 sps:$4 sm:$0xff]   ;;  %v6298_v51 = vld [vmem:[%s8095_s24 + $0x20] ss:$12 sps:$4 sm:$0xff]  }
  0x12   :  { %73 = vadd.xlane.f32.xlu0 %v61_v4  ;;  %75 = vadd.xlane.f32.xlu1 %v62_v5  ;;  %v6299_v52 = vld [vmem:[%s8095_s24 + $0x4] ss:$12 sps:$4 sm:$0xff]   ;;  %v6301_v54 = vld [vmem:[%s8095_s24] ss:$12 sps:$4 sm:$0xff]   ;;  %v6302_v55 = vld [vmem:[%s8095_s24 + $0x8] ss:$12 sps:$4 sm:$0xff]  }
  0x13   :  { %340 = vmatprep.subr.bf16.mxu0 %v6279_v37 }
  0x14   :  { %5961 = vmatpush3.bf16.msra.mxu1 %v6282_v39 }
  0x15   :  { %341 = vmatpush1.bf16.msra.mxu0 %v6281_v38  ;;  %5962 = vmatprep.subr.bf16.mxu1 %v8077_v7 }
  0x16   :  { %342 = vmatprep.subr.bf16.mxu0 %v6283_v40 }
  0x18   :  { %5963 = vmatpush3.bf16.msra.mxu1 %v6286_v42 }
  0x19   :  { %343 = vmatpush1.bf16.msra.mxu0 %v6285_v41  ;;  %5964 = vmatprep.subr.bf16.mxu1 %v8077_v7 }
  0x1a   :  { %344 = vmatprep.subr.bf16.mxu0 %v6287_v43 }
  0x1c   :  { %5965 = vmatpush3.bf16.msra.mxu1 %v6290_v45 }
  0x1d   :  { %345 = vmatpush1.bf16.msra.mxu0 %v6289_v44  ;;  %5966 = vmatprep.subr.bf16.mxu1 %v8077_v7  ;;  %v191_v44 = vld [vmem:[%s8056_s4] sm:$0x7] }
  0x1e   :  { %346 = vmatprep.subr.bf16.mxu0 %v6291_v46 }
  0x20   :  { %5967 = vmatpush3.bf16.msra.mxu1 %v6294_v48 }
  0x21   :  { %347 = vmatpush1.bf16.msra.mxu0 %v6293_v47  ;;  %5968 = vmatprep.subr.bf16.mxu1 %v8077_v7 }
  0x22   :  { %348 = vmatprep.subr.bf16.mxu0 %v6295_v49 }
  0x24   :  { %5969 = vmatpush3.bf16.msra.mxu1 %v6298_v51 }
  0x25   :  { %349 = vmatpush1.bf16.msra.mxu0 %v6297_v50  ;;  %5970 = vmatprep.subr.bf16.mxu1 %v8077_v7 }
  0x26   :  { %350 = vmatprep.subr.bf16.mxu0 %v6299_v52 }
  0x28   :  { %5971 = vmatpush3.bf16.msra.mxu1 %v6302_v55 }
  0x29   :  { %351 = vmatpush1.bf16.msra.mxu0 %v6301_v54  ;;  %5999 = vmatprep.subr.mxu1 %v8077_v7 }
  0x2a   :  { %5984 = vmatprep.subr.mxu0 %v8077_v7 }
  0x93   :  { %v66_v10 = vpop.xlane.xlu0 %65  ;;  %v70_v11 = vpop.xlane.xlu1 %69 }
  0x94   :  { %v78_v12 = vmul.f32 0.0078125, %v66_v10  ;;  %v80_v13 = vmul.f32 0.0078125, %v70_v11 }
  0x96   :  { %v6711_v14 = vsub.f32 %v57_v0, %v78_v12  ;;  %v6713_v15 = vsub.f32 %v59_v1, %v80_v13  ;;  %v5636_v13 = vld [vmem:[%s8054_s1] ss:$0 sm:$0xff] }
  0x97   :  { %v68_v16 = vpop.xlane.xlu0 %67  ;;  %v72_v17 = vpop.xlane.xlu1 %71 }
  0x98   :  { %v79_v18 = vmul.f32 0.0078125, %v68_v16  ;;  %v90_v19 = vmul.f32 %v6711_v14, %v6711_v14  ;;  %v81_v20 = vmul.f32 0.0078125, %v72_v17  ;;  %v92_v23 = vmul.f32 %v6713_v15, %v6713_v15 }
  0x9a   :  { %v6717_v21 = vsub.f32 %v58_v2, %v79_v18  ;;  %96 = vadd.xlane.f32.xlu0 %v90_v19  ;;  %v6719_v22 = vsub.f32 %v60_v3, %v81_v20  ;;  %v5637_v20 = vld [vmem:[%s8055_s2] ss:$0 sm:$0xff] }
  0x9b   :  { %v74_v24 = vpop.xlane.xlu0 %73  ;;  %v76_v25 = vpop.xlane.xlu1 %75 }
  0x9c   :  { %v82_v26 = vmul.f32 0.0078125, %v74_v24  ;;  %v91_v27 = vmul.f32 %v6717_v21, %v6717_v21  ;;  %v83_v28 = vmul.f32 0.0078125, %v76_v25  ;;  %v93_v31 = vmul.f32 %v6719_v22, %v6719_v22 }
  0x9e   :  { %v6725_v29 = vsub.f32 %v61_v4, %v82_v26  ;;  %100 = vadd.xlane.f32.xlu0 %v92_v23  ;;  %98 = vadd.xlane.f32.xlu1 %v91_v27  ;;  %v6727_v30 = vsub.f32 %v62_v5, %v83_v28 }
  0xa0   :  { %v94_v32 = vmul.f32 %v6725_v29, %v6725_v29  ;;  %v95_v33 = vmul.f32 %v6727_v30, %v6727_v30 }
  0xa2   :  { %102 = vadd.xlane.f32.xlu1 %v93_v31  ;;  %104 = vadd.xlane.f32.xlu0 %v94_v32 }
  0xa6   :  { %106 = vadd.xlane.f32.xlu1 %v95_v33 }
 0x123   :  { %v97_v56 = vpop.xlane.xlu0 %96 }
 0x124   :  { %v108_v57 = vmul.f32 0.0078125, %v97_v56 }
 0x126   :  { %v114_v58 = vadd.f32 1e-05, %v108_v57 }
 0x127   :  { %v99_v59 = vpop.xlane.xlu1 %98  ;;  %v101_v60 = vpop.xlane.xlu0 %100 }
 0x128   :  { %6391 = vrsqrt.f32 %v114_v58  ;;  %v109_v61 = vmul.f32 0.0078125, %v99_v59  ;;  %v110_v62 = vmul.f32 0.0078125, %v101_v60 }
 0x12a   :  { %v115_v63 = vadd.f32 1e-05, %v109_v61  ;;  %v116_v0 = vadd.f32 1e-05, %v110_v62 }
 0x12b   :  { %v103_v1 = vpop.xlane.xlu1 %102  ;;  %v105_v2 = vpop.xlane.xlu0 %104 }
 0x12c   :  { %6393 = vrsqrt.f32 %v115_v63  ;;  %v111_v3 = vmul.f32 0.0078125, %v103_v1  ;;  %v112_v5 = vmul.f32 0.0078125, %v105_v2 }
 0x12d   :  { %6395 = vrsqrt.f32 %v116_v0 }
 0x12e   :  { %v117_v4 = vadd.f32 1e-05, %v111_v3  ;;  %v118_v9 = vadd.f32 1e-05, %v112_v5 }
 0x12f   :  { %v107_v6 = vpop.xlane.xlu1 %106 }
 0x130   :  { %6397 = vrsqrt.f32 %v117_v4  ;;  %v113_v8 = vmul.f32 0.0078125, %v107_v6 }
 0x132   :  { %v119_v10 = vadd.f32 1e-05, %v113_v8 }
 0x134   :  { %6399 = vrsqrt.f32 %v119_v10 }
 0x135   :  { %v6392_v11 = vpop.eup %6391  ;;  %6401 = vrsqrt.f32 %v118_v9 }
 0x136   :  { %v126_v12 = vmul.f32 %v6392_v11, %v6711_v14 }
 0x138   :  { %v138_v18 = vmul.f32 %v5636_v13, %v126_v12 }
 0x139   :  { %v6394_v16 = vpop.eup %6393 }
 0x13a   :  { %v127_v17 = vmul.f32 %v6394_v16, %v6717_v21  ;;  %v6396_v19 = vpop.eup %6395  ;;  %v150_v25 = vadd.f32 %v5637_v20, %v138_v18 }
 0x13b   :  { %v128_v27 = vmul.f32 %v6396_v19, %v6713_v15 }
 0x13c   :  { %v139_v23 = vmul.f32 %v5636_v13, %v127_v17 }
 0x13d   :  { %v6398_v24 = vpop.eup %6397  ;;  %v140_v21 = vmul.f32 %v5636_v13, %v128_v27 }
 0x13e   :  { %v151_v26 = vadd.f32 %v5637_v20, %v139_v23  ;;  %v129_v14 = vmul.f32 %v6398_v24, %v6719_v22 }
 0x13f   :  { %v152_v36 = vadd.f32 %v5637_v20, %v140_v21 }
 0x140   :  { %v156_v28 = vpack.c.bf16 %v151_v26, %v150_v25  ;;  %v141_v31 = vmul.f32 %v5636_v13, %v129_v14 }
 0x141   :  { %v6400_v32 = vpop.eup %6399 }
 0x142   :  { %369 = vmatmul.mubr.bf16.vlgmr.msra.gmra.mxu0 %v156_v28  ;;  %5973 = vmatmul.mubr.bf16.vlgmr.msra.gmra.mxu1 %v156_v28  ;;  %v6402_v33 = vpop.eup %6401  ;;  %v153_v34 = vadd.f32 %v5637_v20, %v141_v31  ;;  %v131_v35 = vmul.f32 %v6400_v32, %v6727_v30 }
 0x143   :  { %378 = vmatprep.mubr.bf16.mxu0 %v8075_v53  ;;  %5976 = vmatprep.mubr.msk.bf16.mxu1 %vm6591_vm0, %v8077_v7  ;;  %v130_v15 = vmul.f32 %v6402_v33, %v6725_v29  ;;  %v193_v29 = vlaneseq }
 0x144   :  { %v157_v37 = vpack.c.bf16 %v153_v34, %v152_v36  ;;  %v143_v22 = vmul.f32 %v5636_v13, %v131_v35 }
 0x145   :  { %v142_v38 = vmul.f32 %v5636_v13, %v130_v15  ;;  %v6831_v30 = vshrl.u32 %v193_v29, 7  ;;  %v457_v42 = vand.u32 127, %v193_v29 }
 0x146   :  { %v155_v39 = vadd.f32 %v5637_v20, %v143_v22 }
 0x147   :  { %v154_v40 = vadd.f32 %v5637_v20, %v142_v38  ;;  %8096 = vst [vmem:[#allocation2_spill] sm:$0xff] %v6831_v30  ;;  %v8073_v43 = vsub.s32 2, %v6831_v30  ;;  %vm2353_vm1 = vcmp.ge.s32.totalorder %v457_v42, 64  ;;  %vm2354_vm2 = vcmp.lt.s32.totalorder %v457_v42, 96 }
 0x148   :  { %v8072_v45 = vsub.s32 1, %v6831_v30  ;;  %vm459_vm3 = vcmp.lt.s32.totalorder %v457_v42, 32  ;;  %vm2355_vm4 = vmand %vm2353_vm1, %vm2354_vm2  ;;  %vm3306_vm5 = vcmp.ge.s32.totalorder %v457_v42, 96  ;;  %v8074_v48 = vsub.s32 0, %v6831_v30 }
 0x149   :  { %v158_v41 = vpack.c.bf16 %v155_v39, %v154_v40  ;;  %v6840_v46 = vrot.slane %v191_v44, %v8073_v43  ;;  %v6848_v51 = vsel %vm459_vm3, 1.0, %v8077_v7  ;;  %v6851_v52 = vsel %vm2355_vm4, 1.0, %v8077_v7 }
 0x14a   :  { %379 = vmatmul.mubr.bf16.gmra.mxu0 %v157_v37  ;;  %5977 = vmatmul.mubr.bf16.gmra.mxu1 %v157_v37  ;;  %v6844_v47 = vrot.slane %v191_v44, %v8072_v45  ;;  %v6857_v55 = vsel %vm3306_vm5, 1.0, %v8077_v7  ;;  %v6872_v61 = vrot.slane %v191_v44, %v8074_v48  ;;  %vm968_vm6 = vcmp.ge.s32.totalorder %v457_v42, 32 }
 0x14b   :  { %388 = vmatprep.mubr.bf16.mxu0 %v8075_v53  ;;  %5980 = vmatprep.mubr.msk.bf16.mxu1 %vm6591_vm0, %v8077_v7  ;;  %vm969_vm7 = vcmp.lt.s32.totalorder %v457_v42, 64 }
 0x14c   :  { %vm970_vm8 = vmand %vm968_vm6, %vm969_vm7 }
 0x14d   :  { %v6915_v23 = vsel %vm970_vm8, 1.0, %v8077_v7 }
 0x152   :  { %389 = vmatmul.mubr.bf16.gmra.mxu0 %v158_v41  ;;  %5981 = vmatmul.mubr.bf16.gmra.mxu1 %v158_v41 }
 0x153   :  { %5986 = vmatprep.mubr.msk.f32.mxu0 %vm6591_vm0, %v8077_v7  ;;  %6001 = vmatprep.mubr.msk.f32.mxu1 %vm6591_vm0, %v8077_v7 }
 0x202   :  { %v370_v49 = vpop.f32.mrf.mxu0  ;;  %v433_v50 = vpop.f32.mrf.mxu1 }
 0x203   :  { %v6854_v54 = vadd.f32 %v433_v50, %v6840_v46  ;;  %v6903_v11 = vadd.f32 %v370_v49, %v6872_v61 }
 0x204   :  { %v372_v56 = vpop.f32.mrf.mxu0  ;;  %v5974_v57 = vpop.f32.mrf.mxu1 }
 0x205   :  { %v6860_v58 = vadd.f32 %v372_v56, %v6844_v47  ;;  %v6864_v59 = vmul.f32 %v6848_v51, %v6854_v54  ;;  %v6868_v60 = vmul.f32 %v6851_v52, %v6854_v54  ;;  %v6876_v0 = vmul.f32 %v6857_v55, %v6854_v54 }
 0x206   :  { %v374_v62 = vpop.f32.mrf.mxu0  ;;  %v436_v63 = vpop.f32.mrf.mxu1 }
 0x207   :  { %v6879_v1 = vadd.f32 %v436_v63, %v6840_v46  ;;  %v463_v2 = vmul.f32 %v6848_v51, %v6860_v58  ;;  %v6885_v5 = vmul.f32 %v6851_v52, %v6860_v58  ;;  %v6889_v6 = vmul.f32 %v6857_v55, %v6860_v58 }
 0x208   :  { %v376_v3 = vpop.f32.mrf.mxu0  ;;  %v5975_v4 = vpop.f32.mrf.mxu1  ;;  %v6937_v28 = vadd.f32 %v374_v62, %v6872_v61 }
 0x209   :  { %v6892_v8 = vadd.f32 %v376_v3, %v6844_v47  ;;  %5985 = vmatpush3.xpose.msra.mxu0 %v463_v2  ;;  %v6896_v9 = vmul.f32 %v6848_v51, %v6879_v1  ;;  %v6900_v10 = vmul.f32 %v6851_v52, %v6879_v1  ;;  %v6908_v16 = vmul.f32 %v6857_v55, %v6879_v1 }
 0x20a   :  { %v380_v12 = vpop.f32.mrf.mxu0  ;;  %v441_v13 = vpop.f32.mrf.mxu1  ;;  %5989 = vmatprep.subr.mxu0 %v8077_v7 }
 0x20b   :  { %8097 = vst [vmem:[#allocation3_spill] sm:$0xff] %v6908_v16  ;;  %v442_v17 = vadd.f32 %v441_v13, %v6840_v46  ;;  %v464_v18 = vmul.f32 %v6848_v51, %v6892_v8  ;;  %v6919_v24 = vmul.f32 %v6851_v52, %v6892_v8  ;;  %v6923_v25 = vmul.f32 %v6857_v55, %v6892_v8 }
 0x20c   :  { %v382_v19 = vpop.f32.mrf.mxu0  ;;  %v5978_v20 = vpop.f32.mrf.mxu1  ;;  %5987 = vmatmul.mubr.f32.vlgmr.msra.gmra.mxu0 %v6903_v11  ;;  %v6970_v41 = vadd.f32 %v380_v12, %v6872_v61 }
 0x20d   :  { %v6926_v26 = vadd.f32 %v382_v19, %v6844_v47  ;;  %5990 = vmatpush3.xpose.msra.mxu0 %v464_v18  ;;  %5991 = vmatprep.mubr.msk.f32.mxu0 %vm6591_vm0, %v8077_v7  ;;  %v6931_v27 = vmul.f32 %v6915_v23, %v442_v17  ;;  %v6934_v14 = vmul.f32 %v6848_v51, %v442_v17 }
 0x20e   :  { %v384_v31 = vpop.f32.mrf.mxu0  ;;  %v444_v32 = vpop.f32.mrf.mxu1  ;;  %5994 = vmatprep.subr.mxu0 %v8077_v7  ;;  %v6941_v21 = vmul.f32 %v6851_v52, %v442_v17  ;;  %v6944_v33 = vmul.f32 %v6857_v55, %v442_v17 }
 0x20f   :  { %v445_v34 = vadd.f32 %v444_v32, %v6840_v46  ;;  %v465_v35 = vmul.f32 %v6848_v51, %v6926_v26  ;;  %v6952_v37 = vmul.f32 %v6851_v52, %v6926_v26  ;;  %v6956_v22 = vmul.f32 %v6857_v55, %v6926_v26 }
 0x210   :  { %8098 = vst [vmem:[#allocation4_spill] sm:$0xff] %v6944_v33  ;;  %v386_v36 = vpop.f32.mrf.mxu0  ;;  %v5979_v15 = vpop.f32.mrf.mxu1  ;;  %5992 = vmatmul.mubr.f32.vlgmr.msra.gmra.mxu0 %v6937_v28  ;;  %v7001_v13 = vadd.f32 %v384_v31, %v6872_v61 }
 0x211   :  { %v6959_v38 = vadd.f32 %v386_v36, %v6844_v47  ;;  %5995 = vmatpush3.xpose.msra.mxu0 %v465_v35  ;;  %5996 = vmatprep.mubr.msk.f32.mxu0 %vm6591_vm0, %v8077_v7  ;;  %v6964_v39 = vmul.f32 %v6915_v23, %v445_v34  ;;  %v6967_v40 = vmul.f32 %v6848_v51, %v445_v34 }
 0x212   :  { %v390_v29 = vpop.f32.mrf.mxu0  ;;  %v449_v42 = vpop.f32.mrf.mxu1  ;;  %6004 = vmatprep.subr.mxu0 %v8077_v7  ;;  %v6974_v44 = vmul.f32 %v6851_v52, %v445_v34  ;;  %v6977_v49 = vmul.f32 %v6857_v55, %v445_v34 }
 0x213   :  { %v450_v50 = vadd.f32 %v449_v42, %v6840_v46  ;;  %v466_v56 = vmul.f32 %v6848_v51, %v6959_v38  ;;  %v6985_v63 = vmul.f32 %v6851_v52, %v6959_v38  ;;  %v6989_v2 = vmul.f32 %v6857_v55, %v6959_v38 }
 0x214   :  { %8099 = vst [vmem:[#allocation5_spill] sm:$0xff] %v6977_v49  ;;  %v392_v57 = vpop.f32.mrf.mxu0  ;;  %v5982_v62 = vpop.f32.mrf.mxu1  ;;  %5997 = vmatmul.mubr.f32.vlgmr.msra.gmra.mxu0 %v6970_v41 }
 0x215   :  { %v393_v3 = vadd.f32 %v392_v57, %v6844_v47  ;;  %6000 = vmatpush3.xpose.msra.mxu1 %v466_v56  ;;  %6006 = vmatprep.mubr.msk.f32.mxu0 %vm6591_vm0, %v8077_v7  ;;  %v6995_v4 = vmul.f32 %v6915_v23, %v450_v50  ;;  %v6998_v12 = vmul.f32 %v6848_v51, %v450_v50 }
 0x216   :  { %v394_v17 = vpop.f32.mrf.mxu0  ;;  %v452_v18 = vpop.f32.mrf.mxu1  ;;  %6009 = vmatprep.subr.mxu1 %v8077_v7  ;;  %v7005_v19 = vmul.f32 %v6851_v52, %v450_v50  ;;  %v7008_v20 = vmul.f32 %v6857_v55, %v450_v50  ;;  %v7029_v56 = vadd.f32 %v390_v29, %v6872_v61 }
 0x217   :  { %v453_v32 = vadd.f32 %v452_v18, %v6840_v46  ;;  %v467_v34 = vmul.f32 %v6848_v51, %v393_v3  ;;  %v7014_v31 = vmul.f32 %v6851_v52, %v393_v3  ;;  %v7017_v15 = vmul.f32 %v6857_v55, %v393_v3 }
 0x218   :  { %8100 = vst [vmem:[#allocation6_spill] sm:$0xff] %v7008_v20  ;;  %v396_v35 = vpop.f32.mrf.mxu0  ;;  %v5983_v36 = vpop.f32.mrf.mxu1  ;;  %6002 = vmatmul.mubr.f32.vlgmr.msra.gmra.mxu1 %v7001_v13  ;;  %v973_v18 = vmul.f32 %v6915_v23, %v6860_v58  ;;  %v7049_v29 = vadd.f32 %v394_v17, %v6872_v61  ;;  %v977_v58 = vmul.f32 %v6915_v23, %v393_v3 }
 0x219   :  { %v397_v42 = vadd.f32 %v396_v35, %v6844_v47  ;;  %6005 = vmatpush3.xpose.msra.mxu0 %v467_v34  ;;  %6011 = vmatprep.mubr.msk.f32.mxu1 %vm6591_vm0, %v8077_v7  ;;  %v7023_v46 = vmul.f32 %v6915_v23, %v453_v32  ;;  %v7026_v50 = vmul.f32 %v6848_v51, %v453_v32 }
 0x21a   :  { %6014 = vmatprep.subr.mxu0 %v8077_v7  ;;  %v7033_v57 = vmul.f32 %v6851_v52, %v453_v32  ;;  %v7036_v47 = vmul.f32 %v6857_v55, %v453_v32 }
 0x21b   :  { %v468_v62 = vmul.f32 %v6848_v51, %v397_v42  ;;  %v7042_v34 = vmul.f32 %v6851_v52, %v397_v42  ;;  %v7045_v35 = vmul.f32 %v6857_v55, %v397_v42  ;;  %v974_v51 = vmul.f32 %v6915_v23, %v6892_v8 }
 0x21c   :  { %8101 = vst [vmem:[#allocation7_spill] sm:$0xff] %v7036_v47  ;;  %6007 = vmatmul.mubr.f32.vlgmr.msra.gmra.mxu0 %v7029_v56  ;;  %v975_v52 = vmul.f32 %v6915_v23, %v6926_v26  ;;  %v976_v55 = vmul.f32 %v6915_v23, %v6959_v38  ;;  %v978_v61 = vmul.f32 %v6915_v23, %v397_v42 }
 0x21d   :  { %6010 = vmatpush3.xpose.msra.mxu1 %v468_v62  ;;  %6015 = vmatpush3.xpose.msra.mxu0 %v973_v18  ;;  %v1471_v8 = vmul.f32 %v6915_v23, %v6854_v54  ;;  %v1472_v26 = vmul.f32 %v6915_v23, %v6879_v1 }
 0x21e   :  { %6016 = vmatprep.mubr.msk.f32.mxu0 %vm6591_vm0, %v8077_v7  ;;  %6019 = vmatprep.subr.mxu1 %v8077_v7 }
 0x21f   :  { %6024 = vmatprep.subr.mxu0 %v8077_v7 }
 0x220   :  { %6012 = vmatmul.mubr.f32.vlgmr.msra.gmra.mxu1 %v7049_v29  ;;  %6017 = vmatmul.mubr.f32.vlgmr.msra.gmra.mxu0 %v6903_v11 }
 0x221   :  { %6020 = vmatpush3.xpose.msra.mxu1 %v974_v51  ;;  %6025 = vmatpush3.xpose.msra.mxu0 %v975_v52 }
 0x222   :  { %6021 = vmatprep.mubr.msk.f32.mxu1 %vm6591_vm0, %v8077_v7  ;;  %6026 = vmatprep.mubr.msk.f32.mxu0 %vm6591_vm0, %v8077_v7 }
 0x223   :  { %6029 = vmatprep.subr.mxu1 %v8077_v7  ;;  %6034 = vmatprep.subr.mxu0 %v8077_v7 }
 0x224   :  { %6022 = vmatmul.mubr.f32.vlgmr.msra.gmra.mxu1 %v6937_v28  ;;  %6027 = vmatmul.mubr.f32.vlgmr.msra.gmra.mxu0 %v6970_v41 }
 0x225   :  { %6030 = vmatpush3.xpose.msra.mxu1 %v976_v55  ;;  %6035 = vmatpush3.xpose.msra.mxu0 %v977_v58 }
 0x226   :  { %6031 = vmatprep.mubr.msk.f32.mxu1 %vm6591_vm0, %v8077_v7  ;;  %6036 = vmatprep.mubr.msk.f32.mxu0 %vm6591_vm0, %v8077_v7 }
 0x227   :  { %6039 = vmatprep.subr.mxu1 %v8077_v7  ;;  %6044 = vmatprep.subr.mxu0 %v8077_v7 }
 0x228   :  { %6032 = vmatmul.mubr.f32.vlgmr.msra.gmra.mxu1 %v7001_v13  ;;  %6037 = vmatmul.mubr.f32.vlgmr.msra.gmra.mxu0 %v7029_v56 }
 0x229   :  { %6040 = vmatpush3.xpose.msra.mxu1 %v978_v61  ;;  %6045 = vmatpush3.msra.mxu0 %v1471_v8 }
 0x22a   :  { %6041 = vmatprep.mubr.msk.f32.mxu1 %vm6591_vm0, %v8077_v7  ;;  %6049 = vmatprep.subr.mxu1 %v8077_v7 }
 0x22b   :  { %6046 = vmatprep.mubr.msk.f32.mxu0 %vm6591_vm0, %v8077_v7  ;;  %6054 = vmatprep.subr.mxu0 %v8077_v7 }
 0x22c   :  { %6042 = vmatmul.mubr.f32.vlgmr.msra.gmra.mxu1 %v7049_v29 }
 0x22d   :  { %6050 = vmatpush3.msra.mxu1 %v1472_v26  ;;  %6051 = vmatprep.mubr.msk.f32.mxu1 %vm6591_vm0, %v8077_v7 }
 0x22e   :  { %6059 = vmatprep.subr.mxu1 %v8077_v7 }
 0x2cc   :  { %v535_v54 = vpop.f32.mrf.mxu0 }
 0x2cd   :  { %v889_v7 = vmul.f32 0.17677669, %v535_v54 }
 0x2ce   :  { %v5988_v38 = vpop.f32.mrf.mxu0 }
 0x2d0   :  { %v605_v3 = vpop.f32.mrf.mxu0 }
 0x2d1   :  { %v890_v30 = vmul.f32 0.17677669, %v605_v3 }
 0x2d2   :  { %v5993_v17 = vpop.f32.mrf.mxu0 }
 0x2d3   :  { %v899_v54 = vsel %vm895_vm9, %v890_v30, -inf }
 0x2d4   :  { %v675_v32 = vpop.f32.mrf.mxu0 }
 0x2d5   :  { %v891_v47 = vmul.f32 0.17677669, %v675_v32 }
 0x2d6   :  { %v5998_v36 = vpop.f32.mrf.mxu0 }
 0x2d8   :  { %v745_v1 = vpop.f32.mrf.mxu1 }
 0x2da   :  { %v6003_v23 = vpop.f32.mrf.mxu1 }
 0x2dc   :  { %v815_v42 = vpop.f32.mrf.mxu0 }
 0x2de   :  { %v6008_v62 = vpop.f32.mrf.mxu0 }
 0x2e0   :  { %v885_v18 = vpop.f32.mrf.mxu1  ;;  %v1045_v51 = vpop.f32.mrf.mxu0 }
 0x2e1   :  { %v1399_v52 = vmul.f32 0.17677669, %v1045_v51 }
 0x2e2   :  { %v6013_v55 = vpop.f32.mrf.mxu1  ;;  %v6018_v58 = vpop.f32.mrf.mxu0 }
 0x2e3   :  { %v1405_v61 = vsel %vm895_vm9, %v1399_v52, -inf }
 0x2e4   :  { %v1115_v8 = vpop.f32.mrf.mxu1  ;;  %1406 = vmax.xlane.f32.xlu0 %v1405_v61  ;;  %v1185_v26 = vpop.f32.mrf.mxu0 }
 0x2e5   :  { %v1400_v38 = vmul.f32 0.17677669, %v1115_v8  ;;  %v1401_v45 = vmul.f32 0.17677669, %v1185_v26 }
 0x2e6   :  { %v6023_v17 = vpop.f32.mrf.mxu1  ;;  %v6028_v43 = vpop.f32.mrf.mxu0 }
 0x2e7   :  { %v1408_v36 = vsel %vm895_vm9, %v1400_v38, -inf  ;;  %v1411_v23 = vsel %vm895_vm9, %v1401_v45, -inf }
 0x2e8   :  { %1409 = vmax.xlane.f32.xlu1 %v1408_v36  ;;  %v1255_v62 = vpop.f32.mrf.mxu1  ;;  %1412 = vmax.xlane.f32.xlu0 %v1411_v23  ;;  %v1325_v51 = vpop.f32.mrf.mxu0  ;;  %v896_v23 = vsel %vm895_vm9, %v889_v7, -inf }
 0x2e9   :  { %v1402_v55 = vmul.f32 0.17677669, %v1255_v62  ;;  %v1403_v58 = vmul.f32 0.17677669, %v1325_v51  ;;  %v902_v62 = vsel %vm895_vm9, %v891_v47, -inf }
 0x2ea   :  { %v6033_v48 = vpop.f32.mrf.mxu1  ;;  %v6038_v53 = vpop.f32.mrf.mxu0  ;;  %v7104_v51 = vmul.f32 0.17677669, %v885_v18 }
 0x2eb   :  { %v1414_v61 = vsel %vm895_vm9, %v1402_v55, -inf  ;;  %v1417_v8 = vsel %vm895_vm9, %v1403_v58, -inf  ;;  %v892_v48 = vmul.f32 0.17677669, %v745_v1  ;;  %v893_v53 = vmul.f32 0.17677669, %v815_v42 }
 0x2ec   :  { %1415 = vmax.xlane.f32.xlu1 %v1414_v61  ;;  %v1395_v26 = vpop.f32.mrf.mxu1  ;;  %1418 = vmax.xlane.f32.xlu0 %v1417_v8  ;;  %v911_v32 = vsel %vm895_vm9, %v7104_v51, -inf }
 0x2ed   :  { %v1404_v43 = vmul.f32 0.17677669, %v1395_v26  ;;  %v905_v61 = vsel %vm895_vm9, %v892_v48, -inf  ;;  %v908_v3 = vsel %vm895_vm9, %v893_v53, -inf }
 0x2ee   :  { %v6043_v17 = vpop.f32.mrf.mxu1 }
 0x2ef   :  { %v1420_v36 = vsel %vm895_vm9, %v1404_v43, -inf }
 0x2f0   :  { %1421 = vmax.xlane.f32.xlu1 %v1420_v36  ;;  %897 = vmax.xlane.f32.xlu0 %v896_v23 }
 0x2f4   :  { %900 = vmax.xlane.f32.xlu1 %v899_v54  ;;  %903 = vmax.xlane.f32.xlu0 %v902_v62 }
 0x2f8   :  { %906 = vmax.xlane.f32.xlu1 %v905_v61  ;;  %909 = vmax.xlane.f32.xlu0 %v908_v3 }
 0x2fc   :  { %912 = vmax.xlane.f32.xlu1 %v911_v32 }
 0x36d   :  { %v1407_v1 = vpop.xlane.xlu0 %1406 }
 0x36e   :  { %v1423_v42 = vsub.f32 %v1399_v52, %v1407_v1 }
 0x370   :  { %v1429_v8 = vmul.f32 1.442695, %v1423_v42 }
 0x371   :  { %v1410_v26 = vpop.xlane.xlu1 %1409  ;;  %v1413_v17 = vpop.xlane.xlu0 %1412 }
 0x372   :  { %6403 = vpow2.f32 %v1429_v8  ;;  %v1424_v36 = vsub.f32 %v1400_v38, %v1410_v26  ;;  %v1425_v23 = vsub.f32 %v1401_v45, %v1413_v17 }
 0x374   :  { %v1431_v18 = vmul.f32 1.442695, %v1424_v36  ;;  %v1433_v54 = vmul.f32 1.442695, %v1425_v23 }
 0x375   :  { %v1416_v62 = vpop.xlane.xlu1 %1415  ;;  %v1419_v20 = vpop.xlane.xlu0 %1418 }
 0x376   :  { %6405 = vpow2.f32 %v1431_v18  ;;  %v1426_v49 = vsub.f32 %v1402_v55, %v1416_v62  ;;  %v1427_v61 = vsub.f32 %v1403_v58, %v1419_v20 }
 0x377   :  { %6407 = vpow2.f32 %v1433_v54 }
 0x378   :  { %v1435_v3 = vmul.f32 1.442695, %v1426_v49  ;;  %v1437_v33 = vmul.f32 1.442695, %v1427_v61 }
 0x379   :  { %v1422_v16 = vpop.xlane.xlu1 %1421  ;;  %v898_v32 = vpop.xlane.xlu0 %897 }
 0x37a   :  { %6409 = vpow2.f32 %v1435_v3  ;;  %v1428_v52 = vsub.f32 %v1404_v43, %v1422_v16  ;;  %v914_v1 = vsub.f32 %v889_v7, %v898_v32 }
 0x37b   :  { %6411 = vpow2.f32 %v1437_v33 }
 0x37c   :  { %v1439_v42 = vmul.f32 1.442695, %v1428_v52  ;;  %v920_v8 = vmul.f32 1.442695, %v914_v1 }
 0x37d   :  { %v901_v38 = vpop.xlane.xlu1 %900  ;;  %v904_v45 = vpop.xlane.xlu0 %903 }
 0x37e   :  { %6413 = vpow2.f32 %v1439_v42  ;;  %v915_v26 = vsub.f32 %v890_v30, %v901_v38  ;;  %v916_v17 = vsub.f32 %v891_v47, %v904_v45 }
 0x37f   :  { %v7110_v36 = vpop.eup %6403  ;;  %6415 = vpow2.f32 %v920_v8 }
 0x380   :  { %v922_v20 = vmul.f32 1.442695, %v915_v26  ;;  %v924_v55 = vmul.f32 1.442695, %v916_v17  ;;  %v1441_v49 = vsel %vm895_vm9, %v7110_v36, 0.0 }
 0x381   :  { %v907_v58 = vpop.xlane.xlu1 %906  ;;  %1442 = vadd.xlane.f32.xlu0 %v1441_v49  ;;  %v910_v16 = vpop.xlane.xlu0 %909 }
 0x382   :  { %6417 = vpow2.f32 %v922_v20  ;;  %v917_v7 = vsub.f32 %v892_v48, %v907_v58  ;;  %v918_v33 = vsub.f32 %v893_v53, %v910_v16 }
 0x383   :  { %v7114_v43 = vpop.eup %6405  ;;  %6419 = vpow2.f32 %v924_v55 }
 0x384   :  { %v7116_v23 = vpop.eup %6407  ;;  %v926_v30 = vmul.f32 1.442695, %v917_v7  ;;  %v928_v47 = vmul.f32 1.442695, %v918_v33  ;;  %v1444_v18 = vsel %vm895_vm9, %v7114_v43, 0.0 }
 0x385   :  { %1445 = vadd.xlane.f32.xlu1 %v1444_v18  ;;  %v913_v54 = vpop.xlane.xlu1 %912  ;;  %v1447_v62 = vsel %vm895_vm9, %v7116_v23, 0.0 }
 0x386   :  { %6421 = vpow2.f32 %v926_v30  ;;  %v919_v61 = vsub.f32 %v7104_v51, %v913_v54  ;;  %1448 = vadd.xlane.f32.xlu0 %v1447_v62 }
 0x387   :  { %v7123_v48 = vpop.eup %6409  ;;  %6423 = vpow2.f32 %v928_v47 }
 0x388   :  { %v7125_v53 = vpop.eup %6411  ;;  %v930_v3 = vmul.f32 1.442695, %v919_v61  ;;  %v1450_v32 = vsel %vm895_vm9, %v7123_v48, 0.0 }
 0x389   :  { %1451 = vadd.xlane.f32.xlu1 %v1450_v32  ;;  %v1453_v52 = vsel %vm895_vm9, %v7125_v53, 0.0 }
 0x38a   :  { %6425 = vpow2.f32 %v930_v3  ;;  %1454 = vadd.xlane.f32.xlu0 %v1453_v52 }
 0x38b   :  { %v7131_v1 = vpop.eup %6413 }
 0x38c   :  { %v7133_v42 = vpop.eup %6415  ;;  %v1456_v51 = vsel %vm895_vm9, %v7131_v1, 0.0 }
 0x38d   :  { %1457 = vadd.xlane.f32.xlu1 %v1456_v51  ;;  %v932_v8 = vsel %vm895_vm9, %v7133_v42, 0.0 }
 0x38e   :  { %933 = vadd.xlane.f32.xlu0 %v932_v8 }
 0x38f   :  { %v7139_v38 = vpop.eup %6417 }
 0x390   :  { %v7141_v45 = vpop.eup %6419  ;;  %v935_v26 = vsel %vm895_vm9, %v7139_v38, 0.0 }
 0x391   :  { %936 = vadd.xlane.f32.xlu1 %v935_v26  ;;  %v938_v17 = vsel %vm895_vm9, %v7141_v45, 0.0  ;;  %v8102_v26 = vmov 0.0  }
 0x392   :  { %939 = vadd.xlane.f32.xlu0 %v938_v17 }
 0x393   :  { %v7147_v20 = vpop.eup %6421 }
 0x394   :  { %v7149_v55 = vpop.eup %6423  ;;  %v941_v49 = vsel %vm895_vm9, %v7147_v20, 0.0 }
 0x395   :  { %942 = vadd.xlane.f32.xlu1 %v941_v49  ;;  %v944_v58 = vsel %vm895_vm9, %v7149_v55, 0.0 }
 0x396   :  { %945 = vadd.xlane.f32.xlu0 %v944_v58 }
 0x397   :  { %v7155_v16 = vpop.eup %6425 }
 0x398   :  { %v947_v7 = vsel %vm895_vm9, %v7155_v16, 0.0 }
 0x399   :  { %948 = vadd.xlane.f32.xlu1 %v947_v7 }
 0x40a   :  { %v1443_v33 = vpop.xlane.xlu0 %1442 }
 0x40b   :  { %6427 = vrcp.f32 %v1443_v33 }
 0x40e   :  { %v1446_v30 = vpop.xlane.xlu1 %1445 }
 0x40f   :  { %6429 = vrcp.f32 %v1446_v30  ;;  %v1449_v47 = vpop.xlane.xlu0 %1448 }
 0x410   :  { %6431 = vrcp.f32 %v1449_v47 }
 0x412   :  { %v1452_v18 = vpop.xlane.xlu1 %1451 }
 0x413   :  { %6433 = vrcp.f32 %v1452_v18  ;;  %v1455_v54 = vpop.xlane.xlu0 %1454 }
 0x414   :  { %6435 = vrcp.f32 %v1455_v54 }
 0x416   :  { %v1458_v62 = vpop.xlane.xlu1 %1457 }
 0x417   :  { %6437 = vrcp.f32 %v1458_v62  ;;  %v934_v61 = vpop.xlane.xlu0 %933 }
 0x418   :  { %v6428_v3 = vpop.eup %6427  ;;  %6439 = vrcp.f32 %v934_v61 }
 0x419   :  { %v1465_v32 = vmul.f32 %v6428_v3, %v7110_v36 }
 0x41a   :  { %v937_v52 = vpop.xlane.xlu1 %936 }
 0x41b   :  { %6441 = vrcp.f32 %v937_v52  ;;  %v940_v51 = vpop.xlane.xlu0 %939  ;;  %6047 = vmatmul.mubr.msk.f32.vlgmr.msra.gmra.mxu0 %vm895_vm9, %v1465_v32 }
 0x41c   :  { %v6430_v8 = vpop.eup %6429  ;;  %6443 = vrcp.f32 %v940_v51  ;;  %6055 = vmatpush3.msra.mxu0 %v6931_v27  ;;  %6056 = vmatprep.mubr.msk.f32.mxu0 %vm6591_vm0, %v8102_v26 }
 0x41d   :  { %v6432_v17 = vpop.eup %6431  ;;  %6064 = vmatprep.subr.mxu0 %v8102_v26  ;;  %v1466_v49 = vmul.f32 %v6430_v8, %v7114_v43 }
 0x41e   :  { %v943_v58 = vpop.xlane.xlu1 %942  ;;  %v1467_v36 = vmul.f32 %v6432_v17, %v7116_v23 }
 0x41f   :  { %6445 = vrcp.f32 %v943_v58  ;;  %v946_v7 = vpop.xlane.xlu0 %945  ;;  %6052 = vmatmul.mubr.msk.f32.vlgmr.msra.gmra.mxu1 %vm895_vm9, %v1466_v49 }
 0x420   :  { %v6434_v33 = vpop.eup %6433  ;;  %6447 = vrcp.f32 %v946_v7  ;;  %6057 = vmatmul.mubr.msk.f32.vlgmr.msra.gmra.mxu0 %vm895_vm9, %v1467_v36  ;;  %6060 = vmatpush3.msra.mxu1 %v6964_v39 }
 0x421   :  { %v6436_v27 = vpop.eup %6435  ;;  %6065 = vmatpush3.msra.mxu0 %v6995_v4  ;;  %6061 = vmatprep.mubr.msk.f32.mxu1 %vm6591_vm0, %v8102_v26  ;;  %v1468_v43 = vmul.f32 %v6434_v33, %v7123_v48 }
 0x422   :  { %6069 = vmatprep.subr.mxu1 %v8102_v26  ;;  %v949_v23 = vpop.xlane.xlu1 %948  ;;  %6066 = vmatprep.mubr.msk.f32.mxu0 %vm6591_vm0, %v8102_v26  ;;  %v1469_v30 = vmul.f32 %v6436_v27, %v7125_v53 }
 0x423   :  { %6449 = vrcp.f32 %v949_v23  ;;  %6074 = vmatprep.subr.mxu0 %v8102_v26  ;;  %6062 = vmatmul.mubr.msk.f32.vlgmr.msra.gmra.mxu1 %vm895_vm9, %v1468_v43 }
 0x424   :  { %v6438_v39 = vpop.eup %6437  ;;  %6067 = vmatmul.mubr.msk.f32.vlgmr.msra.gmra.mxu0 %vm895_vm9, %v1469_v30  ;;  %6070 = vmatpush3.msra.mxu1 %v7023_v46 }
 0x425   :  { %v6440_v4 = vpop.eup %6439  ;;  %6075 = vmatpush3.msra.mxu0 %v6864_v59  ;;  %6071 = vmatprep.mubr.msk.f32.mxu1 %vm6591_vm0, %v8102_v26  ;;  %v1470_v48 = vmul.f32 %v6438_v39, %v7131_v1 }
 0x426   :  { %6076 = vmatprep.mubr.msk.f32.mxu0 %vm6591_vm0, %v8102_v26  ;;  %6079 = vmatprep.subr.mxu1 %v8102_v26  ;;  %v956_v53 = vmul.f32 %v6440_v4, %v7133_v42 }
 0x427   :  { %6084 = vmatprep.subr.mxu0 %v8102_v26  ;;  %6072 = vmatmul.mubr.msk.f32.vlgmr.msra.gmra.mxu1 %vm895_vm9, %v1470_v48 }
 0x428   :  { %v6442_v46 = vpop.eup %6441  ;;  %6077 = vmatmul.mubr.msk.f32.vlgmr.msra.gmra.mxu0 %vm895_vm9, %v956_v53  ;;  %6080 = vmatpush3.msra.mxu1 %v6896_v9 }
 0x429   :  { %v6444_v59 = vpop.eup %6443  ;;  %6085 = vmatpush3.msra.mxu0 %v6934_v14  ;;  %6081 = vmatprep.mubr.msk.f32.mxu1 %vm6591_vm0, %v8102_v26  ;;  %v957_v1 = vmul.f32 %v6442_v46, %v7139_v38 }
 0x42a   :  { %6086 = vmatprep.mubr.msk.f32.mxu0 %vm6591_vm0, %v8102_v26  ;;  %6089 = vmatprep.subr.mxu1 %v8102_v26  ;;  %v958_v42 = vmul.f32 %v6444_v59, %v7141_v45 }
 0x42b   :  { %6094 = vmatprep.subr.mxu0 %v8102_v26  ;;  %6082 = vmatmul.mubr.msk.f32.vlgmr.msra.gmra.mxu1 %vm895_vm9, %v957_v1 }
 0x42c   :  { %v6446_v9 = vpop.eup %6445  ;;  %6087 = vmatmul.mubr.msk.f32.vlgmr.msra.gmra.mxu0 %vm895_vm9, %v958_v42  ;;  %6090 = vmatpush3.msra.mxu1 %v6967_v40 }
 0x42d   :  { %v6448_v14 = vpop.eup %6447  ;;  %6095 = vmatpush3.msra.mxu0 %v6998_v12  ;;  %6091 = vmatprep.mubr.msk.f32.mxu1 %vm6591_vm0, %v8102_v26  ;;  %v959_v38 = vmul.f32 %v6446_v9, %v7147_v20 }
 0x42e   :  { %6096 = vmatprep.mubr.msk.f32.mxu0 %vm6591_vm0, %v8102_v26  ;;  %6099 = vmatprep.subr.mxu1 %v8102_v26  ;;  %v960_v45 = vmul.f32 %v6448_v14, %v7149_v55 }
 0x42f   :  { %6104 = vmatprep.subr.mxu0 %v8102_v26  ;;  %6092 = vmatmul.mubr.msk.f32.vlgmr.msra.gmra.mxu1 %vm895_vm9, %v959_v38 }
 0x430   :  { %v6450_v40 = vpop.eup %6449  ;;  %6097 = vmatmul.mubr.msk.f32.vlgmr.msra.gmra.mxu0 %vm895_vm9, %v960_v45  ;;  %6100 = vmatpush3.msra.mxu1 %v7026_v50 }
 0x431   :  { %6105 = vmatpush3.xpose.msra.mxu0 %v6885_v5  ;;  %6101 = vmatprep.mubr.msk.f32.mxu1 %vm6591_vm0, %v8102_v26  ;;  %v961_v12 = vmul.f32 %v6450_v40, %v7155_v16 }
 0x432   :  { %6106 = vmatprep.mubr.msk.f32.mxu0 %vm6591_vm0, %v8102_v26  ;;  %6109 = vmatprep.subr.mxu1 %v8102_v26 }
 0x433   :  { %6114 = vmatprep.subr.mxu0 %v8102_v26  ;;  %6102 = vmatmul.mubr.msk.f32.vlgmr.msra.gmra.mxu1 %vm895_vm9, %v961_v12 }
 0x434   :  { %6107 = vmatmul.mubr.f32.vlgmr.msra.gmra.mxu0 %v6903_v11  ;;  %6110 = vmatpush3.xpose.msra.mxu1 %v6919_v24 }
 0x435   :  { %6115 = vmatpush3.xpose.msra.mxu0 %v6952_v37  ;;  %6111 = vmatprep.mubr.msk.f32.mxu1 %vm6591_vm0, %v8102_v26 }
 0x436   :  { %6116 = vmatprep.mubr.msk.f32.mxu0 %vm6591_vm0, %v8102_v26  ;;  %6119 = vmatprep.subr.mxu1 %v8102_v26 }
 0x437   :  { %6124 = vmatprep.subr.mxu0 %v8102_v26  ;;  %6112 = vmatmul.mubr.f32.vlgmr.msra.gmra.mxu1 %v6937_v28 }
 0x438   :  { %6117 = vmatmul.mubr.f32.vlgmr.msra.gmra.mxu0 %v6970_v41  ;;  %6120 = vmatpush3.xpose.msra.mxu1 %v6985_v63 }
 0x439   :  { %6125 = vmatpush3.xpose.msra.mxu0 %v7014_v31  ;;  %6121 = vmatprep.mubr.msk.f32.mxu1 %vm6591_vm0, %v8102_v26 }
 0x43a   :  { %6126 = vmatprep.mubr.msk.f32.mxu0 %vm6591_vm0, %v8102_v26  ;;  %6129 = vmatprep.subr.mxu1 %v8102_v26 }
 0x43b   :  { %6134 = vmatprep.subr.mxu0 %v8102_v26  ;;  %6122 = vmatmul.mubr.f32.vlgmr.msra.gmra.mxu1 %v7001_v13 }
 0x43c   :  { %6127 = vmatmul.mubr.f32.vlgmr.msra.gmra.mxu0 %v7029_v56  ;;  %6130 = vmatpush3.xpose.msra.mxu1 %v7042_v34 }
 0x43d   :  { %6135 = vmatpush3.msra.mxu0 %v6868_v60  ;;  %6131 = vmatprep.mubr.msk.f32.mxu1 %vm6591_vm0, %v8102_v26 }
 0x43e   :  { %6139 = vmatprep.subr.mxu1 %v8102_v26  ;;  %6136 = vmatprep.mubr.msk.f32.mxu0 %vm6591_vm0, %v8102_v26 }
 0x43f   :  { %6132 = vmatmul.mubr.f32.vlgmr.msra.gmra.mxu1 %v7049_v29  ;;  %6144 = vmatprep.subr.mxu0 %v8102_v26 }
 0x440   :  { %6140 = vmatpush3.msra.mxu1 %v6900_v10  ;;  %6141 = vmatprep.mubr.msk.f32.mxu1 %vm6591_vm0, %v8102_v26 }
 0x441   :  { %6149 = vmatprep.subr.mxu1 %v8102_v26 }
 0x4db   :  { %v1546_v60 = vpop.f32.mrf.mxu0 }
 0x4dd   :  { %v6048_v5 = vpop.f32.mrf.mxu0 }
 0x4df   :  { %v1619_v24 = vpop.f32.mrf.mxu1 }
 0x4e0   :  { %v1692_v37 = vpop.f32.mrf.mxu0 }
 0x4e1   :  { %v6053_v63 = vpop.f32.mrf.mxu1 }
 0x4e2   :  { %v6058_v31 = vpop.f32.mrf.mxu0 }
 0x4e3   :  { %v1765_v50 = vpop.f32.mrf.mxu1 }
 0x4e4   :  { %v1838_v34 = vpop.f32.mrf.mxu0 }
 0x4e5   :  { %v6063_v20 = vpop.f32.mrf.mxu1 }
 0x4e6   :  { %v6068_v55 = vpop.f32.mrf.mxu0 }
 0x4e7   :  { %v1911_v16 = vpop.f32.mrf.mxu1 }
 0x4e8   :  { %v1984_v47 = vpop.f32.mrf.mxu0 }
 0x4e9   :  { %v7261_v18 = vadd.f32 %v1984_v47, %v1546_v60  ;;  %v6073_v10 = vpop.f32.mrf.mxu1 }
 0x4ea   :  { %v6078_v54 = vpop.f32.mrf.mxu0 }
 0x4eb   :  { %v2057_v62 = vpop.f32.mrf.mxu1 }
 0x4ec   :  { %v7263_v61 = vadd.f32 %v2057_v62, %v1619_v24  ;;  %v2130_v3 = vpop.f32.mrf.mxu0 }
 0x4ed   :  { %v7265_v32 = vadd.f32 %v2130_v3, %v1692_v37  ;;  %v6083_v52 = vpop.f32.mrf.mxu1 }
 0x4ee   :  { %v6088_v51 = vpop.f32.mrf.mxu0 }
 0x4ef   :  { %v2203_v8 = vpop.f32.mrf.mxu1 }
 0x4f0   :  { %v7267_v17 = vadd.f32 %v2203_v8, %v1765_v50  ;;  %v2276_v49 = vpop.f32.mrf.mxu0 }
 0x4f1   :  { %v7269_v58 = vadd.f32 %v2276_v49, %v1838_v34  ;;  %v6093_v36 = vpop.f32.mrf.mxu1 }
 0x4f2   :  { %v6098_v7 = vpop.f32.mrf.mxu0 }
 0x4f3   :  { %v2349_v33 = vpop.f32.mrf.mxu1 }
 0x4f4   :  { %v7271_v27 = vadd.f32 %v2349_v33, %v1911_v16  ;;  %v2430_v43 = vpop.f32.mrf.mxu0 }
 0x4f5   :  { %v2784_v23 = vmul.f32 0.17677669, %v2430_v43  ;;  %v6103_v30 = vpop.f32.mrf.mxu1 }
 0x4f6   :  { %v6108_v39 = vpop.f32.mrf.mxu0 }
 0x4f7   :  { %v2500_v4 = vpop.f32.mrf.mxu1  ;;  %v2790_v48 = vsel %vm895_vm9, %v2784_v23, -inf }
 0x4f8   :  { %v2785_v53 = vmul.f32 0.17677669, %v2500_v4  ;;  %2791 = vmax.xlane.f32.xlu0 %v2790_v48  ;;  %v2570_v46 = vpop.f32.mrf.mxu0 }
 0x4f9   :  { %v2786_v59 = vmul.f32 0.17677669, %v2570_v46  ;;  %v6113_v1 = vpop.f32.mrf.mxu1 }
 0x4fa   :  { %v6118_v42 = vpop.f32.mrf.mxu0  ;;  %v2793_v9 = vsel %vm895_vm9, %v2785_v53, -inf }
 0x4fb   :  { %2794 = vmax.xlane.f32.xlu1 %v2793_v9  ;;  %v2640_v14 = vpop.f32.mrf.mxu1  ;;  %v2796_v38 = vsel %vm895_vm9, %v2786_v59, -inf }
 0x4fc   :  { %v2787_v45 = vmul.f32 0.17677669, %v2640_v14  ;;  %2797 = vmax.xlane.f32.xlu0 %v2796_v38  ;;  %v2710_v40 = vpop.f32.mrf.mxu0 }
 0x4fd   :  { %v2788_v12 = vmul.f32 0.17677669, %v2710_v40  ;;  %v6123_v60 = vpop.f32.mrf.mxu1 }
 0x4fe   :  { %v6128_v5 = vpop.f32.mrf.mxu0  ;;  %v2799_v24 = vsel %vm895_vm9, %v2787_v45, -inf }
 0x4ff   :  { %2800 = vmax.xlane.f32.xlu1 %v2799_v24  ;;  %v2780_v37 = vpop.f32.mrf.mxu1  ;;  %v2802_v63 = vsel %vm895_vm9, %v2788_v12, -inf }
 0x500   :  { %v2789_v31 = vmul.f32 0.17677669, %v2780_v37  ;;  %2803 = vmax.xlane.f32.xlu0 %v2802_v63 }
 0x501   :  { %v6133_v50 = vpop.f32.mrf.mxu1 }
 0x502   :  { %v2805_v34 = vsel %vm895_vm9, %v2789_v31, -inf }
 0x503   :  { %2806 = vmax.xlane.f32.xlu1 %v2805_v34 }
 0x581   :  { %v2792_v20 = vpop.xlane.xlu0 %2791 }
 0x582   :  { %v2808_v55 = vsub.f32 %v2784_v23, %v2792_v20 }
 0x584   :  { %v2814_v16 = vmul.f32 1.442695, %v2808_v55  ;;  %v2795_v47 = vpop.xlane.xlu1 %2794 }
 0x585   :  { %v2809_v10 = vsub.f32 %v2785_v53, %v2795_v47  ;;  %v2798_v54 = vpop.xlane.xlu0 %2797 }
 0x586   :  { %6451 = vpow2.f32 %v2814_v16  ;;  %v2810_v62 = vsub.f32 %v2786_v59, %v2798_v54 }
 0x587   :  { %v2816_v3 = vmul.f32 1.442695, %v2809_v10 }
 0x588   :  { %v2818_v52 = vmul.f32 1.442695, %v2810_v62  ;;  %v2801_v51 = vpop.xlane.xlu1 %2800 }
 0x589   :  { %6453 = vpow2.f32 %v2816_v3  ;;  %v2811_v8 = vsub.f32 %v2787_v45, %v2801_v51  ;;  %v2804_v49 = vpop.xlane.xlu0 %2803 }
 0x58a   :  { %6455 = vpow2.f32 %v2818_v52  ;;  %v2812_v36 = vsub.f32 %v2788_v12, %v2804_v49 }
 0x58b   :  { %v2820_v7 = vmul.f32 1.442695, %v2811_v8 }
 0x58c   :  { %v2822_v33 = vmul.f32 1.442695, %v2812_v36  ;;  %v2807_v43 = vpop.xlane.xlu1 %2806 }
 0x58d   :  { %6457 = vpow2.f32 %v2820_v7  ;;  %v2813_v30 = vsub.f32 %v2789_v31, %v2807_v43 }
 0x58e   :  { %6459 = vpow2.f32 %v2822_v33 }
 0x58f   :  { %v2824_v23 = vmul.f32 1.442695, %v2813_v30 }
 0x591   :  { %6461 = vpow2.f32 %v2824_v23 }
 0x593   :  { %v6452_v39 = vpop.eup %6451 }
 0x594   :  { %v2826_v4 = vsel %vm895_vm9, %v6452_v39, 0.0 }
 0x595   :  { %2827 = vadd.xlane.f32.xlu0 %v2826_v4 }
 0x596   :  { %v6454_v48 = vpop.eup %6453 }
 0x597   :  { %v6456_v53 = vpop.eup %6455  ;;  %v2829_v46 = vsel %vm895_vm9, %v6454_v48, 0.0 }
 0x598   :  { %2830 = vadd.xlane.f32.xlu1 %v2829_v46  ;;  %v2832_v59 = vsel %vm895_vm9, %v6456_v53, 0.0 }
 0x599   :  { %2833 = vadd.xlane.f32.xlu0 %v2832_v59 }
 0x59a   :  { %v6458_v1 = vpop.eup %6457 }
 0x59b   :  { %v6460_v42 = vpop.eup %6459  ;;  %v2835_v9 = vsel %vm895_vm9, %v6458_v1, 0.0 }
 0x59c   :  { %2836 = vadd.xlane.f32.xlu1 %v2835_v9  ;;  %v2838_v14 = vsel %vm895_vm9, %v6460_v42, 0.0 }
 0x59d   :  { %2839 = vadd.xlane.f32.xlu0 %v2838_v14 }
 0x59e   :  { %v6462_v38 = vpop.eup %6461 }
 0x59f   :  { %v2841_v45 = vsel %vm895_vm9, %v6462_v38, 0.0 }
 0x5a0   :  { %2842 = vadd.xlane.f32.xlu1 %v2841_v45 }
 0x61e   :  { %v2828_v40 = vpop.xlane.xlu0 %2827 }
 0x61f   :  { %6463 = vrcp.f32 %v2828_v40 }
 0x621   :  { %v2831_v12 = vpop.xlane.xlu1 %2830 }
 0x622   :  { %6465 = vrcp.f32 %v2831_v12  ;;  %v2834_v60 = vpop.xlane.xlu0 %2833 }
 0x623   :  { %6467 = vrcp.f32 %v2834_v60 }
 0x625   :  { %v2837_v5 = vpop.xlane.xlu1 %2836 }
 0x626   :  { %6469 = vrcp.f32 %v2837_v5  ;;  %v2840_v24 = vpop.xlane.xlu0 %2839 }
 0x627   :  { %6471 = vrcp.f32 %v2840_v24 }
 0x629   :  { %v2843_v37 = vpop.xlane.xlu1 %2842 }
 0x62a   :  { %6473 = vrcp.f32 %v2843_v37 }
 0x62c   :  { %v6464_v63 = vpop.eup %6463 }
 0x62d   :  { %v2850_v31 = vmul.f32 %v6464_v63, %v6452_v39 }
 0x62f   :  { %v6466_v50 = vpop.eup %6465  ;;  %6137 = vmatmul.mubr.msk.f32.vlgmr.msra.gmra.mxu0 %vm895_vm9, %v2850_v31 }
 0x630   :  { %v6468_v34 = vpop.eup %6467  ;;  %6145 = vmatpush3.msra.mxu0 %v6941_v21  ;;  %6146 = vmatprep.mubr.msk.f32.mxu0 %vm6591_vm0, %v8102_v26  ;;  %v2851_v20 = vmul.f32 %v6466_v50, %v6454_v48 }
 0x631   :  { %6154 = vmatprep.subr.mxu0 %v8102_v26  ;;  %v2852_v55 = vmul.f32 %v6468_v34, %v6456_v53 }
 0x632   :  { %6142 = vmatmul.mubr.msk.f32.vlgmr.msra.gmra.mxu1 %vm895_vm9, %v2851_v20 }
 0x633   :  { %v6470_v16 = vpop.eup %6469  ;;  %6147 = vmatmul.mubr.msk.f32.vlgmr.msra.gmra.mxu0 %vm895_vm9, %v2852_v55  ;;  %6150 = vmatpush3.msra.mxu1 %v6974_v44 }
 0x634   :  { %v6472_v47 = vpop.eup %6471  ;;  %6155 = vmatpush3.msra.mxu0 %v7005_v19  ;;  %6151 = vmatprep.mubr.msk.f32.mxu1 %vm6591_vm0, %v8102_v26  ;;  %v2853_v21 = vmul.f32 %v6470_v16, %v6458_v1 }
 0x635   :  { %6156 = vmatprep.mubr.msk.f32.mxu0 %vm6591_vm0, %v8102_v26  ;;  %6159 = vmatprep.subr.mxu1 %v8102_v26  ;;  %v2854_v10 = vmul.f32 %v6472_v47, %v6460_v42 }
 0x636   :  { %6164 = vmatprep.subr.mxu0 %v8102_v26  ;;  %6152 = vmatmul.mubr.msk.f32.vlgmr.msra.gmra.mxu1 %vm895_vm9, %v2853_v21 }
 0x637   :  { %v6474_v54 = vpop.eup %6473  ;;  %6157 = vmatmul.mubr.msk.f32.vlgmr.msra.gmra.mxu0 %vm895_vm9, %v2854_v10  ;;  %6160 = vmatpush3.msra.mxu1 %v7033_v57 }
 0x638   :  { %6165 = vmatpush3.xpose.msra.mxu0 %v6889_v6  ;;  %6161 = vmatprep.mubr.msk.f32.mxu1 %vm6591_vm0, %v8102_v26  ;;  %v2855_v44 = vmul.f32 %v6474_v54, %v6462_v38  ;;  %v8103_v6 = vld [vmem:[#allocation3_spill] sm:$0xff] }
 0x639   :  { %6166 = vmatprep.mubr.msk.f32.mxu0 %vm6591_vm0, %v8102_v26  ;;  %6169 = vmatprep.subr.mxu1 %v8102_v26 }
 0x63a   :  { %6174 = vmatprep.subr.mxu0 %v8102_v26  ;;  %6162 = vmatmul.mubr.msk.f32.vlgmr.msra.gmra.mxu1 %vm895_vm9, %v2855_v44 }
 0x63b   :  { %6167 = vmatmul.mubr.f32.vlgmr.msra.gmra.mxu0 %v6903_v11  ;;  %6170 = vmatpush3.xpose.msra.mxu1 %v6923_v25 }
 0x63c   :  { %6175 = vmatpush3.xpose.msra.mxu0 %v6956_v22  ;;  %6171 = vmatprep.mubr.msk.f32.mxu1 %vm6591_vm0, %v8102_v26 }
 0x63d   :  { %6176 = vmatprep.mubr.msk.f32.mxu0 %vm6591_vm0, %v8102_v26  ;;  %6179 = vmatprep.subr.mxu1 %v8102_v26 }
 0x63e   :  { %6184 = vmatprep.subr.mxu0 %v8102_v26  ;;  %6172 = vmatmul.mubr.f32.vlgmr.msra.gmra.mxu1 %v6937_v28 }
 0x63f   :  { %6177 = vmatmul.mubr.f32.vlgmr.msra.gmra.mxu0 %v6970_v41  ;;  %6180 = vmatpush3.xpose.msra.mxu1 %v6989_v2 }
 0x640   :  { %6185 = vmatpush3.xpose.msra.mxu0 %v7017_v15  ;;  %6181 = vmatprep.mubr.msk.f32.mxu1 %vm6591_vm0, %v8102_v26 }
 0x641   :  { %6186 = vmatprep.mubr.msk.f32.mxu0 %vm6591_vm0, %v8102_v26  ;;  %6189 = vmatprep.subr.mxu1 %v8102_v26 }
 0x642   :  { %6194 = vmatprep.subr.mxu0 %v8102_v26  ;;  %6182 = vmatmul.mubr.f32.vlgmr.msra.gmra.mxu1 %v7001_v13 }
 0x643   :  { %6187 = vmatmul.mubr.f32.vlgmr.msra.gmra.mxu0 %v7029_v56  ;;  %6190 = vmatpush3.xpose.msra.mxu1 %v7045_v35 }
 0x644   :  { %6195 = vmatpush3.msra.mxu0 %v6876_v0  ;;  %6191 = vmatprep.mubr.msk.f32.mxu1 %vm6591_vm0, %v8102_v26 }
 0x645   :  { %6199 = vmatprep.subr.mxu1 %v8102_v26  ;;  %6196 = vmatprep.mubr.msk.f32.mxu0 %vm6591_vm0, %v8102_v26 }
 0x646   :  { %6192 = vmatmul.mubr.f32.vlgmr.msra.gmra.mxu1 %v7049_v29  ;;  %6204 = vmatprep.subr.mxu0 %v8102_v26 }
 0x647   :  { %6200 = vmatpush3.msra.mxu1 %v8103_v6  ;;  %6201 = vmatprep.mubr.msk.f32.mxu1 %vm6591_vm0, %v8102_v26 }
 0x648   :  { %6209 = vmatprep.subr.mxu1 %v8102_v26 }
 0x6ef   :  { %v2931_v0 = vpop.f32.mrf.mxu0 }
 0x6f0   :  { %v7346_v11 = vadd.f32 %v2931_v0, %v7261_v18 }
 0x6f1   :  { %v6138_v25 = vpop.f32.mrf.mxu0 }
 0x6f2   :  { %v3004_v28 = vpop.f32.mrf.mxu1 }
 0x6f3   :  { %v7349_v22 = vadd.f32 %v3004_v28, %v7263_v61  ;;  %v3077_v41 = vpop.f32.mrf.mxu0 }
 0x6f4   :  { %v7352_v2 = vadd.f32 %v3077_v41, %v7265_v32  ;;  %v6143_v13 = vpop.f32.mrf.mxu1 }
 0x6f5   :  { %v6148_v19 = vpop.f32.mrf.mxu0 }
 0x6f6   :  { %v3150_v15 = vpop.f32.mrf.mxu1 }
 0x6f7   :  { %v7355_v56 = vadd.f32 %v3150_v15, %v7267_v17  ;;  %v3223_v57 = vpop.f32.mrf.mxu0 }
 0x6f8   :  { %v7358_v35 = vadd.f32 %v3223_v57, %v7269_v58  ;;  %v6153_v29 = vpop.f32.mrf.mxu1 }
 0x6f9   :  { %v6158_v18 = vpop.f32.mrf.mxu0 }
 0x6fa   :  { %v3296_v62 = vpop.f32.mrf.mxu1 }
 0x6fb   :  { %v7361_v61 = vadd.f32 %v3296_v62, %v7271_v27  ;;  %v3383_v3 = vpop.f32.mrf.mxu0 }
 0x6fc   :  { %v3737_v52 = vmul.f32 0.17677669, %v3383_v3  ;;  %v6163_v32 = vpop.f32.mrf.mxu1 }
 0x6fd   :  { %v6168_v51 = vpop.f32.mrf.mxu0 }
 0x6fe   :  { %v3453_v8 = vpop.f32.mrf.mxu1  ;;  %v3743_v49 = vsel %vm895_vm9, %v3737_v52, -inf }
 0x6ff   :  { %v3738_v36 = vmul.f32 0.17677669, %v3453_v8  ;;  %3744 = vmax.xlane.f32.xlu0 %v3743_v49  ;;  %v3523_v17 = vpop.f32.mrf.mxu0 }
 0x700   :  { %v3739_v7 = vmul.f32 0.17677669, %v3523_v17  ;;  %v6173_v33 = vpop.f32.mrf.mxu1 }
 0x701   :  { %v6178_v58 = vpop.f32.mrf.mxu0  ;;  %v3746_v43 = vsel %vm895_vm9, %v3738_v36, -inf }
 0x702   :  { %3747 = vmax.xlane.f32.xlu1 %v3746_v43  ;;  %v3593_v30 = vpop.f32.mrf.mxu1  ;;  %v3749_v27 = vsel %vm895_vm9, %v3739_v7, -inf }
 0x703   :  { %v3740_v23 = vmul.f32 0.17677669, %v3593_v30  ;;  %3750 = vmax.xlane.f32.xlu0 %v3749_v27  ;;  %v3663_v39 = vpop.f32.mrf.mxu0  ;;  %v8105_v30 = vld [vmem:[#allocation5_spill] sm:$0xff] }
 0x704   :  { %v3741_v4 = vmul.f32 0.17677669, %v3663_v39  ;;  %v6183_v48 = vpop.f32.mrf.mxu1 }
 0x705   :  { %v6188_v53 = vpop.f32.mrf.mxu0  ;;  %v3752_v46 = vsel %vm895_vm9, %v3740_v23, -inf }
 0x706   :  { %3753 = vmax.xlane.f32.xlu1 %v3752_v46  ;;  %v3733_v59 = vpop.f32.mrf.mxu1  ;;  %v3755_v1 = vsel %vm895_vm9, %v3741_v4, -inf  ;;  %v8107_v46 = vld [vmem:[#allocation7_spill] sm:$0xff] }
 0x707   :  { %v3742_v42 = vmul.f32 0.17677669, %v3733_v59  ;;  %3756 = vmax.xlane.f32.xlu0 %v3755_v1  ;;  %v6304_v1 = vld [vmem:[%s8057_s5 + $0x30] sm:$0xff]  }
 0x708   :  { %v6193_v9 = vpop.f32.mrf.mxu1 }
 0x709   :  { %v3758_v14 = vsel %vm895_vm9, %v3742_v42, -inf  ;;  %v6305_v9 = vld [vmem:[%s8057_s5 + $0x28] sm:$0xff]  }
 0x70a   :  { %3759 = vmax.xlane.f32.xlu1 %v3758_v14  ;;  %v6306_v14 = vld [vmem:[%s8057_s5 + $0x20] sm:$0xff]  }
 0x788   :  { %v3745_v38 = vpop.xlane.xlu0 %3744 }
 0x789   :  { %v3761_v45 = vsub.f32 %v3737_v52, %v3745_v38  ;;  %v6307_v38 = vld [vmem:[%s8057_s5 + $0x18] sm:$0xff]  }
 0x78b   :  { %v3767_v40 = vmul.f32 1.442695, %v3761_v45  ;;  %v3748_v12 = vpop.xlane.xlu1 %3747  ;;  %v6308_v45 = vld [vmem:[%s8057_s5 + $0x10] sm:$0xff]  }
 0x78c   :  { %v3762_v60 = vsub.f32 %v3738_v36, %v3748_v12  ;;  %v3751_v5 = vpop.xlane.xlu0 %3750  ;;  %v6310_v12 = vld [vmem:[%s8057_s5] sm:$0xff]  }
 0x78d   :  { %6475 = vpow2.f32 %v3767_v40  ;;  %v3763_v24 = vsub.f32 %v3739_v7, %v3751_v5  ;;  %v8104_v7 = vld [vmem:[#allocation4_spill] sm:$0xff]  ;;  %v6309_v40 = vld [vmem:[%s8057_s5 + $0x8] sm:$0xff]  }
 0x78e   :  { %v3769_v37 = vmul.f32 1.442695, %v3762_v60 }
 0x78f   :  { %v3771_v63 = vmul.f32 1.442695, %v3763_v24  ;;  %v3754_v31 = vpop.xlane.xlu1 %3753 }
 0x790   :  { %6477 = vpow2.f32 %v3769_v37  ;;  %v3764_v50 = vsub.f32 %v3740_v23, %v3754_v31  ;;  %v3757_v34 = vpop.xlane.xlu0 %3756  ;;  %v8106_v23 = vld [vmem:[#allocation6_spill] sm:$0xff] }
 0x791   :  { %6479 = vpow2.f32 %v3771_v63  ;;  %v3765_v20 = vsub.f32 %v3741_v4, %v3757_v34  ;;  %v6303_v4 = vld [vmem:[%s8057_s5 + $0x38] sm:$0xff]  }
 0x792   :  { %v3773_v55 = vmul.f32 1.442695, %v3764_v50 }
 0x793   :  { %v3775_v16 = vmul.f32 1.442695, %v3765_v20  ;;  %v3760_v47 = vpop.xlane.xlu1 %3759 }
 0x794   :  { %6481 = vpow2.f32 %v3773_v55  ;;  %v3766_v21 = vsub.f32 %v3742_v42, %v3760_v47  ;;  %v8108_v42 = vmov 0  }
 0x795   :  { %6483 = vpow2.f32 %v3775_v16 }
 0x796   :  { %v3777_v10 = vmul.f32 1.442695, %v3766_v21 }
 0x798   :  { %6485 = vpow2.f32 %v3777_v10 }
 0x79a   :  { %v6476_v54 = vpop.eup %6475 }
 0x79b   :  { %v3779_v44 = vsel %vm895_vm9, %v6476_v54, 0.0 }
 0x79c   :  { %3780 = vadd.xlane.f32.xlu0 %v3779_v44 }
 0x79d   :  { %v6478_v6 = vpop.eup %6477 }
 0x79e   :  { %v6480_v0 = vpop.eup %6479  ;;  %v3782_v25 = vsel %vm895_vm9, %v6478_v6, 0.0 }
 0x79f   :  { %3783 = vadd.xlane.f32.xlu1 %v3782_v25  ;;  %v3785_v28 = vsel %vm895_vm9, %v6480_v0, 0.0 }
 0x7a0   :  { %3786 = vadd.xlane.f32.xlu0 %v3785_v28 }
 0x7a1   :  { %v6482_v41 = vpop.eup %6481 }
 0x7a2   :  { %v6484_v13 = vpop.eup %6483  ;;  %v3788_v19 = vsel %vm895_vm9, %v6482_v41, 0.0 }
 0x7a3   :  { %3789 = vadd.xlane.f32.xlu1 %v3788_v19  ;;  %v3791_v15 = vsel %vm895_vm9, %v6484_v13, 0.0 }
 0x7a4   :  { %3792 = vadd.xlane.f32.xlu0 %v3791_v15 }
 0x7a5   :  { %v6486_v57 = vpop.eup %6485 }
 0x7a6   :  { %v3794_v29 = vsel %vm895_vm9, %v6486_v57, 0.0 }
 0x7a7   :  { %3795 = vadd.xlane.f32.xlu1 %v3794_v29 }
 0x825   :  { %v3781_v18 = vpop.xlane.xlu0 %3780 }
 0x826   :  { %6487 = vrcp.f32 %v3781_v18 }
 0x828   :  { %v3784_v62 = vpop.xlane.xlu1 %3783 }
 0x829   :  { %6489 = vrcp.f32 %v3784_v62  ;;  %v3787_v3 = vpop.xlane.xlu0 %3786 }
 0x82a   :  { %6491 = vrcp.f32 %v3787_v3 }
 0x82c   :  { %v3790_v52 = vpop.xlane.xlu1 %3789 }
 0x82d   :  { %6493 = vrcp.f32 %v3790_v52  ;;  %v3793_v32 = vpop.xlane.xlu0 %3792 }
 0x82e   :  { %6495 = vrcp.f32 %v3793_v32 }
 0x830   :  { %v3796_v51 = vpop.xlane.xlu1 %3795 }
 0x831   :  { %6497 = vrcp.f32 %v3796_v51 }
 0x833   :  { %v6488_v8 = vpop.eup %6487 }
 0x834   :  { %v3803_v49 = vmul.f32 %v6488_v8, %v6476_v54 }
 0x836   :  { %v6490_v36 = vpop.eup %6489  ;;  %6197 = vmatmul.mubr.msk.f32.vlgmr.msra.gmra.mxu0 %vm895_vm9, %v3803_v49 }
 0x837   :  { %v6492_v17 = vpop.eup %6491  ;;  %6205 = vmatpush3.msra.mxu0 %v8104_v7  ;;  %6206 = vmatprep.mubr.msk.f32.mxu0 %vm6591_vm0, %v8102_v26  ;;  %v3804_v33 = vmul.f32 %v6490_v36, %v6478_v6 }
 0x838   :  { %6214 = vmatprep.subr.mxu0 %v8102_v26  ;;  %v3805_v58 = vmul.f32 %v6492_v17, %v6480_v0 }
 0x839   :  { %6202 = vmatmul.mubr.msk.f32.vlgmr.msra.gmra.mxu1 %vm895_vm9, %v3804_v33 }
 0x83a   :  { %v6494_v43 = vpop.eup %6493  ;;  %6207 = vmatmul.mubr.msk.f32.vlgmr.msra.gmra.mxu0 %vm895_vm9, %v3805_v58  ;;  %6210 = vmatpush3.msra.mxu1 %v8105_v30 }
 0x83b   :  { %v6496_v27 = vpop.eup %6495  ;;  %6215 = vmatpush3.msra.mxu0 %v8106_v23  ;;  %6211 = vmatprep.mubr.msk.f32.mxu1 %vm6591_vm0, %v8102_v26  ;;  %v3806_v39 = vmul.f32 %v6494_v43, %v6482_v41 }
 0x83c   :  { %6216 = vmatprep.mubr.msk.f32.mxu0 %vm6591_vm0, %v8102_v26  ;;  %6219 = vmatprep.subr.mxu1 %v8102_v26  ;;  %v3807_v48 = vmul.f32 %v6496_v27, %v6484_v13 }
 0x83d   :  { %6212 = vmatmul.mubr.msk.f32.vlgmr.msra.gmra.mxu1 %vm895_vm9, %v3806_v39  ;;  %6224 = vmatprep.subr.bf16.mxu0 %v8102_v26 }
 0x83e   :  { %v6498_v53 = vpop.eup %6497  ;;  %6217 = vmatmul.mubr.msk.f32.vlgmr.msra.gmra.mxu0 %vm895_vm9, %v3807_v48  ;;  %6220 = vmatpush3.msra.mxu1 %v8107_v46 }
 0x83f   :  { %6221 = vmatprep.mubr.msk.f32.mxu1 %vm6591_vm0, %v8102_v26  ;;  %v3808_v59 = vmul.f32 %v6498_v53, %v6486_v57  ;;  %6225 = vmatpush3.bf16.msra.mxu0 %v6303_v4 }
 0x840   :  { %6226 = vmatprep.subr.bf16.mxu0 %v8102_v26  ;;  %6240 = vmatprep.mubr.msk.bf16.mxu0 %vm6591_vm0, %v8102_v26 }
 0x841   :  { %6222 = vmatmul.mubr.msk.f32.vlgmr.msra.gmra.mxu1 %vm895_vm9, %v3808_v59 }
 0x842   :  { %4829 = vmatprep.mubr.bf16.mxu1 %v8108_v42 }
 0x843   :  { %6227 = vmatpush3.bf16.msra.mxu0 %v6304_v1 }
 0x844   :  { %6228 = vmatprep.subr.bf16.mxu0 %v8102_v26 }
 0x847   :  { %6229 = vmatpush3.bf16.msra.mxu0 %v6305_v9 }
 0x848   :  { %6230 = vmatprep.subr.bf16.mxu0 %v8102_v26 }
 0x84b   :  { %6231 = vmatpush3.bf16.msra.mxu0 %v6306_v14 }
 0x84c   :  { %6232 = vmatprep.subr.bf16.mxu0 %v8102_v26 }
 0x84f   :  { %6233 = vmatpush3.bf16.msra.mxu0 %v6307_v38 }
 0x850   :  { %6234 = vmatprep.subr.bf16.mxu0 %v8102_v26 }
 0x853   :  { %6235 = vmatpush3.bf16.msra.mxu0 %v6308_v45 }
 0x854   :  { %6236 = vmatprep.subr.bf16.mxu0 %v8102_v26 }
 0x857   :  { %6237 = vmatpush3.bf16.msra.mxu0 %v6309_v40 }
 0x858   :  { %6238 = vmatprep.subr.bf16.mxu0 %v8102_v26 }
 0x85b   :  { %6239 = vmatpush3.bf16.msra.mxu0 %v6310_v12 }
 0x8f6   :  { %v3884_v60 = vpop.f32.mrf.mxu0 }
 0x8f7   :  { %v4253_v37 = vadd.f32 %v3884_v60, %v7346_v11 }
 0x8f8   :  { %v6198_v5 = vpop.f32.mrf.mxu0 }
 0x8f9   :  { %v3957_v24 = vpop.f32.mrf.mxu1 }
 0x8fa   :  { %v4254_v63 = vadd.f32 %v3957_v24, %v7349_v22  ;;  %v4030_v31 = vpop.f32.mrf.mxu0 }
 0x8fb   :  { %v6203_v50 = vpop.f32.mrf.mxu1  ;;  %v4255_v16 = vadd.f32 %v4030_v31, %v7352_v2  ;;  %v5690_v2 = vld [vmem:[%s8058_s6] ss:$0 sm:$0xff] }
 0x8fc   :  { %v4259_v34 = vpack.c.bf16 %v4254_v63, %v4253_v37  ;;  %v6208_v20 = vpop.f32.mrf.mxu0 }
 0x8fd   :  { %v4103_v55 = vpop.f32.mrf.mxu1 }
 0x8fe   :  { %v4256_v47 = vadd.f32 %v4103_v55, %v7355_v56  ;;  %v4176_v21 = vpop.f32.mrf.mxu0  ;;  %6241 = vmatmul.mubr.bf16.vlgmr.msra.gmra.mxu0 %v4259_v34 }
 0x8ff   :  { %v6213_v10 = vpop.f32.mrf.mxu1  ;;  %6244 = vmatprep.mubr.msk.bf16.mxu0 %vm6591_vm0, %v8102_v26  ;;  %v4257_v22 = vadd.f32 %v4176_v21, %v7358_v35 }
 0x900   :  { %v4260_v54 = vpack.c.bf16 %v4256_v47, %v4255_v16  ;;  %v6218_v44 = vpop.f32.mrf.mxu0 }
 0x901   :  { %v4249_v11 = vpop.f32.mrf.mxu1 }
 0x902   :  { %v4258_v6 = vadd.f32 %v4249_v11, %v7361_v61  ;;  %v5699_v11 = vld [vmem:[%s8059_s7] ss:$0 sm:$0xff] }
 0x903   :  { %v6223_v0 = vpop.f32.mrf.mxu1 }
 0x904   :  { %v4261_v25 = vpack.c.bf16 %v4258_v6, %v4257_v22 }
 0x906   :  { %6245 = vmatmul.mubr.bf16.gmra.mxu0 %v4260_v54 }
 0x907   :  { %6248 = vmatprep.mubr.msk.bf16.mxu0 %vm6591_vm0, %v8102_v26 }
 0x90e   :  { %6249 = vmatmul.mubr.bf16.gmra.mxu0 %v4261_v25  ;;  %v5700_v25 = vld [vmem:[%s8060_s8] ss:$0 sm:$0xff] }
 0x90f   :  { %4892 = vmatprep.mubr.bf16.mxu0 %v8108_v42 }
 0x9be   :  { %v4367_v56 = vpop.f32.mrf.mxu0 }
 0x9bf   :  { %v4368_v28 = vadd.f32 %v5690_v2, %v4367_v56 }
 0x9c0   :  { %v6242_v41 = vpop.f32.mrf.mxu0 }
 0x9c1   :  { %4392 = vadd.xlane.f32.xlu0 %v4368_v28 }
 0x9c2   :  { %v4370_v35 = vpop.f32.mrf.mxu0 }
 0x9c3   :  { %v4371_v13 = vadd.f32 %v5690_v2, %v4370_v35 }
 0x9c4   :  { %v6243_v61 = vpop.f32.mrf.mxu0 }
 0x9c5   :  { %4394 = vadd.xlane.f32.xlu1 %v4371_v13  ;;  %v6583_v61 = vld [vmem:[%s8094_s26] sm:$0xff] }
 0x9c6   :  { %v4375_v19 = vpop.f32.mrf.mxu0 }
 0x9c7   :  { %v4376_v15 = vadd.f32 %v5690_v2, %v4375_v19 }
 0x9c8   :  { %v6246_v57 = vpop.f32.mrf.mxu0 }
 0x9c9   :  { %4396 = vadd.xlane.f32.xlu0 %v4376_v15 }
 0x9ca   :  { %v4378_v26 = vpop.f32.mrf.mxu0 }
 0x9cb   :  { %v4379_v29 = vadd.f32 %v5690_v2, %v4378_v26 }
 0x9cc   :  { %v6247_v18 = vpop.f32.mrf.mxu0 }
 0x9cd   :  { %4398 = vadd.xlane.f32.xlu1 %v4379_v29  ;;  %v6584_v18 = vld [vmem:[%s8094_s26 + $0x8] sm:$0xff] }
 0x9ce   :  { %v4383_v62 = vpop.f32.mrf.mxu0 }
 0x9cf   :  { %v4384_v3 = vadd.f32 %v5690_v2, %v4383_v62 }
 0x9d0   :  { %v6250_v52 = vpop.f32.mrf.mxu0 }
 0x9d1   :  { %4400 = vadd.xlane.f32.xlu0 %v4384_v3 }
 0x9d2   :  { %v4386_v32 = vpop.f32.mrf.mxu0 }
 0x9d3   :  { %v4387_v51 = vadd.f32 %v5690_v2, %v4386_v32 }
 0x9d4   :  { %v6251_v8 = vpop.f32.mrf.mxu0 }
 0x9d5   :  { %4402 = vadd.xlane.f32.xlu1 %v4387_v51  ;;  %v6585_v8 = vld [vmem:[%s8094_s26 + $0x10] sm:$0xff] }
 0xa4a   :  { %v4393_v49 = vpop.xlane.xlu0 %4392 }
 0xa4b   :  { %v4404_v36 = vmul.f32 0.0078125, %v4393_v49 }
 0xa4d   :  { %v4410_v17 = vsub.f32 %v4368_v28, %v4404_v36 }
 0xa4e   :  { %v4395_v7 = vpop.xlane.xlu1 %4394 }
 0xa4f   :  { %v4405_v33 = vmul.f32 0.0078125, %v4395_v7  ;;  %v4416_v58 = vmul.f32 %v4410_v17, %v4410_v17 }
 0xa51   :  { %v4411_v43 = vsub.f32 %v4371_v13, %v4405_v33  ;;  %4422 = vadd.xlane.f32.xlu0 %v4416_v58  ;;  %v6586_v58 = vld [vmem:[%s8094_s26 + $0x18] sm:$0xff] }
 0xa52   :  { %v4397_v30 = vpop.xlane.xlu0 %4396 }
 0xa53   :  { %v4406_v27 = vmul.f32 0.0078125, %v4397_v30  ;;  %v4417_v23 = vmul.f32 %v4411_v43, %v4411_v43 }
 0xa55   :  { %v4412_v39 = vsub.f32 %v4376_v15, %v4406_v27  ;;  %4424 = vadd.xlane.f32.xlu1 %v4417_v23 }
 0xa56   :  { %v4399_v4 = vpop.xlane.xlu1 %4398 }
 0xa57   :  { %v4407_v48 = vmul.f32 0.0078125, %v4399_v4  ;;  %v4418_v53 = vmul.f32 %v4412_v39, %v4412_v39  ;;  %v6587_v4 = vld [vmem:[%s8094_s26 + $0x20] sm:$0xff] }
 0xa59   :  { %v4413_v46 = vsub.f32 %v4379_v29, %v4407_v48  ;;  %4426 = vadd.xlane.f32.xlu0 %v4418_v53 }
 0xa5a   :  { %v4401_v59 = vpop.xlane.xlu0 %4400 }
 0xa5b   :  { %v4408_v1 = vmul.f32 0.0078125, %v4401_v59  ;;  %v4419_v9 = vmul.f32 %v4413_v46, %v4413_v46  ;;  %v6588_v59 = vld [vmem:[%s8094_s26 + $0x28] sm:$0xff] }
 0xa5d   :  { %v7444_v14 = vsub.f32 %v4384_v3, %v4408_v1  ;;  %4428 = vadd.xlane.f32.xlu1 %v4419_v9  ;;  %v6311_v9 = vld [vmem:[%s8061_s11 + $0xe0] ss:$16 sps:$4 sm:$0xff]  }
 0xa5e   :  { %v4403_v38 = vpop.xlane.xlu1 %4402 }
 0xa5f   :  { %v4409_v45 = vmul.f32 0.0078125, %v4403_v38  ;;  %v4420_v40 = vmul.f32 %v7444_v14, %v7444_v14  ;;  %v6314_v38 = vld [vmem:[%s8061_s11 + $0xe8] ss:$16 sps:$4 sm:$0xff]  }
 0xa61   :  { %v7448_v12 = vsub.f32 %v4387_v51, %v4409_v45  ;;  %4430 = vadd.xlane.f32.xlu0 %v4420_v40  ;;  %v6316_v45 = vld [vmem:[%s8061_s11 + $0xec] ss:$16 sps:$4 sm:$0xff]  }
 0xa62   :  { %4860 = vmatprep.subr.bf16.mxu0 %v6316_v45 }
 0xa63   :  { %v4421_v60 = vmul.f32 %v7448_v12, %v7448_v12  ;;  %4861 = vmatpush1.bf16.msra.mxu0 %v6314_v38 }
 0xa65   :  { %4432 = vadd.xlane.f32.xlu1 %v4421_v60 }
 0xada   :  { %v4423_v5 = vpop.xlane.xlu0 %4422 }
 0xadb   :  { %v4434_v24 = vmul.f32 0.0078125, %v4423_v5 }
 0xadd   :  { %v4440_v37 = vadd.f32 1e-05, %v4434_v24 }
 0xade   :  { %v4425_v63 = vpop.xlane.xlu1 %4424 }
 0xadf   :  { %6499 = vrsqrt.f32 %v4440_v37  ;;  %v4435_v31 = vmul.f32 0.0078125, %v4425_v63 }
 0xae1   :  { %v4441_v50 = vadd.f32 1e-05, %v4435_v31 }
 0xae2   :  { %v4427_v34 = vpop.xlane.xlu0 %4426 }
 0xae3   :  { %6501 = vrsqrt.f32 %v4441_v50  ;;  %v4436_v20 = vmul.f32 0.0078125, %v4427_v34 }
 0xae5   :  { %v4442_v55 = vadd.f32 1e-05, %v4436_v20 }
 0xae6   :  { %v4429_v16 = vpop.xlane.xlu1 %4428 }
 0xae7   :  { %6503 = vrsqrt.f32 %v4442_v55  ;;  %v4437_v47 = vmul.f32 0.0078125, %v4429_v16 }
 0xae9   :  { %v4443_v21 = vadd.f32 1e-05, %v4437_v47 }
 0xaea   :  { %v4431_v10 = vpop.xlane.xlu0 %4430 }
 0xaeb   :  { %6505 = vrsqrt.f32 %v4443_v21  ;;  %v4438_v54 = vmul.f32 0.0078125, %v4431_v10 }
 0xaec   :  { %v6500_v44 = vpop.eup %6499 }
 0xaed   :  { %v4444_v22 = vadd.f32 1e-05, %v4438_v54  ;;  %v4452_v6 = vmul.f32 %v6500_v44, %v4410_v17 }
 0xaee   :  { %v4433_v0 = vpop.xlane.xlu1 %4432 }
 0xaef   :  { %6507 = vrsqrt.f32 %v4444_v22  ;;  %v4439_v2 = vmul.f32 0.0078125, %v4433_v0  ;;  %v4464_v56 = vmul.f32 %v5699_v11, %v4452_v6  ;;  %v6319_v22 = vld [vmem:[%s8061_s11 + $0xc4] ss:$16 sps:$4 sm:$0xff]   ;;  %v6322_v6 = vld [vmem:[%s8061_s11 + $0xcc] ss:$16 sps:$4 sm:$0xff]  }
 0xaf0   :  { %v6502_v28 = vpop.eup %6501  ;;  %4862 = vmatprep.subr.bf16.mxu0 %v6322_v6 }
 0xaf1   :  { %v4445_v41 = vadd.f32 1e-05, %v4439_v2  ;;  %v4476_v35 = vadd.f32 %v5700_v25, %v4464_v56  ;;  %v4453_v13 = vmul.f32 %v6502_v28, %v4411_v43  ;;  %v6320_v2 = vld [vmem:[%s8061_s11 + $0xc8] ss:$16 sps:$4 sm:$0xff]  }
 0xaf2   :  { %4863 = vmatpush1.bf16.msra.mxu0 %v6320_v2 }
 0xaf3   :  { %6509 = vrsqrt.f32 %v4445_v41  ;;  %v7461_v19 = vadd.f32 %v6583_v61, %v4476_v35  ;;  %v4465_v15 = vmul.f32 %v5699_v11, %v4453_v13  ;;  %v6325_v35 = vld [vmem:[%s8061_s11 + $0xa4] ss:$16 sps:$4 sm:$0xff]   ;;  %v6328_v13 = vld [vmem:[%s8061_s11 + $0xac] ss:$16 sps:$4 sm:$0xff]   ;;  %v6323_v61 = vld [vmem:[%s8061_s11 + $0xa0] ss:$16 sps:$4 sm:$0xff]  }
 0xaf4   :  { %v6504_v57 = vpop.eup %6503  ;;  %4864 = vmatprep.subr.bf16.mxu0 %v6328_v13 }
 0xaf5   :  { %8109 = vst [vmem:[#allocation3_spill] sm:$0xff] %v7461_v19  ;;  %4490 = vadd.xlane.f32.xlu0 %v7461_v19  ;;  %v4477_v26 = vadd.f32 %v5700_v25, %v4465_v15  ;;  %v4454_v29 = vmul.f32 %v6504_v57, %v4412_v39  ;;  %v6326_v15 = vld [vmem:[%s8061_s11 + $0xa8] ss:$16 sps:$4 sm:$0xff]  }
 0xaf6   :  { %4865 = vmatpush1.bf16.msra.mxu0 %v6326_v15 }
 0xaf7   :  { %v7467_v62 = vadd.f32 %v6584_v18, %v4477_v26  ;;  %v4466_v3 = vmul.f32 %v5699_v11, %v4454_v29  ;;  %v6331_v26 = vld [vmem:[%s8061_s11 + $0x84] ss:$16 sps:$4 sm:$0xff]   ;;  %v6334_v29 = vld [vmem:[%s8061_s11 + $0x8c] ss:$16 sps:$4 sm:$0xff]   ;;  %v6329_v18 = vld [vmem:[%s8061_s11 + $0x80] ss:$16 sps:$4 sm:$0xff]  }
 0xaf8   :  { %v6506_v52 = vpop.eup %6505  ;;  %4866 = vmatprep.subr.bf16.mxu0 %v6334_v29 }
 0xaf9   :  { %8110 = vst [vmem:[#allocation4_spill] sm:$0xff] %v7467_v62  ;;  %4492 = vadd.xlane.f32.xlu1 %v7467_v62  ;;  %v4478_v32 = vadd.f32 %v5700_v25, %v4466_v3  ;;  %v4455_v51 = vmul.f32 %v6506_v52, %v4413_v46  ;;  %v6332_v3 = vld [vmem:[%s8061_s11 + $0x88] ss:$16 sps:$4 sm:$0xff]   ;;  %v6337_v52 = vld [vmem:[%s8061_s11 + $0x64] ss:$16 sps:$4 sm:$0xff]  }
 0xafa   :  { %4867 = vmatpush1.bf16.msra.mxu0 %v6332_v3 }
 0xafb   :  { %v7473_v49 = vadd.f32 %v6585_v8, %v4478_v32  ;;  %v4467_v36 = vmul.f32 %v5699_v11, %v4455_v51  ;;  %v6340_v32 = vld [vmem:[%s8061_s11 + $0x6c] ss:$16 sps:$4 sm:$0xff]   ;;  %v6335_v51 = vld [vmem:[%s8061_s11 + $0x60] ss:$16 sps:$4 sm:$0xff]   ;;  %v6338_v8 = vld [vmem:[%s8061_s11 + $0x68] ss:$16 sps:$4 sm:$0xff]  }
 0xafc   :  { %v6508_v17 = vpop.eup %6507  ;;  %4868 = vmatprep.subr.bf16.mxu0 %v6340_v32 }
 0xafd   :  { %8111 = vst [vmem:[#allocation5_spill] sm:$0xff] %v7473_v49  ;;  %4494 = vadd.xlane.f32.xlu0 %v7473_v49  ;;  %v4479_v7 = vadd.f32 %v5700_v25, %v4467_v36  ;;  %v4456_v33 = vmul.f32 %v6508_v17, %v7444_v14  ;;  %v6313_v14 = vld [vmem:[%s8061_s11 + $0xe4] ss:$16 sps:$4 sm:$0xff]   ;;  %v6346_v17 = vld [vmem:[%s8061_s11 + $0x4c] ss:$16 sps:$4 sm:$0xff]  }
 0xafe   :  { %4797 = vmatprep.subr.bf16.mxu1 %v6313_v14  ;;  %4869 = vmatpush1.bf16.msra.mxu0 %v6338_v8  ;;  %v6343_v36 = vld [vmem:[%s8061_s11 + $0x44] ss:$16 sps:$4 sm:$0xff]  }
 0xaff   :  { %v7480_v43 = vadd.f32 %v6586_v58, %v4479_v7  ;;  %v4468_v30 = vmul.f32 %v5699_v11, %v4456_v33  ;;  %4798 = vmatpush1.bf16.msra.mxu1 %v6311_v9  ;;  %v6341_v7 = vld [vmem:[%s8061_s11 + $0x40] ss:$16 sps:$4 sm:$0xff]   ;;  %v6344_v33 = vld [vmem:[%s8061_s11 + $0x48] ss:$16 sps:$4 sm:$0xff]   ;;  %4870 = vmatprep.subr.bf16.mxu0 %v6346_v17  ;;  %v6349_v58 = vld [vmem:[%s8061_s11 + $0x24] ss:$16 sps:$4 sm:$0xff]  }
 0xb00   :  { %v6510_v27 = vpop.eup %6509  ;;  %4799 = vmatprep.subr.bf16.mxu1 %v6319_v22 }
 0xb01   :  { %8112 = vst [vmem:[#allocation6_spill] sm:$0xff] %v7480_v43  ;;  %4496 = vadd.xlane.f32.xlu1 %v7480_v43  ;;  %v4480_v23 = vadd.f32 %v5700_v25, %v4468_v30  ;;  %v4457_v39 = vmul.f32 %v6510_v27, %v7448_v12  ;;  %v6352_v30 = vld [vmem:[%s8061_s11 + $0x2c] ss:$16 sps:$4 sm:$0xff]   ;;  %v6347_v27 = vld [vmem:[%s8061_s11 + $0x20] ss:$16 sps:$4 sm:$0xff]  }
 0xb02   :  { %4871 = vmatpush1.bf16.msra.mxu0 %v6344_v33 }
 0xb03   :  { %v7487_v48 = vadd.f32 %v6587_v4, %v4480_v23  ;;  %v4469_v53 = vmul.f32 %v5699_v11, %v4457_v39  ;;  %v6350_v23 = vld [vmem:[%s8061_s11 + $0x28] ss:$16 sps:$4 sm:$0xff]   ;;  %4872 = vmatprep.subr.bf16.mxu0 %v6352_v30  ;;  %v6355_v39 = vld [vmem:[%s8061_s11 + $0x4] ss:$16 sps:$4 sm:$0xff]   ;;  %v6353_v4 = vld [vmem:[%s8061_s11] ss:$16 sps:$4 sm:$0xff]  }
 0xb04   :  { %v6363_v30 = vld [vmem:[%s8064_s13 + $0x70] sm:$0xff]  }
 0xb05   :  { %8113 = vst [vmem:[#allocation7_spill] sm:$0xff] %v7487_v48  ;;  %4498 = vadd.xlane.f32.xlu0 %v7487_v48  ;;  %v4481_v46 = vadd.f32 %v5700_v25, %v4469_v53  ;;  %v6317_v25 = vld [vmem:[%s8061_s11 + $0xc0] ss:$16 sps:$4 sm:$0xff]   ;;  %v6356_v53 = vld [vmem:[%s8061_s11 + $0x8] ss:$16 sps:$4 sm:$0xff]  }
 0xb06   :  { %4800 = vmatpush1.bf16.msra.mxu1 %v6317_v25  ;;  %4873 = vmatpush1.bf16.msra.mxu0 %v6350_v23  ;;  %v7662_v23 = vld [vmem:[%s8064_s13 + $0xf0] sm:$0xff]  }
 0xb07   :  { %v7493_v1 = vadd.f32 %v6588_v59, %v4481_v46  ;;  %4801 = vmatprep.subr.bf16.mxu1 %v6325_v35  ;;  %v6358_v46 = vld [vmem:[%s8061_s11 + $0xc] ss:$16 sps:$4 sm:$0xff]  }
 0xb08   :  { %4874 = vmatprep.subr.bf16.mxu0 %v6358_v46  ;;  %v7680_v46 = vld [vmem:[%s8064_s13 + $0xe8] sm:$0xff]  }
 0xb09   :  { %8114 = vst [vmem:[#allocation8_spill] sm:$0xff] %v7493_v1  ;;  %4500 = vadd.xlane.f32.xlu1 %v7493_v1 }
 0xb0a   :  { %4802 = vmatpush1.bf16.msra.mxu1 %v6323_v61  ;;  %4875 = vmatpush1.bf16.msra.mxu0 %v6356_v53  ;;  %v6368_v53 = vld [vmem:[%s8064_s13 + $0x28] sm:$0xff]  }
 0xb0b   :  { %4803 = vmatprep.subr.bf16.mxu1 %v6331_v26 }
 0xb0e   :  { %4804 = vmatpush1.bf16.msra.mxu1 %v6329_v18 }
 0xb0f   :  { %4805 = vmatprep.subr.bf16.mxu1 %v6337_v52 }
 0xb12   :  { %4806 = vmatpush1.bf16.msra.mxu1 %v6335_v51 }
 0xb13   :  { %4807 = vmatprep.subr.bf16.mxu1 %v6343_v36 }
 0xb16   :  { %4808 = vmatpush1.bf16.msra.mxu1 %v6341_v7 }
 0xb17   :  { %4809 = vmatprep.subr.bf16.mxu1 %v6349_v58  ;;  %v6361_v58 = vld [vmem:[%s8064_s13 + $0xf8] sm:$0xff]  }
 0xb18   :  { %5922 = vmatprep.subr.bf16.mxu0 %v6361_v58 }
 0xb1a   :  { %4810 = vmatpush1.bf16.msra.mxu1 %v6347_v27  ;;  %v6364_v27 = vld [vmem:[%s8064_s13 + $0x30] sm:$0xff]  }
 0xb1b   :  { %4811 = vmatprep.subr.bf16.mxu1 %v6355_v39  ;;  %v7667_v39 = vld [vmem:[%s8064_s13 + $0xb0] sm:$0xff]  }
 0xb1e   :  { %4812 = vmatpush1.bf16.msra.mxu1 %v6353_v4  ;;  %v6367_v4 = vld [vmem:[%s8064_s13 + $0x68] sm:$0xff]  }
 0xb7e   :  { %v4491_v40 = vpop.xlane.xlu0 %4490 }
 0xb7f   :  { %v4502_v12 = vmul.f32 0.0078125, %v4491_v40 }
 0xb81   :  { %v7509_v60 = vsub.f32 %v7461_v19, %v4502_v12 }
 0xb82   :  { %v4493_v5 = vpop.xlane.xlu1 %4492 }
 0xb83   :  { %v4503_v24 = vmul.f32 0.0078125, %v4493_v5  ;;  %v4514_v37 = vmul.f32 %v7509_v60, %v7509_v60 }
 0xb85   :  { %v7514_v63 = vsub.f32 %v7467_v62, %v4503_v24  ;;  %4520 = vadd.xlane.f32.xlu0 %v4514_v37 }
 0xb86   :  { %v4495_v31 = vpop.xlane.xlu0 %4494 }
 0xb87   :  { %v4504_v50 = vmul.f32 0.0078125, %v4495_v31  ;;  %v4515_v34 = vmul.f32 %v7514_v63, %v7514_v63 }
 0xb89   :  { %v7519_v20 = vsub.f32 %v7473_v49, %v4504_v50  ;;  %4522 = vadd.xlane.f32.xlu1 %v4515_v34 }
 0xb8a   :  { %v4497_v55 = vpop.xlane.xlu1 %4496 }
 0xb8b   :  { %v4505_v16 = vmul.f32 0.0078125, %v4497_v55  ;;  %v4516_v47 = vmul.f32 %v7519_v20, %v7519_v20 }
 0xb8d   :  { %v7524_v21 = vsub.f32 %v7480_v43, %v4505_v16  ;;  %4524 = vadd.xlane.f32.xlu0 %v4516_v47 }
 0xb8e   :  { %v4499_v10 = vpop.xlane.xlu0 %4498 }
 0xb8f   :  { %v4506_v54 = vmul.f32 0.0078125, %v4499_v10  ;;  %v4517_v44 = vmul.f32 %v7524_v21, %v7524_v21 }
 0xb91   :  { %v7529_v11 = vsub.f32 %v7487_v48, %v4506_v54  ;;  %4526 = vadd.xlane.f32.xlu1 %v4517_v44  ;;  %v5701_v44 = vld [vmem:[%s8062_s9] ss:$0 sm:$0xff] }
 0xb92   :  { %v4501_v0 = vpop.xlane.xlu1 %4500 }
 0xb93   :  { %v4507_v56 = vmul.f32 0.0078125, %v4501_v0  ;;  %v4518_v28 = vmul.f32 %v7529_v11, %v7529_v11 }
 0xb95   :  { %v7546_v41 = vsub.f32 %v7493_v1, %v4507_v56  ;;  %4528 = vadd.xlane.f32.xlu0 %v4518_v28  ;;  %v5702_v56 = vld [vmem:[%s8063_s10] ss:$0 sm:$0xff] }
 0xb97   :  { %v4519_v57 = vmul.f32 %v7546_v41, %v7546_v41 }
 0xb99   :  { %4530 = vadd.xlane.f32.xlu1 %v4519_v57 }
 0xc0e   :  { %v4521_v59 = vpop.xlane.xlu0 %4520 }
 0xc0f   :  { %v4532_v9 = vmul.f32 0.0078125, %v4521_v59  ;;  %v7685_v59 = vld [vmem:[%s8064_s13 + $0xa8] sm:$0xff]  }
 0xc11   :  { %v4538_v14 = vadd.f32 1e-05, %v4532_v9  ;;  %v6371_v9 = vld [vmem:[%s8064_s13 + $0x60] sm:$0xff]  }
 0xc12   :  { %v4523_v38 = vpop.xlane.xlu1 %4522 }
 0xc13   :  { %6511 = vrsqrt.f32 %v4538_v14  ;;  %v4533_v45 = vmul.f32 0.0078125, %v4523_v38  ;;  %v6372_v14 = vld [vmem:[%s8064_s13 + $0x20] sm:$0xff]  }
 0xc14   :  { %v7698_v38 = vld [vmem:[%s8064_s13 + $0xe0] sm:$0xff]  }
 0xc15   :  { %v4539_v40 = vadd.f32 1e-05, %v4533_v45  ;;  %v7703_v45 = vld [vmem:[%s8064_s13 + $0xa0] sm:$0xff]  }
 0xc16   :  { %v4525_v12 = vpop.xlane.xlu0 %4524 }
 0xc17   :  { %6513 = vrsqrt.f32 %v4539_v40  ;;  %v4534_v5 = vmul.f32 0.0078125, %v4525_v12  ;;  %v6375_v40 = vld [vmem:[%s8064_s13 + $0x58] sm:$0xff]  }
 0xc18   :  { %v6376_v12 = vld [vmem:[%s8064_s13 + $0x18] sm:$0xff]  }
 0xc19   :  { %v4540_v24 = vadd.f32 1e-05, %v4534_v5  ;;  %v7716_v5 = vld [vmem:[%s8064_s13 + $0xd8] sm:$0xff]  }
 0xc1a   :  { %v4527_v37 = vpop.xlane.xlu1 %4526 }
 0xc1b   :  { %6515 = vrsqrt.f32 %v4540_v24  ;;  %v4535_v31 = vmul.f32 0.0078125, %v4527_v37  ;;  %v7721_v24 = vld [vmem:[%s8064_s13 + $0x98] sm:$0xff]   ;;  %v6379_v37 = vld [vmem:[%s8064_s13 + $0x50] sm:$0xff]  }
 0xc1d   :  { %v4541_v50 = vadd.f32 1e-05, %v4535_v31  ;;  %v6380_v31 = vld [vmem:[%s8064_s13 + $0x10] sm:$0xff]  }
 0xc1e   :  { %v4529_v34 = vpop.xlane.xlu0 %4528 }
 0xc1f   :  { %6517 = vrsqrt.f32 %v4541_v50  ;;  %v4536_v55 = vmul.f32 0.0078125, %v4529_v34  ;;  %v7734_v50 = vld [vmem:[%s8064_s13 + $0xd0] sm:$0xff]  }
 0xc20   :  { %v6512_v16 = vpop.eup %6511  ;;  %v7739_v34 = vld [vmem:[%s8064_s13 + $0x90] sm:$0xff]  }
 0xc21   :  { %v4542_v47 = vadd.f32 1e-05, %v4536_v55  ;;  %v4550_v10 = vmul.f32 %v6512_v16, %v7509_v60  ;;  %v6383_v55 = vld [vmem:[%s8064_s13 + $0x48] sm:$0xff]  }
 0xc22   :  { %v4531_v54 = vpop.xlane.xlu1 %4530  ;;  %v6384_v16 = vld [vmem:[%s8064_s13 + $0x8] sm:$0xff]  }
 0xc23   :  { %6519 = vrsqrt.f32 %v4542_v47  ;;  %v4537_v22 = vmul.f32 0.0078125, %v4531_v54  ;;  %v4562_v2 = vmul.f32 %v5701_v44, %v4550_v10  ;;  %v7752_v47 = vld [vmem:[%s8064_s13 + $0xc8] sm:$0xff]   ;;  %v6387_v54 = vld [vmem:[%s8064_s13 + $0x40] sm:$0xff]  }
 0xc24   :  { %v6514_v6 = vpop.eup %6513  ;;  %v7757_v10 = vld [vmem:[%s8064_s13 + $0x88] sm:$0xff]  }
 0xc25   :  { %v4543_v0 = vadd.f32 1e-05, %v4537_v22  ;;  %v4551_v25 = vmul.f32 %v6514_v6, %v7514_v63  ;;  %v4574_v60 = vadd.f32 %v5702_v56, %v4562_v2  ;;  %8115 = vst [vmem:[#allocation9_spill] sm:$0xff] %v7757_v10  ;;  %v7770_v22 = vld [vmem:[%s8064_s13 + $0xc0] sm:$0xff]  }
 0xc26   :  { %8116 = vst [vmem:[#allocation10_spill] sm:$0xff] %v7770_v22  ;;  %v7775_v6 = vld [vmem:[%s8064_s13 + $0x80] sm:$0xff]  }
 0xc27   :  { %6521 = vrsqrt.f32 %v4543_v0  ;;  %v4563_v28 = vmul.f32 %v5701_v44, %v4551_v25  ;;  %8117 = vst [vmem:[#allocation11_spill] sm:$0xff] %v7775_v6  ;;  %v4615_v0 = vld [vmem:[%s8065_s12] sm:$0xf] }
 0xc28   :  { %v6516_v35 = vpop.eup %6515  ;;  %v8118_v25 = vld [vmem:[#allocation2_spill] sm:$0xff] }
 0xc29   :  { %v4575_v13 = vadd.f32 %v5702_v56, %v4563_v28  ;;  %v4552_v61 = vmul.f32 %v6516_v35, %v7519_v20  ;;  %v8119_v2 = vsub.s32 0, %v8118_v25  ;;  %v8120_v28 = vsub.s32 2, %v8118_v25 }
 0xc2b   :  { %v4580_v15 = vpack.c.bf16 %v4575_v13, %v4574_v60  ;;  %v4564_v29 = vmul.f32 %v5701_v44, %v4552_v61  ;;  %v7788_v35 = vrot.slane %v4615_v0, %v8120_v28  ;;  %v4631_v60 = vsub.s32 3, %v8118_v25 }
 0xc2c   :  { %v6518_v57 = vpop.eup %6517 }
 0xc2d   :  { %4830 = vmatmul.mubr.bf16.vlgmr.msra.gmra.mxu1 %v4580_v15  ;;  %4893 = vmatmul.mubr.bf16.vlgmr.msra.gmra.mxu0 %v4580_v15  ;;  %v4553_v26 = vmul.f32 %v6518_v57, %v7524_v21  ;;  %v4576_v3 = vadd.f32 %v5702_v56, %v4564_v29  ;;  %v8121_v15 = vsub.s32 1, %v8118_v25 }
 0xc2e   :  { %4839 = vmatprep.mubr.bf16.mxu1 %v8108_v42  ;;  %4902 = vmatprep.mubr.bf16.mxu0 %v8108_v42 }
 0xc2f   :  { %v4565_v63 = vmul.f32 %v5701_v44, %v4553_v26  ;;  %v7793_v57 = vrot.slane %v4615_v0, %v8121_v15 }
 0xc30   :  { %v6520_v18 = vpop.eup %6519 }
 0xc31   :  { %v4577_v52 = vadd.f32 %v5702_v56, %v4565_v63  ;;  %v4554_v32 = vmul.f32 %v6520_v18, %v7529_v11  ;;  %v6359_v11 = vld [vmem:[%s8064_s13 + $0x78] sm:$0xff]   ;;  %v7801_v63 = vrot.slane %v4615_v0, %v4631_v60 }
 0xc32   :  { %5888 = vmatprep.subr.bf16.mxu1 %v6359_v11 }
 0xc33   :  { %v4581_v51 = vpack.c.bf16 %v4577_v52, %v4576_v3  ;;  %v4566_v36 = vmul.f32 %v5701_v44, %v4554_v32 }
 0xc34   :  { %v6522_v8 = vpop.eup %6521 }
 0xc35   :  { %4840 = vmatmul.mubr.bf16.gmra.mxu1 %v4581_v51  ;;  %4903 = vmatmul.mubr.bf16.gmra.mxu0 %v4581_v51  ;;  %v4555_v20 = vmul.f32 %v6522_v8, %v7546_v41  ;;  %v4578_v17 = vadd.f32 %v5702_v56, %v4566_v36  ;;  %v6360_v41 = vld [vmem:[%s8064_s13 + $0x38] sm:$0xff]  }
 0xc36   :  { %4849 = vmatprep.mubr.bf16.mxu1 %v8108_v42  ;;  %4912 = vmatprep.mubr.bf16.mxu0 %v8108_v42  ;;  %v7650_v42 = vld [vmem:[%s8064_s13 + $0xb8] sm:$0xff]  }
 0xc37   :  { %v4567_v21 = vmul.f32 %v5701_v44, %v4555_v20  ;;  %5889 = vmatpush3.bf16.msra.mxu1 %v6360_v41  ;;  %5923 = vmatpush3.bf16.msra.mxu0 %v7650_v42  ;;  %v6388_v44 = vld [vmem:[%s8064_s13] sm:$0xff]  }
 0xc38   :  { %5890 = vmatprep.subr.bf16.mxu1 %v6363_v30  ;;  %5924 = vmatprep.subr.bf16.mxu0 %v7662_v23 }
 0xc39   :  { %v4579_v7 = vadd.f32 %v5702_v56, %v4567_v21  ;;  %v7784_v56 = vrot.slane %v4615_v0, %v8119_v2 }
 0xc3b   :  { %v4582_v33 = vpack.c.bf16 %v4579_v7, %v4578_v17  ;;  %5891 = vmatpush3.bf16.msra.mxu1 %v6364_v27  ;;  %5925 = vmatpush3.bf16.msra.mxu0 %v7667_v39 }
 0xc3c   :  { %5892 = vmatprep.subr.bf16.mxu1 %v6367_v4  ;;  %5926 = vmatprep.subr.bf16.mxu0 %v7680_v46 }
 0xc3d   :  { %4850 = vmatmul.mubr.bf16.gmra.mxu1 %v4582_v33  ;;  %4913 = vmatmul.mubr.bf16.gmra.mxu0 %v4582_v33 }
 0xc3f   :  { %5893 = vmatpush3.bf16.msra.mxu1 %v6368_v53  ;;  %5927 = vmatpush3.bf16.msra.mxu0 %v7685_v59 }
 0xc40   :  { %5894 = vmatprep.subr.bf16.mxu1 %v6371_v9  ;;  %5928 = vmatprep.subr.bf16.mxu0 %v7698_v38 }
 0xc43   :  { %5895 = vmatpush3.bf16.msra.mxu1 %v6372_v14  ;;  %5929 = vmatpush3.bf16.msra.mxu0 %v7703_v45 }
 0xc44   :  { %5896 = vmatprep.subr.bf16.mxu1 %v6375_v40  ;;  %5930 = vmatprep.subr.bf16.mxu0 %v7716_v5 }
 0xc47   :  { %5897 = vmatpush3.bf16.msra.mxu1 %v6376_v12  ;;  %5931 = vmatpush3.bf16.msra.mxu0 %v7721_v24 }
 0xc48   :  { %5898 = vmatprep.subr.bf16.mxu1 %v6379_v37  ;;  %5932 = vmatprep.subr.bf16.mxu0 %v7734_v50 }
 0xc4b   :  { %5899 = vmatpush3.bf16.msra.mxu1 %v6380_v31  ;;  %5933 = vmatpush3.bf16.msra.mxu0 %v7739_v34 }
 0xc4c   :  { %5900 = vmatprep.subr.bf16.mxu1 %v6383_v55  ;;  %5934 = vmatprep.subr.bf16.mxu0 %v7752_v47 }
 0xc4f   :  { %5901 = vmatpush3.bf16.msra.mxu1 %v6384_v16  ;;  %5935 = vmatpush3.bf16.msra.mxu0 %v7757_v10 }
 0xc50   :  { %5902 = vmatprep.subr.bf16.mxu1 %v6387_v54  ;;  %5936 = vmatprep.subr.bf16.mxu0 %v7770_v22 }
 0xc53   :  { %5903 = vmatpush3.bf16.msra.mxu1 %v6388_v44  ;;  %5937 = vmatpush3.bf16.msra.mxu0 %v7775_v6 }
 0xc54   :  { %6252 = vmatprep.subr.bf16.mxu1 %v6361_v58 }
 0xced   :  { %v4831_v13 = vpop.f32.mrf.mxu1  ;;  %v4894_v61 = vpop.f32.mrf.mxu0 }
 0xcee   :  { %v7796_v26 = vadd.f32 %v4831_v13, %v7784_v56  ;;  %v7799_v29 = vadd.f32 %v4894_v61, %v7788_v35 }
 0xcef   :  { %v4833_v18 = vpop.f32.mrf.mxu1  ;;  %v4896_v3 = vpop.f32.mrf.mxu0 }
 0xcf0   :  { %v4923_v52 = vmul.f32 %v7796_v26, %v7796_v26  ;;  %v4925_v32 = vmul.f32 %v7799_v29, %v7799_v29  ;;  %v7808_v51 = vadd.f32 %v4833_v18, %v7793_v57  ;;  %v7813_v17 = vadd.f32 %v4896_v3, %v7801_v63 }
 0xcf1   :  { %v4835_v8 = vpop.f32.mrf.mxu1  ;;  %v4898_v20 = vpop.f32.mrf.mxu0 }
 0xcf2   :  { %v4947_v36 = vmul.f32 %v4923_v52, %v7796_v26  ;;  %v4949_v21 = vmul.f32 %v4925_v32, %v7799_v29  ;;  %v7816_v7 = vadd.f32 %v4835_v8, %v7784_v56  ;;  %v7819_v33 = vadd.f32 %v4898_v20, %v7788_v35 }
 0xcf3   :  { %v4837_v11 = vpop.f32.mrf.mxu1  ;;  %v4900_v41 = vpop.f32.mrf.mxu0  ;;  %v4924_v27 = vmul.f32 %v7808_v51, %v7808_v51  ;;  %v4926_v37 = vmul.f32 %v7813_v17, %v7813_v17 }
 0xcf4   :  { %v4971_v58 = vmul.f32 0.044715, %v4947_v36  ;;  %v4973_v30 = vmul.f32 0.044715, %v4949_v21  ;;  %v4927_v4 = vmul.f32 %v7816_v7, %v7816_v7  ;;  %v4929_v53 = vmul.f32 %v7819_v33, %v7819_v33 }
 0xcf5   :  { %v7828_v9 = vadd.f32 %v4837_v11, %v7793_v57  ;;  %v4841_v14 = vpop.f32.mrf.mxu1  ;;  %v4904_v40 = vpop.f32.mrf.mxu0  ;;  %v7834_v31 = vadd.f32 %v4900_v41, %v7801_v63  ;;  %v4948_v2 = vmul.f32 %v4924_v27, %v7808_v51  ;;  %v4950_v61 = vmul.f32 %v4926_v37, %v7813_v17 }
 0xcf6   :  { %v4995_v12 = vadd.f32 %v4971_v58, %v7796_v26  ;;  %v4997_v55 = vadd.f32 %v4973_v30, %v7799_v29  ;;  %v4951_v16 = vmul.f32 %v4927_v4, %v7816_v7  ;;  %v4953_v54 = vmul.f32 %v4929_v53, %v7819_v33 }
 0xcf7   :  { %v4928_v0 = vmul.f32 %v7828_v9, %v7828_v9  ;;  %v4843_v25 = vpop.f32.mrf.mxu1  ;;  %v4906_v13 = vpop.f32.mrf.mxu0  ;;  %v4930_v15 = vmul.f32 %v7834_v31, %v7834_v31  ;;  %v7846_v18 = vadd.f32 %v4841_v14, %v7784_v56  ;;  %v4972_v36 = vmul.f32 0.044715, %v4948_v2 }
 0xcf8   :  { %v5019_v44 = vmul.f32 0.7978846, %v4995_v12  ;;  %v4975_v28 = vmul.f32 0.044715, %v4951_v16  ;;  %v4977_v60 = vmul.f32 0.044715, %v4953_v54  ;;  %v7855_v30 = vadd.f32 %v4904_v40, %v7788_v35 }
 0xcf9   :  { %v5021_v3 = vmul.f32 0.7978846, %v4997_v55  ;;  %v4952_v32 = vmul.f32 %v4928_v0, %v7828_v9  ;;  %v4931_v8 = vmul.f32 %v7846_v18, %v7846_v18  ;;  %v4845_v20 = vpop.f32.mrf.mxu1  ;;  %v4908_v11 = vpop.f32.mrf.mxu0  ;;  %v4974_v41 = vmul.f32 0.044715, %v4950_v61 }
 0xcfa   :  { %6523 = vtanh.f32 %v5019_v44  ;;  %v4999_v52 = vadd.f32 %v4975_v28, %v7816_v7  ;;  %v5001_v21 = vadd.f32 %v4977_v60, %v7819_v33  ;;  %v4954_v58 = vmul.f32 %v4930_v15, %v7834_v31  ;;  %8122 = vst [vmem:[#allocation2_spill] sm:$0xff] %v7855_v30 }
 0xcfb   :  { %v7858_v27 = vadd.f32 %v4843_v25, %v7793_v57  ;;  %v4955_v4 = vmul.f32 %v4931_v8, %v7846_v18  ;;  %v7862_v53 = vadd.f32 %v4906_v13, %v7801_v63  ;;  %v7865_v14 = vadd.f32 %v4845_v20, %v7784_v56  ;;  %v4847_v55 = vpop.f32.mrf.mxu1  ;;  %v4910_v0 = vpop.f32.mrf.mxu0 }
 0xcfc   :  { %6525 = vtanh.f32 %v5021_v3  ;;  %v5023_v12 = vmul.f32 0.7978846, %v4999_v52  ;;  %v4976_v37 = vmul.f32 0.044715, %v4952_v32  ;;  %v5025_v16 = vmul.f32 0.7978846, %v5001_v21 }
 0xcfd   :  { %v4932_v40 = vmul.f32 %v7858_v27, %v7858_v27  ;;  %v4934_v54 = vmul.f32 %v7862_v53, %v7862_v53  ;;  %v4935_v44 = vmul.f32 %v7865_v14, %v7865_v14  ;;  %v4996_v25 = vadd.f32 %v4972_v36, %v7808_v51  ;;  %v7904_v1 = vpop.f32.mrf.mxu0 }
 0xcfe   :  { %v4998_v2 = vadd.f32 %v4974_v41, %v7813_v17  ;;  %v4978_v28 = vmul.f32 0.044715, %v4954_v58  ;;  %v4933_v60 = vmul.f32 %v7855_v30, %v7855_v30  ;;  %v4979_v13 = vmul.f32 0.044715, %v4955_v4  ;;  %v4851_v4 = vpop.f32.mrf.mxu1 }
 0xcff   :  { %v4956_v61 = vmul.f32 %v4932_v40, %v7858_v27  ;;  %v7879_v15 = vadd.f32 %v4908_v11, %v7788_v35  ;;  %v7882_v3 = vadd.f32 %v4847_v55, %v7793_v57  ;;  %6527 = vtanh.f32 %v5023_v12 }
 0xd00   :  { %v5000_v52 = vadd.f32 %v4976_v37, %v7828_v9  ;;  %v4959_v32 = vmul.f32 %v4935_v44, %v7865_v14  ;;  %v7887_v8 = vadd.f32 %v4910_v0, %v7801_v63  ;;  %6529 = vtanh.f32 %v5025_v16  ;;  %v4853_v43 = vpop.f32.mrf.mxu1 }
 0xd01   :  { %8123 = vst [vmem:[#allocation12_spill] sm:$0xff] %v7879_v15  ;;  %v4980_v20 = vmul.f32 0.044715, %v4956_v61  ;;  %v4958_v36 = vmul.f32 %v4934_v54, %v7862_v53  ;;  %v4936_v21 = vmul.f32 %v7882_v3, %v7882_v3  ;;  %v5020_v11 = vmul.f32 0.7978846, %v4996_v25 }
 0xd02   :  { %v5002_v41 = vadd.f32 %v4978_v28, %v7834_v31  ;;  %v4938_v58 = vmul.f32 %v7887_v8, %v7887_v8  ;;  %v5003_v12 = vadd.f32 %v4979_v13, %v7846_v18  ;;  %v4957_v37 = vmul.f32 %v4933_v60, %v7855_v30 }
 0xd03   :  { %v4937_v55 = vmul.f32 %v7879_v15, %v7879_v15  ;;  %v4960_v16 = vmul.f32 %v4936_v21, %v7882_v3  ;;  %v5022_v40 = vmul.f32 0.7978846, %v4998_v2  ;;  %v4983_v54 = vmul.f32 0.044715, %v4959_v32 }
 0xd04   :  { %v5024_v0 = vmul.f32 0.7978846, %v5000_v52  ;;  %v5004_v25 = vadd.f32 %v4980_v20, %v7858_v27  ;;  %v4982_v28 = vmul.f32 0.044715, %v4958_v36  ;;  %v7902_v61 = vadd.f32 %v4851_v4, %v7784_v56 }
 0xd05   :  { %6531 = vtanh.f32 %v5020_v11  ;;  %v5026_v13 = vmul.f32 0.7978846, %v5002_v41  ;;  %v4984_v60 = vmul.f32 0.044715, %v4960_v16  ;;  %v4962_v48 = vmul.f32 %v4938_v58, %v7887_v8  ;;  %v4916_v58 = vpop.f32.mrf.mxu0  ;;  %v4855_v16 = vpop.f32.mrf.mxu1 }
 0xd06   :  { %v5027_v49 = vmul.f32 0.7978846, %v5003_v12  ;;  %v4981_v21 = vmul.f32 0.044715, %v4957_v37  ;;  %v4961_v2 = vmul.f32 %v4937_v55, %v7879_v15  ;;  %v4939_v52 = vmul.f32 %v7902_v61, %v7902_v61 }
 0xd07   :  { %v6524_v44 = vpop.eup %6523  ;;  %6533 = vtanh.f32 %v5022_v40  ;;  %v5007_v20 = vadd.f32 %v4983_v54, %v7865_v14  ;;  %v5008_v36 = vadd.f32 %v4984_v60, %v7882_v3  ;;  %v5028_v11 = vmul.f32 0.7978846, %v5004_v25 }
 0xd08   :  { %v5067_v32 = vadd.f32 1.0, %v6524_v44  ;;  %6535 = vtanh.f32 %v5024_v0  ;;  %v5006_v41 = vadd.f32 %v4982_v28, %v7862_v53  ;;  %v4986_v37 = vmul.f32 0.044715, %v4962_v48 }
 0xd09   :  { %v6526_v4 = vpop.eup %6525  ;;  %6537 = vtanh.f32 %v5026_v13  ;;  %v5032_v12 = vmul.f32 0.7978846, %v5008_v36  ;;  %v4963_v55 = vmul.f32 %v4939_v52, %v7902_v61  ;;  %v5005_v44 = vadd.f32 %v4981_v21, %v7855_v30  ;;  %v4918_v13 = vpop.f32.mrf.mxu0 }
 0xd0a   :  { %6539 = vtanh.f32 %v5027_v49  ;;  %v4985_v40 = vmul.f32 0.044715, %v4961_v2  ;;  %v7916_v54 = vadd.f32 %v4853_v43, %v7793_v57  ;;  %v5091_v60 = vmul.f32 0.5, %v5067_v32  ;;  %v4857_v2 = vpop.f32.mrf.mxu1 }
 0xd0b   :  { %v5069_v62 = vadd.f32 1.0, %v6526_v4  ;;  %v5031_v0 = vmul.f32 0.7978846, %v5007_v20  ;;  %v4987_v25 = vmul.f32 0.044715, %v4963_v55  ;;  %6541 = vtanh.f32 %v5028_v11 }
 0xd0c   :  { %v6528_v19 = vpop.eup %6527  ;;  %v5030_v28 = vmul.f32 0.7978846, %v5006_v41  ;;  %v4940_v48 = vmul.f32 %v7916_v54, %v7916_v54  ;;  %6543 = vtanh.f32 %v5032_v12  ;;  %v5010_v49 = vadd.f32 %v4986_v37, %v7887_v8 }
 0xd0d   :  { %v6530_v52 = vpop.eup %6529  ;;  %v7922_v21 = vadd.f32 %v4916_v58, %v7801_v63  ;;  %v7925_v43 = vadd.f32 %v4855_v16, %v7784_v56  ;;  %v7927_v32 = vmul.f32 0.7978846, %v5005_v44  ;;  %v5009_v20 = vadd.f32 %v4985_v40, %v7879_v15  ;;  %v4920_v16 = vpop.f32.mrf.mxu0 }
 0xd0e   :  { %v5011_v36 = vadd.f32 %v4987_v25, %v7902_v61  ;;  %v4964_v4 = vmul.f32 %v4940_v48, %v7916_v54  ;;  %v7933_v11 = vmul.f32 %v5091_v60, %v7796_v26  ;;  %v7935_v41 = vmul.f32 0.5, %v5069_v62 }
 0xd0f   :  { %6545 = vtanh.f32 %v5031_v0  ;;  %v4943_v58 = vmul.f32 %v7925_v43, %v7925_v43  ;;  %v5071_v56 = vadd.f32 1.0, %v6528_v19  ;;  %v5073_v12 = vadd.f32 1.0, %v6530_v52 }
 0xd10   :  { %v4988_v37 = vmul.f32 0.044715, %v4964_v4  ;;  %v7940_v55 = vadd.f32 %v4857_v2, %v7793_v57  ;;  %6547 = vtanh.f32 %v5030_v28  ;;  %v5034_v44 = vmul.f32 0.7978846, %v5010_v49 }
 0xd11   :  { %v4942_v40 = vmul.f32 %v7922_v21, %v7922_v21  ;;  %v4967_v26 = vmul.f32 %v4943_v58, %v7925_v43  ;;  %v5035_v60 = vmul.f32 0.7978846, %v5011_v36  ;;  %v7947_v25 = vadd.f32 %v4918_v13, %v7788_v35 }
 0xd12   :  { %v6532_v62 = vpop.eup %6531  ;;  %v5012_v0 = vadd.f32 %v4988_v37, %v7916_v54  ;;  %v4944_v19 = vmul.f32 %v7940_v55, %v7940_v55  ;;  %v7951_v57 = vmul.f32 0.7978846, %v5009_v20  ;;  %v7955_v28 = vadd.f32 %v7904_v1, %v7788_v35 }
 0xd13   :  { %v4991_v48 = vmul.f32 0.044715, %v4967_v26  ;;  %v7958_v52 = vadd.f32 %v4920_v16, %v7801_v63  ;;  %v5095_v2 = vmul.f32 0.5, %v5071_v56  ;;  %v5097_v36 = vmul.f32 0.5, %v5073_v12 }
 0xd14   :  { %v6534_v49 = vpop.eup %6533  ;;  %v5036_v4 = vmul.f32 0.7978846, %v5012_v0  ;;  %v4968_v13 = vmul.f32 %v4944_v19, %v7940_v55  ;;  %6549 = vtanh.f32 %v5034_v44  ;;  %v4966_v37 = vmul.f32 %v4942_v40, %v7922_v21 }
 0xd15   :  { %v6536_v58 = vpop.eup %6535  ;;  %v5015_v20 = vadd.f32 %v4991_v48, %v7925_v43  ;;  %v4946_v1 = vmul.f32 %v7958_v52, %v7958_v52  ;;  %6551 = vtanh.f32 %v5035_v60  ;;  %v4945_v63 = vmul.f32 %v7947_v25, %v7947_v25 }
 0xd16   :  { %v6538_v35 = vpop.eup %6537  ;;  %v4992_v16 = vmul.f32 0.044715, %v4968_v13  ;;  %v5068_v56 = vadd.f32 1.0, %v6532_v62  ;;  %v4941_v26 = vmul.f32 %v7955_v28, %v7955_v28  ;;  %6553 = vtanh.f32 %v5036_v4 }
 0xd17   :  { %v6540_v12 = vpop.eup %6539  ;;  %v5039_v44 = vmul.f32 0.7978846, %v5015_v20  ;;  %v4970_v40 = vmul.f32 %v4946_v1, %v7958_v52  ;;  %v5119_v0 = vmul.f32 %v5095_v2, %v7816_v7  ;;  %v5121_v19 = vmul.f32 %v5097_v36, %v7819_v33 }
 0xd18   :  { %v5016_v48 = vadd.f32 %v4992_v16, %v7940_v55  ;;  %v5072_v60 = vadd.f32 1.0, %v6536_v58  ;;  %v6542_v6 = vpop.eup %6541  ;;  %v4990_v30 = vmul.f32 0.044715, %v4966_v37  ;;  %v5092_v62 = vmul.f32 0.5, %v5068_v56 }
 0xd19   :  { %6555 = vtanh.f32 %v5039_v44  ;;  %v4994_v13 = vmul.f32 0.044715, %v4970_v40  ;;  %v6544_v22 = vpop.eup %6543  ;;  %v4969_v15 = vmul.f32 %v4945_v63, %v7947_v25  ;;  %v5070_v20 = vadd.f32 1.0, %v6534_v49 }
 0xd1a   :  { %v5040_v10 = vmul.f32 0.7978846, %v5016_v48  ;;  %v5096_v4 = vmul.f32 0.5, %v5072_v60  ;;  %v4965_v1 = vmul.f32 %v4941_v26, %v7955_v28  ;;  %v5116_v33 = vmul.f32 %v5092_v62, %v7808_v51 }
 0xd1b   :  { %v5018_v7 = vadd.f32 %v4994_v13, %v7958_v52  ;;  %v5074_v2 = vadd.f32 1.0, %v6538_v35  ;;  %v5094_v37 = vmul.f32 0.5, %v5070_v20  ;;  %v5076_v16 = vadd.f32 1.0, %v6542_v6 }
 0xd1c   :  { %v6546_v36 = vpop.eup %6545  ;;  %6557 = vtanh.f32 %v5040_v10  ;;  %v5120_v58 = vmul.f32 %v5096_v4, %v7828_v9  ;;  %v5139_v56 = vpack.c.bf16 %v5119_v0, %v7933_v11  ;;  %v5014_v63 = vadd.f32 %v4990_v30, %v7922_v21 }
 0xd1d   :  { %v5098_v44 = vmul.f32 0.5, %v5074_v2  ;;  %v5080_v40 = vadd.f32 1.0, %v6544_v22  ;;  %v6548_v49 = vpop.eup %6547  ;;  %v4993_v48 = vmul.f32 0.044715, %v4969_v15  ;;  %v5100_v60 = vmul.f32 0.5, %v5076_v16 }
 0xd1e   :  { %v5140_v26 = vpack.c.bf16 %v5120_v58, %v5116_v33  ;;  %v5075_v13 = vadd.f32 1.0, %v6540_v12  ;;  %v5118_v51 = vmul.f32 %v5094_v37, %v7813_v17  ;;  %v5079_v62 = vadd.f32 1.0, %v6546_v36 }
 0xd1f   :  { %v5122_v35 = vmul.f32 %v5098_v44, %v7834_v31  ;;  %v5104_v10 = vmul.f32 0.5, %v5080_v40  ;;  %v5117_v6 = vmul.f32 %v7935_v41, %v7799_v29  ;;  %v4989_v9 = vmul.f32 0.044715, %v4965_v1 }
 0xd20   :  { %v5042_v11 = vmul.f32 0.7978846, %v5018_v7  ;;  %5446 = vmatprep.mubr.bf16.mxu1 %v5140_v26  ;;  %v5124_v30 = vmul.f32 %v5100_v60, %v7858_v27  ;;  %v5099_v0 = vmul.f32 0.5, %v5075_v13  ;;  %v5103_v12 = vmul.f32 0.5, %v5079_v62 }
 0xd21   :  { %v5142_v22 = vpack.c.bf16 %v5122_v35, %v5118_v51  ;;  %5447 = vmatmul.mubr.bf16.vlgmr.msra.gmra.mxu1 %v5139_v56  ;;  %v5128_v15 = vmul.f32 %v5104_v10, %v7882_v3  ;;  %v6550_v4 = vpop.eup %6549  ;;  %v5141_v17 = vpack.c.bf16 %v5121_v19, %v5117_v6  ;;  %v5038_v20 = vmul.f32 0.7978846, %v5014_v63 }
 0xd22   :  { %6260 = vmatpush3.bf16.msra.mxu1 %v7650_v42  ;;  %v6552_v31 = vpop.eup %6551  ;;  %6559 = vtanh.f32 %v7951_v57  ;;  %v5017_v29 = vadd.f32 %v4993_v48, %v7947_v25  ;;  %v5127_v41 = vmul.f32 %v5103_v12, %v7865_v14  ;;  %v5013_v3 = vadd.f32 %v4989_v9, %v7955_v28 }
 0xd23   :  { %5503 = vmatprep.mubr.bf16.mxu0 %v5142_v22  ;;  %6253 = vmatprep.subr.bf16.mxu1 %v7662_v23  ;;  %v5144_v27 = vpack.c.bf16 %v5128_v15, %v5124_v30  ;;  %v6554_v1 = vpop.eup %6553  ;;  %6561 = vtanh.f32 %v5042_v11  ;;  %v5123_v42 = vmul.f32 %v5099_v0, %v7846_v18  ;;  %v5082_v7 = vadd.f32 1.0, %v6550_v4  ;;  %v8125_v11 = vld [vmem:[#allocation12_spill] sm:$0xff]  ;;  %v8126_v22 = vld [vmem:[#allocation10_spill] sm:$0xff]  ;;  %v8128_v4 = vld [vmem:[#allocation11_spill] sm:$0xff] }
 0xd24   :  { %5504 = vmatmul.mubr.bf16.vlgmr.msra.gmra.mxu0 %v5141_v17  ;;  %6563 = vtanh.f32 %v7927_v32  ;;  %v5084_v57 = vadd.f32 1.0, %v6554_v1  ;;  %v5041_v23 = vmul.f32 0.7978846, %v5017_v29  ;;  %v5083_v33 = vadd.f32 1.0, %v6552_v31  ;;  %v8127_v0 = vld [vmem:[#allocation2_spill] sm:$0xff] }
 0xd25   :  { %5454 = vmatprep.mubr.bf16.mxu1 %v5144_v27  ;;  %6565 = vtanh.f32 %v5038_v20  ;;  %v5143_v14 = vpack.c.bf16 %v5127_v41, %v5123_v42  ;;  %v5078_v36 = vadd.f32 1.0, %v6548_v49  ;;  %v5037_v32 = vmul.f32 0.7978846, %v5013_v3  ;;  %v5735_v3 = vld [vmem:[%s8066_s14] ss:$0 sm:$0xff] }
 0xd26   :  { %v6556_v19 = vpop.eup %6555  ;;  %6261 = vmatpush3.bf16.msra.mxu1 %v7667_v39  ;;  %v5108_v16 = vmul.f32 0.5, %v5084_v57  ;;  %v5106_v56 = vmul.f32 0.5, %v5082_v7  ;;  %6567 = vtanh.f32 %v5041_v23  ;;  %v5107_v39 = vmul.f32 0.5, %v5083_v33 }
 0xd27   :  { %6254 = vmatprep.subr.bf16.mxu1 %v7680_v46  ;;  %v5087_v2 = vadd.f32 1.0, %v6556_v19  ;;  %v5102_v44 = vmul.f32 0.5, %v5078_v36  ;;  %6569 = vtanh.f32 %v5037_v32 }
 0xd28   :  { %v5132_v40 = vmul.f32 %v5108_v16, %v7916_v54  ;;  %v5131_v48 = vmul.f32 %v5107_v39, %v7902_v61 }
 0xd29   :  { %v6558_v58 = vpop.eup %6557  ;;  %5455 = vmatmul.mubr.bf16.gmra.mxu1 %v5143_v14  ;;  %v5111_v37 = vmul.f32 0.5, %v5087_v2  ;;  %v5126_v60 = vmul.f32 %v5102_v44, %v7862_v53 }
 0xd2a   :  { %6262 = vmatpush3.bf16.msra.mxu1 %v7685_v59  ;;  %v5088_v18 = vadd.f32 1.0, %v6558_v58  ;;  %v5130_v59 = vmul.f32 %v5106_v56, %v7887_v8 }
 0xd2b   :  { %6255 = vmatprep.subr.bf16.mxu1 %v7698_v38  ;;  %v5135_v46 = vmul.f32 %v5111_v37, %v7925_v43 }
 0xd2c   :  { %v5112_v63 = vmul.f32 0.5, %v5088_v18 }
 0xd2d   :  { %v5147_v51 = vpack.c.bf16 %v5135_v46, %v5131_v48 }
 0xd2e   :  { %6263 = vmatpush3.bf16.msra.mxu1 %v7703_v45  ;;  %v5136_v49 = vmul.f32 %v5112_v63, %v7940_v55  ;;  %v5146_v45 = vpack.c.bf16 %v5130_v59, %v5126_v60 }
 0xd2f   :  { %6256 = vmatprep.subr.bf16.mxu1 %v7716_v5  ;;  %v6560_v26 = vpop.eup %6559 }
 0xd30   :  { %v5148_v38 = vpack.c.bf16 %v5136_v49, %v5132_v40  ;;  %v6562_v13 = vpop.eup %6561  ;;  %v5081_v43 = vadd.f32 1.0, %v6560_v26 }
 0xd31   :  { %v6564_v35 = vpop.eup %6563  ;;  %v5090_v5 = vadd.f32 1.0, %v6562_v13 }
 0xd32   :  { %5462 = vmatprep.mubr.bf16.mxu1 %v5148_v38  ;;  %6264 = vmatpush3.bf16.msra.mxu1 %v7721_v24  ;;  %v6566_v54 = vpop.eup %6565  ;;  %v5077_v8 = vadd.f32 1.0, %v6564_v35  ;;  %v5105_v55 = vmul.f32 0.5, %v5081_v43  ;;  %v8124_v24 = vld [vmem:[#allocation9_spill] sm:$0xff] }
 0xd33   :  { %5463 = vmatmul.mubr.bf16.gmra.mxu1 %v5147_v51  ;;  %6257 = vmatprep.subr.bf16.mxu1 %v7734_v50  ;;  %v5086_v61 = vadd.f32 1.0, %v6566_v54  ;;  %v6568_v53 = vpop.eup %6567  ;;  %v5114_v10 = vmul.f32 0.5, %v5090_v5 }
 0xd34   :  { %5511 = vmatprep.mubr.bf16.mxu1 %v5146_v45  ;;  %v5101_v62 = vmul.f32 0.5, %v5077_v8  ;;  %v6570_v6 = vpop.eup %6569  ;;  %v5129_v30 = vmul.f32 %v5105_v55, %v8125_v11  ;;  %v5089_v50 = vadd.f32 1.0, %v6568_v53 }
 0xd35   :  { %v5110_v9 = vmul.f32 0.5, %v5086_v61  ;;  %v5138_v15 = vmul.f32 %v5114_v10, %v7958_v52  ;;  %v5085_v12 = vadd.f32 1.0, %v6570_v6 }
 0xd36   :  { %6265 = vmatpush3.bf16.msra.mxu1 %v7739_v34  ;;  %v5125_v34 = vmul.f32 %v5101_v62, %v8127_v0  ;;  %v5113_v20 = vmul.f32 0.5, %v5089_v50 }
 0xd37   :  { %6258 = vmatprep.subr.bf16.mxu1 %v7752_v47  ;;  %v5134_v47 = vmul.f32 %v5110_v9, %v7922_v21  ;;  %v5109_v29 = vmul.f32 0.5, %v5085_v12 }
 0xd38   :  { %v5145_v17 = vpack.c.bf16 %v5129_v30, %v5125_v34  ;;  %v5137_v27 = vmul.f32 %v5113_v20, %v7947_v25 }
 0xd39   :  { %v5150_v31 = vpack.c.bf16 %v5138_v15, %v5134_v47  ;;  %v5133_v41 = vmul.f32 %v5109_v29, %v7955_v28 }
 0xd3a   :  { %6266 = vmatpush3.bf16.msra.mxu1 %v8124_v24 }
 0xd3b   :  { %6259 = vmatprep.subr.bf16.mxu1 %v8126_v22  ;;  %v5149_v1 = vpack.c.bf16 %v5137_v27, %v5133_v41 }
 0xd3e   :  { %6267 = vmatpush3.bf16.msra.mxu1 %v8128_v4 }
 0xd41   :  { %5512 = vmatmul.mubr.bf16.vlgmr.msra.gmra.mxu1 %v5145_v17 }
 0xd42   :  { %5519 = vmatprep.mubr.bf16.mxu1 %v5150_v31 }
 0xd49   :  { %5520 = vmatmul.mubr.bf16.gmra.mxu1 %v5149_v1 }
 0xde1   :  { %v5904_v52 = vpop.f32.mrf.mxu1 }
 0xde3   :  { %v5905_v42 = vpop.f32.mrf.mxu1 }
 0xde4   :  { %v5938_v19 = vpop.f32.mrf.mxu0  ;;  %v5906_v21 = vadd.f32 %v5905_v42, %v5904_v52 }
 0xde5   :  { %v5907_v57 = vpop.f32.mrf.mxu1 }
 0xde6   :  { %v5449_v7 = vadd.f32 %v5906_v21, %v5735_v3  ;;  %v5939_v23 = vpop.f32.mrf.mxu0 }
 0xde7   :  { %v5940_v14 = vadd.f32 %v5939_v23, %v5938_v19  ;;  %v5908_v33 = vpop.f32.mrf.mxu1 }
 0xde8   :  { %v5941_v2 = vpop.f32.mrf.mxu0  ;;  %v5909_v36 = vadd.f32 %v5908_v33, %v5907_v57 }
 0xde9   :  { %v5910_v25 = vpop.f32.mrf.mxu1  ;;  %v5506_v58 = vadd.f32 %v5940_v14, %v5449_v7 }
 0xdea   :  { %v5452_v28 = vadd.f32 %v5909_v36, %v5735_v3  ;;  %v5942_v32 = vpop.f32.mrf.mxu0 }
 0xdeb   :  { %v5943_v37 = vadd.f32 %v5942_v32, %v5941_v2  ;;  %5530 = vadd.xlane.f32.xlu0 %v5506_v58  ;;  %v5911_v18 = vpop.f32.mrf.mxu1 }
 0xdec   :  { %v5912_v49 = vadd.f32 %v5911_v18, %v5910_v25 }
 0xded   :  { %v5913_v16 = vpop.f32.mrf.mxu1  ;;  %v5509_v56 = vadd.f32 %v5943_v37, %v5452_v28  ;;  %v5768_v37 = vld [vmem:[%s8067_s15] ss:$0 sm:$0xff] }
 0xdee   :  { %v5457_v26 = vadd.f32 %v5912_v49, %v5735_v3 }
 0xdef   :  { %5532 = vadd.xlane.f32.xlu1 %v5509_v56  ;;  %v5914_v39 = vpop.f32.mrf.mxu1 }
 0xdf0   :  { %v5915_v38 = vadd.f32 %v5914_v39, %v5913_v16  ;;  %v5769_v16 = vld [vmem:[%s8068_s16] ss:$0 sm:$0xff] }
 0xdf2   :  { %v5460_v45 = vadd.f32 %v5915_v38, %v5735_v3 }
 0xdf3   :  { %v5916_v63 = vpop.f32.mrf.mxu1 }
 0xdf5   :  { %v5917_v44 = vpop.f32.mrf.mxu1 }
 0xdf6   :  { %v5918_v54 = vadd.f32 %v5917_v44, %v5916_v63 }
 0xdf7   :  { %v5919_v46 = vpop.f32.mrf.mxu1 }
 0xdf8   :  { %v5465_v55 = vadd.f32 %v5918_v54, %v5735_v3 }
 0xdf9   :  { %v5920_v40 = vpop.f32.mrf.mxu1 }
 0xdfa   :  { %v5921_v53 = vadd.f32 %v5920_v40, %v5919_v46  ;;  %v8129_v46 = vld [vmem:[#allocation3_spill] sm:$0xff] }
 0xdfc   :  { %v5468_v9 = vadd.f32 %v5921_v53, %v5735_v3 }
 0xe01   :  { %v5944_v59 = vpop.f32.mrf.mxu1 }
 0xe03   :  { %v5945_v48 = vpop.f32.mrf.mxu1 }
 0xe04   :  { %v5946_v60 = vadd.f32 %v5945_v48, %v5944_v59  ;;  %v8130_v48 = vld [vmem:[#allocation4_spill] sm:$0xff] }
 0xe05   :  { %v5947_v13 = vpop.f32.mrf.mxu1 }
 0xe06   :  { %v5514_v51 = vadd.f32 %v5946_v60, %v5457_v26 }
 0xe07   :  { %v5948_v35 = vpop.f32.mrf.mxu1 }
 0xe08   :  { %v5949_v43 = vadd.f32 %v5948_v35, %v5947_v13  ;;  %5534 = vadd.xlane.f32.xlu0 %v5514_v51 }
 0xe09   :  { %v5950_v5 = vpop.f32.mrf.mxu1 }
 0xe0a   :  { %v5517_v8 = vadd.f32 %v5949_v43, %v5460_v45 }
 0xe0b   :  { %v5951_v61 = vpop.f32.mrf.mxu1 }
 0xe0c   :  { %v5952_v10 = vadd.f32 %v5951_v61, %v5950_v5  ;;  %5536 = vadd.xlane.f32.xlu1 %v5517_v8 }
 0xe0d   :  { %v5953_v62 = vpop.f32.mrf.mxu1 }
 0xe0e   :  { %v5522_v6 = vadd.f32 %v5952_v10, %v5465_v55 }
 0xe0f   :  { %v5954_v24 = vpop.f32.mrf.mxu1 }
 0xe10   :  { %v5955_v11 = vadd.f32 %v5954_v24, %v5953_v62  ;;  %5538 = vadd.xlane.f32.xlu0 %v5522_v6 }
 0xe12   :  { %v5525_v30 = vadd.f32 %v5955_v11, %v5468_v9  ;;  %v8131_v11 = vld [vmem:[#allocation5_spill] sm:$0xff] }
 0xe14   :  { %5540 = vadd.xlane.f32.xlu1 %v5525_v30 }
 0xe74   :  { %v5531_v22 = vpop.xlane.xlu0 %5530 }
 0xe75   :  { %v5542_v50 = vmul.f32 0.0078125, %v5531_v22 }
 0xe77   :  { %v5548_v15 = vsub.f32 %v5506_v58, %v5542_v50 }
 0xe78   :  { %v5533_v0 = vpop.xlane.xlu1 %5532 }
 0xe79   :  { %v5543_v34 = vmul.f32 0.0078125, %v5533_v0  ;;  %v5554_v12 = vmul.f32 %v5548_v15, %v5548_v15 }
 0xe7b   :  { %v5549_v4 = vsub.f32 %v5509_v56, %v5543_v34  ;;  %5560 = vadd.xlane.f32.xlu0 %v5554_v12  ;;  %v8132_v34 = vld [vmem:[#allocation6_spill] sm:$0xff] }
 0xe7d   :  { %v5555_v47 = vmul.f32 %v5549_v4, %v5549_v4 }
 0xe7f   :  { %5562 = vadd.xlane.f32.xlu1 %v5555_v47 }
 0xe91   :  { %v5535_v17 = vpop.xlane.xlu0 %5534 }
 0xe92   :  { %v5544_v20 = vmul.f32 0.0078125, %v5535_v17 }
 0xe94   :  { %v5550_v31 = vsub.f32 %v5514_v51, %v5544_v20 }
 0xe95   :  { %v5537_v29 = vpop.xlane.xlu1 %5536 }
 0xe96   :  { %v5545_v27 = vmul.f32 0.0078125, %v5537_v29  ;;  %v5556_v41 = vmul.f32 %v5550_v31, %v5550_v31 }
 0xe98   :  { %v5551_v1 = vsub.f32 %v5517_v8, %v5545_v27  ;;  %5564 = vadd.xlane.f32.xlu0 %v5556_v41 }
 0xe99   :  { %v5539_v52 = vpop.xlane.xlu0 %5538 }
 0xe9a   :  { %v5546_v3 = vmul.f32 0.0078125, %v5539_v52  ;;  %v5557_v42 = vmul.f32 %v5551_v1, %v5551_v1 }
 0xe9c   :  { %v5552_v19 = vsub.f32 %v5522_v6, %v5546_v3  ;;  %5566 = vadd.xlane.f32.xlu1 %v5557_v42 }
 0xe9d   :  { %v5541_v21 = vpop.xlane.xlu1 %5540 }
 0xe9e   :  { %v5547_v57 = vmul.f32 0.0078125, %v5541_v21  ;;  %v5558_v7 = vmul.f32 %v5552_v19, %v5552_v19 }
 0xea0   :  { %v5553_v23 = vsub.f32 %v5525_v30, %v5547_v57  ;;  %5568 = vadd.xlane.f32.xlu0 %v5558_v7 }
 0xea2   :  { %v5559_v14 = vmul.f32 %v5553_v23, %v5553_v23 }
 0xea4   :  { %5570 = vadd.xlane.f32.xlu1 %v5559_v14 }
 0xf04   :  { %v5561_v33 = vpop.xlane.xlu0 %5560 }
 0xf05   :  { %v5572_v2 = vmul.f32 0.0078125, %v5561_v33 }
 0xf07   :  { %v5578_v36 = vadd.f32 1e-05, %v5572_v2 }
 0xf08   :  { %v5563_v25 = vpop.xlane.xlu1 %5562 }
 0xf09   :  { %6571 = vrsqrt.f32 %v5578_v36  ;;  %v5573_v58 = vmul.f32 0.0078125, %v5563_v25 }
 0xf0b   :  { %v5579_v28 = vadd.f32 1e-05, %v5573_v58 }
 0xf0d   :  { %6573 = vrsqrt.f32 %v5579_v28 }
 0xf16   :  { %v6572_v32 = vpop.eup %6571 }
 0xf17   :  { %v5590_v18 = vmul.f32 %v6572_v32, %v5548_v15 }
 0xf19   :  { %v5602_v56 = vmul.f32 %v5768_v37, %v5590_v18 }
 0xf1a   :  { %v6574_v39 = vpop.eup %6573 }
 0xf1b   :  { %v5614_v63 = vadd.f32 %v5769_v16, %v5602_v56  ;;  %v5591_v44 = vmul.f32 %v6574_v39, %v5549_v4 }
 0xf1d   :  { %v5620_v40 = vadd.f32 %v5614_v63, %v8129_v46  ;;  %v5603_v49 = vmul.f32 %v5768_v37, %v5591_v44 }
 0xf1f   :  { %5626 = vst [vmem:[%s8069_s17] sm:$0xff] %v5620_v40  ;;  %v5615_v59 = vadd.f32 %v5769_v16, %v5603_v49 }
 0xf21   :  { %v5621_v26 = vadd.f32 %v5615_v59, %v8130_v48  ;;  %v5565_v38 = vpop.xlane.xlu0 %5564 }
 0xf22   :  { %v5574_v60 = vmul.f32 0.0078125, %v5565_v38 }
 0xf23   :  { %5627 = vst [vmem:[%s8069_s17 + $0x8] sm:$0xff] %v5621_v26 }
 0xf24   :  { %v5580_v13 = vadd.f32 1e-05, %v5574_v60 }
 0xf25   :  { %v5567_v51 = vpop.xlane.xlu1 %5566 }
 0xf26   :  { %6575 = vrsqrt.f32 %v5580_v13  ;;  %v5575_v35 = vmul.f32 0.0078125, %v5567_v51 }
 0xf28   :  { %v5581_v45 = vadd.f32 1e-05, %v5575_v35 }
 0xf29   :  { %v5569_v54 = vpop.xlane.xlu0 %5568 }
 0xf2a   :  { %6577 = vrsqrt.f32 %v5581_v45  ;;  %v5576_v43 = vmul.f32 0.0078125, %v5569_v54 }
 0xf2c   :  { %v5582_v5 = vadd.f32 1e-05, %v5576_v43 }
 0xf2d   :  { %v5571_v8 = vpop.xlane.xlu1 %5570 }
 0xf2e   :  { %6579 = vrsqrt.f32 %v5582_v5  ;;  %v5577_v61 = vmul.f32 0.0078125, %v5571_v8 }
 0xf30   :  { %v5583_v55 = vadd.f32 1e-05, %v5577_v61 }
 0xf32   :  { %6581 = vrsqrt.f32 %v5583_v55 }
 0xf33   :  { %v6576_v53 = vpop.eup %6575 }
 0xf34   :  { %v5592_v10 = vmul.f32 %v6576_v53, %v5550_v31  ;;  %v8133_v31 = vld [vmem:[#allocation7_spill] sm:$0xff] }
 0xf36   :  { %v5604_v62 = vmul.f32 %v5768_v37, %v5592_v10 }
 0xf37   :  { %v6578_v6 = vpop.eup %6577 }
 0xf38   :  { %v5616_v24 = vadd.f32 %v5769_v16, %v5604_v62  ;;  %v5593_v9 = vmul.f32 %v6578_v6, %v5551_v1  ;;  %v8134_v1 = vld [vmem:[#allocation8_spill] sm:$0xff] }
 0xf3a   :  { %v5622_v30 = vadd.f32 %v5616_v24, %v8131_v11  ;;  %v5605_v22 = vmul.f32 %v5768_v37, %v5593_v9 }
 0xf3b   :  { %v6580_v50 = vpop.eup %6579 }
 0xf3c   :  { %5628 = vst [vmem:[%s8069_s17 + $0x10] sm:$0xff] %v5622_v30  ;;  %v5617_v15 = vadd.f32 %v5769_v16, %v5605_v22  ;;  %v5594_v0 = vmul.f32 %v6580_v50, %v5552_v19 }
 0xf3e   :  { %v5623_v12 = vadd.f32 %v5617_v15, %v8132_v34  ;;  %v5606_v4 = vmul.f32 %v5768_v37, %v5594_v0 }
 0xf3f   :  { %v6582_v47 = vpop.eup %6581 }
 0xf40   :  { %5629 = vst [vmem:[%s8069_s17 + $0x18] sm:$0xff] %v5623_v12  ;;  %v5618_v17 = vadd.f32 %v5769_v16, %v5606_v4  ;;  %v5595_v20 = vmul.f32 %v6582_v47, %v5553_v23 }
 0xf42   :  { %v5624_v29 = vadd.f32 %v5618_v17, %v8133_v31  ;;  %v5607_v27 = vmul.f32 %v5768_v37, %v5595_v20 }
 0xf44   :  { %5630 = vst [vmem:[%s8069_s17 + $0x20] sm:$0xff] %v5624_v29  ;;  %v5619_v41 = vadd.f32 %v5769_v16, %v5607_v27 }
 0xf46   :  { %v5625_v52 = vadd.f32 %v5619_v41, %v8134_v1 }
 0xf48   :  { %5631 = vst [vmem:[%s8069_s17 + $0x28] sm:$0xff] %v5625_v52 }

</bundles_post_ra>
